<compile_context>
chip_gen: v6e
topology: v6e:2x2x1
jax: 0.10.0
libtpu: 0.0.40
codegen_flags: <defaults>
</compile_context>

<pallas_src>
import numpy as np
import jax
import jax.numpy as jnp
from jax.experimental import pallas as pl
from jax.experimental.pallas import tpu as pltpu

KH = KW = 3  # 3x3 convs, stride 1, padding 1


# ----------------------------- Pallas kernel -------------------------------

def _sandwich_kernel(x_ref, m1_ref, b1_ref, m2_ref, b2_ref, m3_ref, b3_ref,
                     o_ref):
    """relu(relu(x@M1+B1)@M2+B2)@M3+B3 — three MXU matmuls, two ReLUs."""
    h1 = jnp.dot(x_ref[...], m1_ref[...], preferred_element_type=jnp.float32)
    h1 = jnp.maximum(h1 + b1_ref[...], 0.0)                    # (B, C*HW)
    h2 = jnp.dot(h1, m2_ref[...], preferred_element_type=jnp.float32)
    h2 = jnp.maximum(h2 + b2_ref[...], 0.0)                    # (B, C*HW)
    out = jnp.dot(h2, m3_ref[...], preferred_element_type=jnp.float32)
    o_ref[...] = (out + b3_ref[...]).astype(o_ref.dtype)       # (B, HW)


# ------------------------------- wrapper ------------------------------------

def sandwich_forward(x_nchw, params):
    """x_nchw: (B, 1, H, W) f32 -> (B, 1, H, W) f32.  Single fused pallas_call."""
    B = x_nchw.shape[0]
    H, W = x_nchw.shape[-2], x_nchw.shape[-1]
    HW = H * W
    x_flat = x_nchw.reshape(B, HW).astype(jnp.float32)          # lane-dense rows

    vmem = pl.BlockSpec(memory_space=pltpu.MemorySpace.VMEM)
    y = pl.pallas_call(
        _sandwich_kernel,
        out_shape=jax.ShapeDtypeStruct((B, HW), jnp.float32),
        in_specs=[vmem] * 7,
        out_specs=vmem,
    )(x_flat,
      params["M1"], params["B1"],
      params["M2"], params["B2"],
      params["M3"], params["B3"])
    return y.reshape(B, 1, H, W)


# ------------------- host-side conv -> matrix precomposition ----------------

def conv_to_matrix(w_oihw, H, W):
    """PyTorch Conv2d(3x3, pad=1, stride=1) weight (Cout,Cin,3,3) -> dense
    matrix M in R^(Cin*HW x Cout*HW) for the row-vector convention
    y_flat = x_flat @ M, with channel-major flattening (c*HW + h*W + w)."""
    w = np.asarray(w_oihw, np.float32)
    cout, cin, _, _ = w.shape
    HW = H * W
    oh, ow = np.meshgrid(np.arange(H), np.arange(W), indexing="ij")
    out_pos = (oh * W + ow).ravel()
    M = np.zeros((cin * HW, cout * HW), np.float32)
    for dh in (-1, 0, 1):
        for dw in (-1, 0, 1):
            ih, iw = oh + dh, ow + dw
            valid = ((ih >= 0) & (ih < H) & (iw >= 0) & (iw < W)).ravel()
            in_pos = (np.clip(ih, 0, H - 1) * W + np.clip(iw, 0, W - 1)).ravel()
            ipos, opos = in_pos[valid], out_pos[valid]
            for co in range(cout):
                for ci in range(cin):
                    M[ci * HW + ipos, co * HW + opos] += float(
                        w[co, ci, dh + 1, dw + 1])
    return M


def conv_bias_full(b, HW):
    """(Cout,) bias -> (Cout*HW,) channel-major broadcast bias."""
    return np.repeat(np.asarray(b, np.float32), HW)


def init_params(key, H, W, C):
    HW = H * W
    ks = jax.random.split(key, 9)

    def conv_init(kw_key, kb_key, cout, cin):
        scale = 1.0 / float((cin * KH * KW) ** 0.5)
        w = np.asarray(jax.random.normal(kw_key, (cout, cin, KH, KW),
                                         jnp.float32)) * scale
        b = np.asarray(jax.random.normal(kb_key, (cout,), jnp.float32)) * 0.01
        return w, b

    w1, b1 = conv_init(ks[0], ks[1], C, 1)   # u_net_1 conv1: 1 -> C
    w2, b2 = conv_init(ks[2], ks[3], 1, C)   # u_net_1 conv2: C -> 1
    w3, b3 = conv_init(ks[4], ks[5], C, 1)   # u_net_2 conv1: 1 -> C
    w4, b4 = conv_init(ks[6], ks[7], 1, C)   # u_net_2 conv2: C -> 1
    A = (np.asarray(jax.random.normal(ks[8], (HW, HW), jnp.float32))
         / float(HW ** 0.5))                  # dense adjoint stand-in

    raw = dict(w1=w1, b1=b1, w2=w2, b2=b2, w3=w3, b3=b3, w4=w4, b4=b4, A=A)

    # ---- precompose the linear segments (review's top optimization) --------
    M1 = conv_to_matrix(w1, H, W)            # (HW,   C*HW)
    B1 = conv_bias_full(b1, HW)              # (C*HW,)
    Mc2 = conv_to_matrix(w2, H, W)           # (C*HW, HW)
    Bc2 = conv_bias_full(b2, HW)             # (HW,)
    Mc3 = conv_to_matrix(w3, H, W)           # (HW,   C*HW)
    Bc3 = conv_bias_full(b3, HW)             # (C*HW,)
    M3 = conv_to_matrix(w4, H, W)            # (C*HW, HW)
    B3 = conv_bias_full(b4, HW)              # (HW,)

    M2 = Mc2 @ A @ Mc3                       # conv2 ∘ adjoint ∘ conv3
    B2 = (Bc2 @ A) @ Mc3 + Bc3

    params = {
        "M1": jnp.asarray(M1), "B1": jnp.asarray(B1).reshape(1, -1),
        "M2": jnp.asarray(M2), "B2": jnp.asarray(B2).reshape(1, -1),
        "M3": jnp.asarray(M3), "B3": jnp.asarray(B3).reshape(1, -1),
    }
    return params, raw


# ------------------------- independent numpy reference ----------------------

def _np_conv3x3_same(x_chw, w_oihw, b):
    cin, H, W = x_chw.shape
    cout = w_oihw.shape[0]
    xp = np.pad(x_chw.astype(np.float32), ((0, 0), (1, 1), (1, 1)))
    out = np.zeros((cout, H, W), np.float32)
    for co in range(cout):
        acc = np.zeros((H, W), np.float32)
        for ci in range(cin):
            for kh in range(3):
                for kw in range(3):
                    acc += w_oihw[co, ci, kh, kw] * xp[ci, kh:kh + H, kw:kw + W]
        out[co] = acc + b[co]
    return out


def reference_forward(x_nchw, raw, H, W):
    HW = H * W
    outs = []
    for i in range(x_nchw.shape[0]):
        h = np.maximum(_np_conv3x3_same(x_nchw[i], raw["w1"], raw["b1"]), 0.0)
        y = _np_conv3x3_same(h, raw["w2"], raw["b2"])            # (1,H,W)
        z = (y.reshape(1, HW) @ raw["A"]).reshape(1, H, W)       # adjoint
        h2 = np.maximum(_np_conv3x3_same(z, raw["w3"], raw["b3"]), 0.0)
        outs.append(_np_conv3x3_same(h2, raw["w4"], raw["b4"]))  # (1,H,W)
    return np.stack(outs, 0)                                     # (B,1,H,W)


# ---------------------------------- demo -------------------------------------

if __name__ == "__main__":
    H = W = 16   # spatial size (HW = 256 on the lane axis)
    C = 4        # hidden channels inside each mini u-net
    B = 1        # batch=1 per the module's squeeze()/unsqueeze(0) contract

    key = jax.random.PRNGKey(0)
    kx, kp = jax.random.split(key)
    x = jax.random.normal(kx, (B, 1, H, W), jnp.float32)   # NCHW
    params, raw = init_params(kp, H, W, C)

    fwd = jax.jit(sandwich_forward)
    out = jax.block_until_ready(fwd(x, params))
    assert out.shape == (B, 1, H, W), out.shape
    assert out.dtype == jnp.float32, out.dtype
    assert bool(jnp.isfinite(out).all())

    # Validate the precomposed MXU path against a direct conv/adjoint reference.
    ref = reference_forward(np.asarray(x), raw, H, W)
    max_err = float(np.max(np.abs(np.asarray(out) - ref)))
    assert np.allclose(np.asarray(out), ref, rtol=5e-2, atol=5e-2), max_err

    print("KERNEL_OK")
</pallas_src>

<mosaic_0001>
module attributes {stable_mosaic.version = 11 : i64} {
  func.func @_sandwich_kernel(%arg0: memref<1x256xf32, #tpu.memory_space<vmem>>, %arg1: memref<256x1024xf32, #tpu.memory_space<vmem>>, %arg2: memref<1x1024xf32, #tpu.memory_space<vmem>>, %arg3: memref<1024x1024xf32, #tpu.memory_space<vmem>>, %arg4: memref<1x1024xf32, #tpu.memory_space<vmem>>, %arg5: memref<1024x256xf32, #tpu.memory_space<vmem>>, %arg6: memref<1x256xf32, #tpu.memory_space<vmem>>, %arg7: memref<1x256xf32, #tpu.memory_space<vmem>>) attributes {dimension_semantics = [], scalar_prefetch = 0 : i64, scratch_operands = 0 : i64, tpu.core_type = #tpu.core_type<tc>} {
    %c0 = arith.constant 0 : index
    %c0_0 = arith.constant 0 : index
    %0 = vector.load %arg0[%c0, %c0_0] : memref<1x256xf32, #tpu.memory_space<vmem>>, vector<1x256xf32>
    %c0_1 = arith.constant 0 : index
    %c0_2 = arith.constant 0 : index
    %1 = vector.load %arg1[%c0_1, %c0_2] : memref<256x1024xf32, #tpu.memory_space<vmem>>, vector<256x1024xf32>
    %cst = arith.constant dense<0.000000e+00> : vector<1x1024xf32>
    %2 = tpu.matmul %0, %1, %cst {dimension_numbers = #tpu.dot_dimension_numbers<[1], [0], [0], [1], [0, 0, 1, 1], [], []>} : vector<1x256xf32>, vector<256x1024xf32>, vector<1x1024xf32> -> vector<1x1024xf32>
    %c0_3 = arith.constant 0 : index
    %c0_4 = arith.constant 0 : index
    %3 = vector.load %arg2[%c0_3, %c0_4] : memref<1x1024xf32, #tpu.memory_space<vmem>>, vector<1x1024xf32>
    %4 = arith.addf %2, %3 : vector<1x1024xf32>
    %cst_5 = arith.constant 0.000000e+00 : f32
    %5 = vector.broadcast %cst_5 : f32 to vector<1x1024xf32>
    %6 = arith.maximumf %4, %5 : vector<1x1024xf32>
    %c0_6 = arith.constant 0 : index
    %c0_7 = arith.constant 0 : index
    %7 = vector.load %arg3[%c0_6, %c0_7] : memref<1024x1024xf32, #tpu.memory_space<vmem>>, vector<1024x1024xf32>
    %cst_8 = arith.constant dense<0.000000e+00> : vector<1x1024xf32>
    %8 = tpu.matmul %6, %7, %cst_8 {dimension_numbers = #tpu.dot_dimension_numbers<[1], [0], [0], [1], [0, 0, 1, 1], [], []>} : vector<1x1024xf32>, vector<1024x1024xf32>, vector<1x1024xf32> -> vector<1x1024xf32>
    %c0_9 = arith.constant 0 : index
    %c0_10 = arith.constant 0 : index
    %9 = vector.load %arg4[%c0_9, %c0_10] : memref<1x1024xf32, #tpu.memory_space<vmem>>, vector<1x1024xf32>
    %10 = arith.addf %8, %9 : vector<1x1024xf32>
    %cst_11 = arith.constant 0.000000e+00 : f32
    %11 = vector.broadcast %cst_11 : f32 to vector<1x1024xf32>
    %12 = arith.maximumf %10, %11 : vector<1x1024xf32>
    %c0_12 = arith.constant 0 : index
    %c0_13 = arith.constant 0 : index
    %13 = vector.load %arg5[%c0_12, %c0_13] : memref<1024x256xf32, #tpu.memory_space<vmem>>, vector<1024x256xf32>
    %cst_14 = arith.constant dense<0.000000e+00> : vector<1x256xf32>
    %14 = tpu.matmul %12, %13, %cst_14 {dimension_numbers = #tpu.dot_dimension_numbers<[1], [0], [0], [1], [0, 0, 1, 1], [], []>} : vector<1x1024xf32>, vector<1024x256xf32>, vector<1x256xf32> -> vector<1x256xf32>
    %c0_15 = arith.constant 0 : index
    %c0_16 = arith.constant 0 : index
    %15 = vector.load %arg6[%c0_15, %c0_16] : memref<1x256xf32, #tpu.memory_space<vmem>>, vector<1x256xf32>
    %16 = arith.addf %14, %15 : vector<1x256xf32>
    %c0_17 = arith.constant 0 : index
    %c0_18 = arith.constant 0 : index
    %17 = vector.load %arg7[%c0_17, %c0_18] : memref<1x256xf32, #tpu.memory_space<vmem>>, vector<1x256xf32>
    tpu.vector_store %arg7[%c0_17, %c0_18], %16 {strides = array<i32>} : memref<1x256xf32, #tpu.memory_space<vmem>>, vector<1x256xf32>,
    return
  }
}

</mosaic_0001>

<bundles_post_ra>
// kernel: sandwich_forward.1
= control target key start
LH: loop header
LB: loop body
LE: loop exit
PB: predicated region body
PF: predicated region fallthrough
CT: control target
= control target key end

     0   :  { %12 = vsyncpa [#allocation3], 0  ;;  %s3878_s0 = inlined_call_operand.vmem [shape: f32[1,256], index: 0, kind: input, shape index: {}]   ;;  %s3879_s1 = inlined_call_operand.hbm [shape: f32[256,1024], index: 1, kind: input, shape index: {}]   ;;  %s3880_s2 = inlined_call_operand.hbm [shape: f32[1,1024], index: 2, kind: input, shape index: {}]   ;;  %s3881_s3 = inlined_call_operand.hbm [shape: f32[1024,1024], index: 3, kind: input, shape index: {}]   ;;  %s3882_s4 = inlined_call_operand.hbm [shape: f32[1,1024], index: 4, kind: input, shape index: {}]   ;;  %s3883_s5 = inlined_call_operand.hbm [shape: f32[1024,256], index: 5, kind: input, shape index: {}]   ;;  %s3884_s6 = inlined_call_operand.hbm [shape: f32[1,256], index: 6, kind: input, shape index: {}]   ;;  %s3885_s7 = inlined_call_operand.vmem [shape: f32[1,256], index: 7, kind: output, shape index: {}]  }
   0x1   :  { %13 = vsyncpa [#allocation5], 0 }
   0x2   :  { %14 = vsyncpa [#allocation8], 0 }
   0x3   :  { %15 = vsyncpa [#allocation11], 0  ;;  %s3639_s24 = smov [#allocation4]   ;;  %s3640_s26 = smov [#allocation7]  }
   0x4   :  { %s36_s25 = sshll.u32 %s3639_s24, 4  ;;  %s58_s27 = sshll.u32 %s3640_s26, 4  ;;  %s37_s25 = int_to_ptr.vmem [resolvable:$true] %s36_s25  ;;  %s59_s27 = int_to_ptr.vmem [resolvable:$true] %s58_s27 }
   0x5   :  { %s3519_s28 = scalar_lea.vmem %s37_s25, 128  ;;  %p3524_p1 = scmp.lt.s32.totalorder %s37_s25, %s37_s25 }
   0x6   :  { %p3520_p0 = scmp.ne.s32.totalorder %s37_s25, %s3519_s28  ;;  %p3525_p2 = scmp.lt.s32.totalorder %s3519_s28, %s3519_s28 }
   0x8   :  { %p3526_p3 = por %p3525_p2, %p3524_p1 }
   0xa   :  { %p3527_p4 = pnand %p3526_p3, %p3520_p0 }
   0xc   :  { %3530 = shalt.err (!%p3527_p4)
}
   0xd   :  { %39 = dma.hbm_to_vmem [thread:$0]  %s3880_s2, 128, %s37_s25, [#allocation5]  }
   0xe   :  { %s3539_s8 = scalar_lea.vmem %s59_s27, 128  ;;  %p3544_p6 = scmp.lt.s32.totalorder %s59_s27, %s59_s27 }
   0xf   :  { %p3540_p5 = scmp.ne.s32.totalorder %s59_s27, %s3539_s8  ;;  %p3545_p7 = scmp.lt.s32.totalorder %s3539_s8, %s3539_s8 }
  0x11   :  { %p3546_p8 = por %p3545_p7, %p3544_p6 }
  0x13   :  { %p3547_p9 = pnand %p3546_p8, %p3540_p5 }
  0x15   :  { %3550 = shalt.err (!%p3547_p9)
}
  0x16   :  { %61 = dma.hbm_to_vmem [thread:$0]  %s3882_s4, 128, %s59_s27, [#allocation8]  }
  0x17   :  { %s3641_s11 = smov [#allocation2]  }
  0x18   :  { %s23_s12 = sshll.u32 %s3641_s11, 4  ;;  %s24_s12 = int_to_ptr.vmem [resolvable:$true] %s23_s12 }
  0x19   :  { %s3559_s13 = scalar_lea.vmem %s24_s12, 32768  ;;  %p3564_p11 = scmp.lt.s32.totalorder %s24_s12, %s24_s12 }
  0x1a   :  { %p3560_p10 = scmp.ne.s32.totalorder %s24_s12, %s3559_s13  ;;  %p3565_p12 = scmp.lt.s32.totalorder %s3559_s13, %s3559_s13 }
  0x1c   :  { %p3566_p13 = por %p3565_p12, %p3564_p11 }
  0x1e   :  { %p3567_p0 = pnand %p3566_p13, %p3560_p10 }
  0x20   :  { %3570 = shalt.err (!%p3567_p0)
}
  0x21   :  { %s3642_s2 = smov 1024   ;;  %s3643_s14 = smov 64  }
  0x22   :  { %29 = dma.hbm_to_vmem [thread:$0]  %s3879_s1, 32768, %s24_s12, [#allocation3], %s3642_s2, %s3642_s2, %s3643_s14  }
  0x23   :  { %s3644_s17 = smov [#allocation6]   ;;  %s3645_s4 = smov [#allocation9]  }
  0x24   :  { %s45_s18 = sshll.u32 %s3644_s17, 4  ;;  %s67_s19 = sshll.u32 %s3645_s4, 4  ;;  %s46_s18 = int_to_ptr.vmem [resolvable:$true] %s45_s18  ;;  %s68_s19 = int_to_ptr.vmem [resolvable:$true] %s67_s19 }
  0x25   :  { %s3579_s20 = scalar_lea.vmem %s46_s18, 131072  ;;  %p3584_p2 = scmp.lt.s32.totalorder %s46_s18, %s46_s18 }
  0x26   :  { %p3580_p1 = scmp.ne.s32.totalorder %s46_s18, %s3579_s20  ;;  %p3585_p3 = scmp.lt.s32.totalorder %s3579_s20, %s3579_s20 }
  0x28   :  { %p3586_p4 = por %p3585_p3, %p3584_p2 }
  0x2a   :  { %p3587_p5 = pnand %p3586_p4, %p3580_p1 }
  0x2c   :  { %3590 = shalt.err (!%p3587_p5)
}
  0x2d   :  { %51 = dma.hbm_to_vmem [thread:$0]  %s3881_s3, 131072, %s46_s18, [#allocation5], %s3642_s2, %s3642_s2, %s3643_s14  }
  0x2e   :  { %s3599_s23 = scalar_lea.vmem %s68_s19, 32768  ;;  %p3604_p7 = scmp.lt.s32.totalorder %s68_s19, %s68_s19 }
  0x2f   :  { %p3600_p6 = scmp.ne.s32.totalorder %s68_s19, %s3599_s23  ;;  %p3605_p8 = scmp.lt.s32.totalorder %s3599_s23, %s3599_s23 }
  0x31   :  { %p3606_p9 = por %p3605_p8, %p3604_p7 }
  0x33   :  { %p3607_p10 = pnand %p3606_p9, %p3600_p6 }
  0x35   :  { %3610 = shalt.err (!%p3607_p10)
}
  0x36   :  { %s3646_s1 = smov 256   ;;  %s3647_s24 = smov 16  }
  0x37   :  { %73 = dma.hbm_to_vmem [thread:$0]  %s3883_s5, 32768, %s68_s19, [#allocation8], %s3646_s1, %s3646_s1, %s3647_s24  }
  0x38   :  { %s3648_s27 = smov [#allocation10]  }
  0x39   :  { %s80_s28 = sshll.u32 %s3648_s27, 4  ;;  %s81_s28 = int_to_ptr.vmem [resolvable:$true] %s80_s28 }
  0x3a   :  { %s3619_s29 = scalar_lea.vmem %s81_s28, 32  ;;  %p3624_p12 = scmp.lt.s32.totalorder %s81_s28, %s81_s28 }
  0x3b   :  { %p3620_p11 = scmp.ne.s32.totalorder %s81_s28, %s3619_s29  ;;  %p3625_p13 = scmp.lt.s32.totalorder %s3619_s29, %s3619_s29 }
  0x3d   :  { %p3626_p0 = por %p3625_p13, %p3624_p12 }
  0x3f   :  { %p3627_p1 = pnand %p3626_p0, %p3620_p11 }
  0x41   :  { %3630 = shalt.err (!%p3627_p1)
}
  0x42   :  { %83 = dma.hbm_to_vmem [thread:$0]  %s3884_s6, 32, %s81_s28, [#allocation11]  }
  0x43   :  { %3631 = dma.done.wait [#allocation3], 32768  }
  0x44   :  { %3632 = vsyncadd [#allocation3], 4294934528 }
  0x45   :  { %3633 = dma.done.wait [#allocation5], 131200  }
  0x46   :  { %3634 = vsyncadd [#allocation5], 4294836096 }
  0x47   :  { %3635 = dma.done.wait [#allocation8], 32896  }
  0x48   :  { %3636 = vsyncadd [#allocation8], 4294934400 }
  0x49   :  { %3637 = dma.done.wait [#allocation11], 32  }
  0x4a   :  { %3638 = vsyncadd [#allocation11], 4294967264  ;;  %v224_v0 = vld [vmem:[#allocation2 + $0x3c8] sm:$0xff]  ;;  %v226_v1 = vld [vmem:[#allocation2 + $0x3d8] sm:$0xff] }
  0x4b   :  { %v223_v2 = vld [vmem:[#allocation2 + $0x3c0] sm:$0xff]  ;;  %412 = vmatprep.subr.mxu0 %v224_v0  ;;  %483 = vmatprep.subr.mxu1 %v226_v1  ;;  %v225_v3 = vld [vmem:[#allocation2 + $0x3d0] sm:$0xff]  ;;  %v216_v4 = vld [vmem:[#allocation2 + $0x388] sm:$0xff] }
  0x4c   :  { %v218_v5 = vld [vmem:[#allocation2 + $0x398] sm:$0xff]  ;;  %413 = vmatpush1.msra.mxu0 %v223_v2  ;;  %484 = vmatpush1.msra.mxu1 %v225_v3  ;;  %v215_v6 = vld [vmem:[#allocation2 + $0x380] sm:$0xff]  ;;  %v217_v7 = vld [vmem:[#allocation2 + $0x390] sm:$0xff] }
  0x4d   :  { %v208_v8 = vld [vmem:[#allocation2 + $0x348] sm:$0xff]  ;;  %414 = vmatprep.subr.mxu0 %v216_v4  ;;  %485 = vmatprep.subr.mxu1 %v218_v5  ;;  %v210_v9 = vld [vmem:[#allocation2 + $0x358] sm:$0xff]  ;;  %v207_v10 = vld [vmem:[#allocation2 + $0x340] sm:$0xff] }
  0x4e   :  { %v209_v11 = vld [vmem:[#allocation2 + $0x350] sm:$0xff]  ;;  %415 = vmatpush1.msra.mxu0 %v215_v6  ;;  %486 = vmatpush1.msra.mxu1 %v217_v7  ;;  %v200_v12 = vld [vmem:[#allocation2 + $0x308] sm:$0xff]  ;;  %v202_v13 = vld [vmem:[#allocation2 + $0x318] sm:$0xff] }
  0x4f   :  { %416 = vmatprep.subr.mxu0 %v208_v8  ;;  %487 = vmatprep.subr.mxu1 %v210_v9  ;;  %v199_v14 = vld [vmem:[#allocation2 + $0x300] sm:$0xff]  ;;  %v201_v15 = vld [vmem:[#allocation2 + $0x310] sm:$0xff]  ;;  %v192_v16 = vld [vmem:[#allocation2 + $0x2c8] sm:$0xff] }
  0x50   :  { %417 = vmatpush1.msra.mxu0 %v207_v10  ;;  %488 = vmatpush1.msra.mxu1 %v209_v11  ;;  %v194_v17 = vld [vmem:[#allocation2 + $0x2d8] sm:$0xff]  ;;  %v191_v18 = vld [vmem:[#allocation2 + $0x2c0] sm:$0xff]  ;;  %v193_v19 = vld [vmem:[#allocation2 + $0x2d0] sm:$0xff] }
  0x51   :  { %418 = vmatprep.subr.mxu0 %v200_v12  ;;  %489 = vmatprep.subr.mxu1 %v202_v13  ;;  %v184_v20 = vld [vmem:[#allocation2 + $0x288] sm:$0xff]  ;;  %v186_v21 = vld [vmem:[#allocation2 + $0x298] sm:$0xff]  ;;  %v183_v22 = vld [vmem:[#allocation2 + $0x280] sm:$0xff] }
  0x52   :  { %419 = vmatpush1.msra.mxu0 %v199_v14  ;;  %490 = vmatpush1.msra.mxu1 %v201_v15  ;;  %v185_v23 = vld [vmem:[#allocation2 + $0x290] sm:$0xff]  ;;  %v176_v24 = vld [vmem:[#allocation2 + $0x248] sm:$0xff]  ;;  %v178_v25 = vld [vmem:[#allocation2 + $0x258] sm:$0xff] }
  0x53   :  { %420 = vmatprep.subr.mxu0 %v192_v16  ;;  %491 = vmatprep.subr.mxu1 %v194_v17  ;;  %v175_v26 = vld [vmem:[#allocation2 + $0x240] sm:$0xff]  ;;  %v177_v27 = vld [vmem:[#allocation2 + $0x250] sm:$0xff]  ;;  %v168_v28 = vld [vmem:[#allocation2 + $0x208] sm:$0xff] }
  0x54   :  { %421 = vmatpush1.msra.mxu0 %v191_v18  ;;  %492 = vmatpush1.msra.mxu1 %v193_v19  ;;  %v170_v29 = vld [vmem:[#allocation2 + $0x218] sm:$0xff]  ;;  %v167_v30 = vld [vmem:[#allocation2 + $0x200] sm:$0xff]  ;;  %v169_v31 = vld [vmem:[#allocation2 + $0x210] sm:$0xff] }
  0x55   :  { %422 = vmatprep.subr.mxu0 %v184_v20  ;;  %493 = vmatprep.subr.mxu1 %v186_v21  ;;  %v160_v32 = vld [vmem:[#allocation2 + $0x1c8] sm:$0xff]  ;;  %v162_v33 = vld [vmem:[#allocation2 + $0x1d8] sm:$0xff]  ;;  %v159_v34 = vld [vmem:[#allocation2 + $0x1c0] sm:$0xff] }
  0x56   :  { %423 = vmatpush1.msra.mxu0 %v183_v22  ;;  %494 = vmatpush1.msra.mxu1 %v185_v23  ;;  %v161_v35 = vld [vmem:[#allocation2 + $0x1d0] sm:$0xff]  ;;  %v152_v36 = vld [vmem:[#allocation2 + $0x188] sm:$0xff]  ;;  %v154_v37 = vld [vmem:[#allocation2 + $0x198] sm:$0xff] }
  0x57   :  { %424 = vmatprep.subr.mxu0 %v176_v24  ;;  %495 = vmatprep.subr.mxu1 %v178_v25  ;;  %v151_v38 = vld [vmem:[#allocation2 + $0x180] sm:$0xff]  ;;  %v153_v39 = vld [vmem:[#allocation2 + $0x190] sm:$0xff]  ;;  %v144_v40 = vld [vmem:[#allocation2 + $0x148] sm:$0xff] }
  0x58   :  { %425 = vmatpush1.msra.mxu0 %v175_v26  ;;  %496 = vmatpush1.msra.mxu1 %v177_v27  ;;  %v146_v41 = vld [vmem:[#allocation2 + $0x158] sm:$0xff]  ;;  %v143_v42 = vld [vmem:[#allocation2 + $0x140] sm:$0xff]  ;;  %v145_v43 = vld [vmem:[#allocation2 + $0x150] sm:$0xff] }
  0x59   :  { %426 = vmatprep.subr.mxu0 %v168_v28  ;;  %497 = vmatprep.subr.mxu1 %v170_v29  ;;  %v136_v44 = vld [vmem:[#allocation2 + $0x108] sm:$0xff]  ;;  %v138_v45 = vld [vmem:[#allocation2 + $0x118] sm:$0xff]  ;;  %v135_v46 = vld [vmem:[#allocation2 + $0x100] sm:$0xff] }
  0x5a   :  { %427 = vmatpush1.msra.mxu0 %v167_v30  ;;  %498 = vmatpush1.msra.mxu1 %v169_v31  ;;  %v137_v47 = vld [vmem:[#allocation2 + $0x110] sm:$0xff]  ;;  %v128_v48 = vld [vmem:[#allocation2 + $0xc8] sm:$0xff]  ;;  %v130_v49 = vld [vmem:[#allocation2 + $0xd8] sm:$0xff] }
  0x5b   :  { %428 = vmatprep.subr.mxu0 %v160_v32  ;;  %499 = vmatprep.subr.mxu1 %v162_v33  ;;  %v127_v50 = vld [vmem:[#allocation2 + $0xc0] sm:$0xff]  ;;  %v129_v51 = vld [vmem:[#allocation2 + $0xd0] sm:$0xff]  ;;  %v120_v52 = vld [vmem:[#allocation2 + $0x88] sm:$0xff] }
  0x5c   :  { %429 = vmatpush1.msra.mxu0 %v159_v34  ;;  %500 = vmatpush1.msra.mxu1 %v161_v35  ;;  %v122_v53 = vld [vmem:[#allocation2 + $0x98] sm:$0xff]  ;;  %v119_v54 = vld [vmem:[#allocation2 + $0x80] sm:$0xff]  ;;  %v121_v55 = vld [vmem:[#allocation2 + $0x90] sm:$0xff] }
  0x5d   :  { %430 = vmatprep.subr.mxu0 %v152_v36  ;;  %501 = vmatprep.subr.mxu1 %v154_v37  ;;  %v112_v56 = vld [vmem:[#allocation2 + $0x48] sm:$0xff]  ;;  %v114_v57 = vld [vmem:[#allocation2 + $0x58] sm:$0xff]  ;;  %v111_v58 = vld [vmem:[#allocation2 + $0x40] sm:$0xff] }
  0x5e   :  { %431 = vmatpush1.msra.mxu0 %v151_v38  ;;  %502 = vmatpush1.msra.mxu1 %v153_v39  ;;  %v113_v59 = vld [vmem:[#allocation2 + $0x50] sm:$0xff]  ;;  %v104_v60 = vld [vmem:[#allocation2 + $0x8] sm:$0xff]  ;;  %v106_v61 = vld [vmem:[#allocation2 + $0x18] sm:$0xff]  ;;  %v361_v38 = vlaneseq }
  0x5f   :  { %432 = vmatprep.subr.mxu0 %v144_v40  ;;  %503 = vmatprep.subr.mxu1 %v146_v41  ;;  %v103_v62 = vld [vmem:[#allocation2] sm:$0xff]  ;;  %v105_v63 = vld [vmem:[#allocation2 + $0x10] sm:$0xff]  ;;  %v352_v0 = vld [vmem:[#allocation2 + $0x7c8] sm:$0xff] }
  0x60   :  { %433 = vmatpush1.msra.mxu0 %v143_v42  ;;  %504 = vmatpush1.msra.mxu1 %v145_v43  ;;  %v354_v1 = vld [vmem:[#allocation2 + $0x7d8] sm:$0xff]  ;;  %v351_v2 = vld [vmem:[#allocation2 + $0x7c0] sm:$0xff]  ;;  %v353_v3 = vld [vmem:[#allocation2 + $0x7d0] sm:$0xff]  ;;  %vm3486_vm0 = vcmp.lt.s32.totalorder %v361_v38, 256 }
  0x61   :  { %434 = vmatprep.subr.mxu0 %v136_v44  ;;  %505 = vmatprep.subr.mxu1 %v138_v45  ;;  %v344_v4 = vld [vmem:[#allocation2 + $0x788] sm:$0xff]  ;;  %v346_v5 = vld [vmem:[#allocation2 + $0x798] sm:$0xff]  ;;  %v343_v6 = vld [vmem:[#allocation2 + $0x780] sm:$0xff] }
  0x62   :  { %435 = vmatpush1.msra.mxu0 %v135_v46  ;;  %506 = vmatpush1.msra.mxu1 %v137_v47  ;;  %v345_v7 = vld [vmem:[#allocation2 + $0x790] sm:$0xff]  ;;  %v336_v8 = vld [vmem:[#allocation2 + $0x748] sm:$0xff]  ;;  %v338_v9 = vld [vmem:[#allocation2 + $0x758] sm:$0xff]  ;;  %v3709_v47 = vshrl.u32 %v361_v38, 7 }
  0x63   :  { %436 = vmatprep.subr.mxu0 %v128_v48  ;;  %507 = vmatprep.subr.mxu1 %v130_v49  ;;  %v335_v10 = vld [vmem:[#allocation2 + $0x740] sm:$0xff]  ;;  %v337_v11 = vld [vmem:[#allocation2 + $0x750] sm:$0xff]  ;;  %v328_v12 = vld [vmem:[#allocation2 + $0x708] sm:$0xff] }
  0x64   :  { %437 = vmatpush1.msra.mxu0 %v127_v50  ;;  %508 = vmatpush1.msra.mxu1 %v129_v51  ;;  %v330_v13 = vld [vmem:[#allocation2 + $0x718] sm:$0xff]  ;;  %v327_v14 = vld [vmem:[#allocation2 + $0x700] sm:$0xff]  ;;  %v329_v15 = vld [vmem:[#allocation2 + $0x710] sm:$0xff] }
  0x65   :  { %438 = vmatprep.subr.mxu0 %v120_v52  ;;  %509 = vmatprep.subr.mxu1 %v122_v53  ;;  %v320_v16 = vld [vmem:[#allocation2 + $0x6c8] sm:$0xff]  ;;  %v322_v17 = vld [vmem:[#allocation2 + $0x6d8] sm:$0xff]  ;;  %v319_v18 = vld [vmem:[#allocation2 + $0x6c0] sm:$0xff] }
  0x66   :  { %439 = vmatpush1.msra.mxu0 %v119_v54  ;;  %510 = vmatpush1.msra.mxu1 %v121_v55  ;;  %v321_v19 = vld [vmem:[#allocation2 + $0x6d0] sm:$0xff]  ;;  %v312_v20 = vld [vmem:[#allocation2 + $0x688] sm:$0xff]  ;;  %v314_v21 = vld [vmem:[#allocation2 + $0x698] sm:$0xff] }
  0x67   :  { %440 = vmatprep.subr.mxu0 %v112_v56  ;;  %511 = vmatprep.subr.mxu1 %v114_v57  ;;  %v311_v22 = vld [vmem:[#allocation2 + $0x680] sm:$0xff]  ;;  %v313_v23 = vld [vmem:[#allocation2 + $0x690] sm:$0xff]  ;;  %v304_v24 = vld [vmem:[#allocation2 + $0x648] sm:$0xff]  ;;  %v3712_v56 = vsub.s32 1, %v3709_v47 }
  0x68   :  { %441 = vmatpush1.msra.mxu0 %v111_v58  ;;  %512 = vmatpush1.msra.mxu1 %v113_v59  ;;  %v306_v25 = vld [vmem:[#allocation2 + $0x658] sm:$0xff]  ;;  %v303_v26 = vld [vmem:[#allocation2 + $0x640] sm:$0xff]  ;;  %v305_v27 = vld [vmem:[#allocation2 + $0x650] sm:$0xff] }
  0x69   :  { %442 = vmatprep.subr.mxu0 %v104_v60  ;;  %513 = vmatprep.subr.mxu1 %v106_v61  ;;  %v296_v28 = vld [vmem:[#allocation2 + $0x608] sm:$0xff]  ;;  %v298_v29 = vld [vmem:[#allocation2 + $0x618] sm:$0xff]  ;;  %v295_v30 = vld [vmem:[#allocation2 + $0x600] sm:$0xff] }
  0x6a   :  { %443 = vmatpush1.msra.mxu0 %v103_v62  ;;  %514 = vmatpush1.msra.mxu1 %v105_v63  ;;  %v297_v31 = vld [vmem:[#allocation2 + $0x610] sm:$0xff]  ;;  %v288_v32 = vld [vmem:[#allocation2 + $0x5c8] sm:$0xff]  ;;  %v290_v33 = vld [vmem:[#allocation2 + $0x5d8] sm:$0xff]  ;;  %v3718_v62 = vsub.s32 0, %v3709_v47 }
  0x6b   :  { %444 = vmatprep.subr.mxu0 %v352_v0  ;;  %515 = vmatprep.subr.mxu1 %v354_v1  ;;  %v287_v34 = vld [vmem:[#allocation2 + $0x5c0] sm:$0xff]  ;;  %v289_v35 = vld [vmem:[#allocation2 + $0x5d0] sm:$0xff]  ;;  %v280_v36 = vld [vmem:[#allocation2 + $0x588] sm:$0xff] }
  0x6c   :  { %445 = vmatpush2.msra.mxu0 %v351_v2  ;;  %516 = vmatpush2.msra.mxu1 %v353_v3  ;;  %v282_v37 = vld [vmem:[#allocation2 + $0x598] sm:$0xff]  ;;  %v279_v39 = vld [vmem:[#allocation2 + $0x580] sm:$0xff]  ;;  %v281_v40 = vld [vmem:[#allocation2 + $0x590] sm:$0xff] }
  0x6d   :  { %446 = vmatprep.subr.mxu0 %v344_v4  ;;  %517 = vmatprep.subr.mxu1 %v346_v5  ;;  %v272_v41 = vld [vmem:[#allocation2 + $0x548] sm:$0xff]  ;;  %v274_v42 = vld [vmem:[#allocation2 + $0x558] sm:$0xff]  ;;  %v271_v43 = vld [vmem:[#allocation2 + $0x540] sm:$0xff] }
  0x6e   :  { %447 = vmatpush2.msra.mxu0 %v343_v6  ;;  %518 = vmatpush2.msra.mxu1 %v345_v7  ;;  %v273_v44 = vld [vmem:[#allocation2 + $0x550] sm:$0xff]  ;;  %v264_v45 = vld [vmem:[#allocation2 + $0x508] sm:$0xff]  ;;  %v266_v46 = vld [vmem:[#allocation2 + $0x518] sm:$0xff] }
  0x6f   :  { %448 = vmatprep.subr.mxu0 %v336_v8  ;;  %519 = vmatprep.subr.mxu1 %v338_v9  ;;  %v263_v48 = vld [vmem:[#allocation2 + $0x500] sm:$0xff]  ;;  %v265_v49 = vld [vmem:[#allocation2 + $0x510] sm:$0xff]  ;;  %v256_v50 = vld [vmem:[#allocation2 + $0x4c8] sm:$0xff] }
  0x70   :  { %449 = vmatpush2.msra.mxu0 %v335_v10  ;;  %520 = vmatpush2.msra.mxu1 %v337_v11  ;;  %v258_v51 = vld [vmem:[#allocation2 + $0x4d8] sm:$0xff]  ;;  %v255_v52 = vld [vmem:[#allocation2 + $0x4c0] sm:$0xff]  ;;  %v257_v53 = vld [vmem:[#allocation2 + $0x4d0] sm:$0xff] }
  0x71   :  { %450 = vmatprep.subr.mxu0 %v328_v12  ;;  %521 = vmatprep.subr.mxu1 %v330_v13  ;;  %v248_v54 = vld [vmem:[#allocation2 + $0x488] sm:$0xff]  ;;  %v250_v55 = vld [vmem:[#allocation2 + $0x498] sm:$0xff]  ;;  %v247_v57 = vld [vmem:[#allocation2 + $0x480] sm:$0xff] }
  0x72   :  { %451 = vmatpush2.msra.mxu0 %v327_v14  ;;  %522 = vmatpush2.msra.mxu1 %v329_v15  ;;  %v249_v58 = vld [vmem:[#allocation2 + $0x490] sm:$0xff]  ;;  %v102_v59 = vld [vmem:[%s3878_s0] sm:$0x3]  ;;  %v240_v60 = vld [vmem:[#allocation2 + $0x448] sm:$0xff] }
  0x73   :  { %452 = vmatprep.subr.mxu0 %v320_v16  ;;  %523 = vmatprep.subr.mxu1 %v322_v17  ;;  %v242_v61 = vld [vmem:[#allocation2 + $0x458] sm:$0xff]  ;;  %v239_v63 = vld [vmem:[#allocation2 + $0x440] sm:$0xff]  ;;  %v241_v0 = vld [vmem:[#allocation2 + $0x450] sm:$0xff]  ;;  %v3721_v3 = vrot.slane %v102_v59, %v3712_v56  ;;  %v3724_v6 = vrot.slane %v102_v59, %v3718_v62 }
  0x74   :  { %453 = vmatpush2.msra.mxu0 %v319_v18  ;;  %524 = vmatpush2.msra.mxu1 %v321_v19  ;;  %v232_v1 = vld [vmem:[#allocation2 + $0x408] sm:$0xff]  ;;  %v234_v2 = vld [vmem:[#allocation2 + $0x418] sm:$0xff]  ;;  %v231_v4 = vld [vmem:[#allocation2 + $0x400] sm:$0xff] }
  0x75   :  { %454 = vmatprep.subr.mxu0 %v312_v20  ;;  %525 = vmatprep.subr.mxu1 %v314_v21  ;;  %v233_v5 = vld [vmem:[#allocation2 + $0x410] sm:$0xff]  ;;  %v228_v7 = vld [vmem:[#allocation2 + $0x3e8] sm:$0xff]  ;;  %v230_v8 = vld [vmem:[#allocation2 + $0x3f8] sm:$0xff] }
  0x76   :  { %455 = vmatpush2.msra.mxu0 %v311_v22  ;;  %526 = vmatpush2.msra.mxu1 %v313_v23  ;;  %v227_v9 = vld [vmem:[#allocation2 + $0x3e0] sm:$0xff]  ;;  %v229_v10 = vld [vmem:[#allocation2 + $0x3f0] sm:$0xff]  ;;  %v220_v11 = vld [vmem:[#allocation2 + $0x3a8] sm:$0xff] }
  0x77   :  { %456 = vmatprep.subr.mxu0 %v304_v24  ;;  %527 = vmatprep.subr.mxu1 %v306_v25  ;;  %v222_v12 = vld [vmem:[#allocation2 + $0x3b8] sm:$0xff]  ;;  %v219_v13 = vld [vmem:[#allocation2 + $0x3a0] sm:$0xff]  ;;  %v221_v14 = vld [vmem:[#allocation2 + $0x3b0] sm:$0xff] }
  0x78   :  { %457 = vmatpush2.msra.mxu0 %v303_v26  ;;  %528 = vmatpush2.msra.mxu1 %v305_v27  ;;  %v212_v15 = vld [vmem:[#allocation2 + $0x368] sm:$0xff]  ;;  %v214_v16 = vld [vmem:[#allocation2 + $0x378] sm:$0xff]  ;;  %v211_v17 = vld [vmem:[#allocation2 + $0x360] sm:$0xff] }
  0x79   :  { %458 = vmatprep.subr.mxu0 %v296_v28  ;;  %529 = vmatprep.subr.mxu1 %v298_v29  ;;  %v213_v18 = vld [vmem:[#allocation2 + $0x370] sm:$0xff]  ;;  %v204_v19 = vld [vmem:[#allocation2 + $0x328] sm:$0xff]  ;;  %v206_v20 = vld [vmem:[#allocation2 + $0x338] sm:$0xff] }
  0x7a   :  { %459 = vmatpush2.msra.mxu0 %v295_v30  ;;  %530 = vmatpush2.msra.mxu1 %v297_v31  ;;  %v203_v21 = vld [vmem:[#allocation2 + $0x320] sm:$0xff]  ;;  %v205_v22 = vld [vmem:[#allocation2 + $0x330] sm:$0xff]  ;;  %v196_v23 = vld [vmem:[#allocation2 + $0x2e8] sm:$0xff] }
  0x7b   :  { %460 = vmatprep.subr.mxu0 %v288_v32  ;;  %531 = vmatprep.subr.mxu1 %v290_v33  ;;  %v198_v24 = vld [vmem:[#allocation2 + $0x2f8] sm:$0xff]  ;;  %v195_v25 = vld [vmem:[#allocation2 + $0x2e0] sm:$0xff]  ;;  %v197_v26 = vld [vmem:[#allocation2 + $0x2f0] sm:$0xff] }
  0x7c   :  { %461 = vmatpush2.msra.mxu0 %v287_v34  ;;  %532 = vmatpush2.msra.mxu1 %v289_v35  ;;  %v188_v27 = vld [vmem:[#allocation2 + $0x2a8] sm:$0xff]  ;;  %v190_v28 = vld [vmem:[#allocation2 + $0x2b8] sm:$0xff]  ;;  %v187_v29 = vld [vmem:[#allocation2 + $0x2a0] sm:$0xff] }
  0x7d   :  { %462 = vmatprep.subr.mxu0 %v280_v36  ;;  %533 = vmatprep.subr.mxu1 %v282_v37  ;;  %v189_v30 = vld [vmem:[#allocation2 + $0x2b0] sm:$0xff]  ;;  %v180_v31 = vld [vmem:[#allocation2 + $0x268] sm:$0xff]  ;;  %v182_v32 = vld [vmem:[#allocation2 + $0x278] sm:$0xff] }
  0x7e   :  { %463 = vmatpush2.msra.mxu0 %v279_v39  ;;  %534 = vmatpush2.msra.mxu1 %v281_v40  ;;  %v179_v33 = vld [vmem:[#allocation2 + $0x260] sm:$0xff]  ;;  %v181_v34 = vld [vmem:[#allocation2 + $0x270] sm:$0xff]  ;;  %v172_v35 = vld [vmem:[#allocation2 + $0x228] sm:$0xff] }
  0x7f   :  { %464 = vmatprep.subr.mxu0 %v272_v41  ;;  %535 = vmatprep.subr.mxu1 %v274_v42  ;;  %v174_v36 = vld [vmem:[#allocation2 + $0x238] sm:$0xff]  ;;  %v171_v37 = vld [vmem:[#allocation2 + $0x220] sm:$0xff]  ;;  %v173_v39 = vld [vmem:[#allocation2 + $0x230] sm:$0xff] }
  0x80   :  { %465 = vmatpush2.msra.mxu0 %v271_v43  ;;  %536 = vmatpush2.msra.mxu1 %v273_v44  ;;  %v164_v40 = vld [vmem:[#allocation2 + $0x1e8] sm:$0xff]  ;;  %v166_v41 = vld [vmem:[#allocation2 + $0x1f8] sm:$0xff]  ;;  %v163_v42 = vld [vmem:[#allocation2 + $0x1e0] sm:$0xff] }
  0x81   :  { %466 = vmatprep.subr.mxu0 %v264_v45  ;;  %537 = vmatprep.subr.mxu1 %v266_v46  ;;  %v165_v43 = vld [vmem:[#allocation2 + $0x1f0] sm:$0xff]  ;;  %v156_v44 = vld [vmem:[#allocation2 + $0x1a8] sm:$0xff]  ;;  %v158_v45 = vld [vmem:[#allocation2 + $0x1b8] sm:$0xff] }
  0x82   :  { %467 = vmatpush2.msra.mxu0 %v263_v48  ;;  %538 = vmatpush2.msra.mxu1 %v265_v49  ;;  %v155_v46 = vld [vmem:[#allocation2 + $0x1a0] sm:$0xff]  ;;  %v157_v48 = vld [vmem:[#allocation2 + $0x1b0] sm:$0xff]  ;;  %v148_v49 = vld [vmem:[#allocation2 + $0x168] sm:$0xff] }
  0x83   :  { %468 = vmatprep.subr.mxu0 %v256_v50  ;;  %539 = vmatprep.subr.mxu1 %v258_v51  ;;  %v150_v50 = vld [vmem:[#allocation2 + $0x178] sm:$0xff]  ;;  %v147_v51 = vld [vmem:[#allocation2 + $0x160] sm:$0xff] }
  0x84   :  { %469 = vmatpush2.msra.mxu0 %v255_v52  ;;  %540 = vmatpush2.msra.mxu1 %v257_v53  ;;  %v149_v52 = vld [vmem:[#allocation2 + $0x170] sm:$0xff]  ;;  %v140_v53 = vld [vmem:[#allocation2 + $0x128] sm:$0xff]  ;;  %v134_v59 = vld [vmem:[#allocation2 + $0xf8] sm:$0xff] }
  0x85   :  { %470 = vmatprep.subr.mxu0 %v248_v54  ;;  %541 = vmatprep.subr.mxu1 %v250_v55  ;;  %v142_v54 = vld [vmem:[#allocation2 + $0x138] sm:$0xff]  ;;  %v139_v55 = vld [vmem:[#allocation2 + $0x120] sm:$0xff] }
  0x86   :  { %471 = vmatpush2.msra.mxu0 %v247_v57  ;;  %542 = vmatpush2.msra.mxu1 %v249_v58  ;;  %v141_v57 = vld [vmem:[#allocation2 + $0x130] sm:$0xff]  ;;  %v132_v58 = vld [vmem:[#allocation2 + $0xe8] sm:$0xff] }
  0x87   :  { %472 = vmatprep.subr.mxu0 %v240_v60  ;;  %543 = vmatprep.subr.mxu1 %v242_v61  ;;  %v131_v60 = vld [vmem:[#allocation2 + $0xe0] sm:$0xff]  ;;  %v133_v61 = vld [vmem:[#allocation2 + $0xf0] sm:$0xff] }
  0x88   :  { %473 = vmatpush2.msra.mxu0 %v239_v63  ;;  %544 = vmatpush2.msra.mxu1 %v241_v0  ;;  %v124_v63 = vld [vmem:[#allocation2 + $0xa8] sm:$0xff]  ;;  %v126_v0 = vld [vmem:[#allocation2 + $0xb8] sm:$0xff] }
  0x89   :  { %474 = vmatprep.subr.mxu0 %v232_v1  ;;  %545 = vmatprep.subr.mxu1 %v234_v2  ;;  %v123_v1 = vld [vmem:[#allocation2 + $0xa0] sm:$0xff]  ;;  %v125_v2 = vld [vmem:[#allocation2 + $0xb0] sm:$0xff] }
  0x8a   :  { %475 = vmatpush2.msra.mxu0 %v231_v4  ;;  %476 = vmatprep.mubr.f32.mxu0 %v3721_v3  ;;  %v116_v4 = vld [vmem:[#allocation2 + $0x68] sm:$0xff] }
  0x8b   :  { %546 = vmatpush2.msra.mxu1 %v233_v5  ;;  %547 = vmatprep.mubr.f32.mxu1 %v3721_v3  ;;  %v118_v5 = vld [vmem:[#allocation2 + $0x78] sm:$0xff] }
  0x8c   :  { %477 = vmatmul.mubr.f32.vlgmr.msra.gmra.mxu0 %v3724_v6  ;;  %548 = vmatmul.mubr.f32.vlgmr.msra.gmra.mxu1 %v3724_v6 }
  0x8d   :  { %554 = vmatprep.subr.mxu0 %v228_v7  ;;  %625 = vmatprep.subr.mxu1 %v230_v8  ;;  %v115_v7 = vld [vmem:[#allocation2 + $0x60] sm:$0xff]  ;;  %v117_v8 = vld [vmem:[#allocation2 + $0x70] sm:$0xff] }
  0x8e   :  { %555 = vmatpush1.msra.mxu0 %v227_v9  ;;  %626 = vmatpush1.msra.mxu1 %v229_v10  ;;  %v108_v9 = vld [vmem:[#allocation2 + $0x28] sm:$0xff]  ;;  %v110_v10 = vld [vmem:[#allocation2 + $0x38] sm:$0xff] }
  0x8f   :  { %556 = vmatprep.subr.mxu0 %v220_v11  ;;  %627 = vmatprep.subr.mxu1 %v222_v12  ;;  %v107_v11 = vld [vmem:[#allocation2 + $0x20] sm:$0xff]  ;;  %v109_v12 = vld [vmem:[#allocation2 + $0x30] sm:$0xff] }
  0x90   :  { %557 = vmatpush1.msra.mxu0 %v219_v13  ;;  %628 = vmatpush1.msra.mxu1 %v221_v14  ;;  %v356_v13 = vld [vmem:[#allocation2 + $0x7e8] sm:$0xff]  ;;  %v358_v14 = vld [vmem:[#allocation2 + $0x7f8] sm:$0xff] }
  0x91   :  { %558 = vmatprep.subr.mxu0 %v212_v15  ;;  %629 = vmatprep.subr.mxu1 %v214_v16  ;;  %v355_v15 = vld [vmem:[#allocation2 + $0x7e0] sm:$0xff]  ;;  %v357_v16 = vld [vmem:[#allocation2 + $0x7f0] sm:$0xff] }
  0x92   :  { %559 = vmatpush1.msra.mxu0 %v211_v17  ;;  %630 = vmatpush1.msra.mxu1 %v213_v18  ;;  %v348_v17 = vld [vmem:[#allocation2 + $0x7a8] sm:$0xff]  ;;  %v350_v18 = vld [vmem:[#allocation2 + $0x7b8] sm:$0xff] }
  0x93   :  { %560 = vmatprep.subr.mxu0 %v204_v19  ;;  %631 = vmatprep.subr.mxu1 %v206_v20  ;;  %v347_v19 = vld [vmem:[#allocation2 + $0x7a0] sm:$0xff]  ;;  %v349_v20 = vld [vmem:[#allocation2 + $0x7b0] sm:$0xff] }
  0x94   :  { %561 = vmatpush1.msra.mxu0 %v203_v21  ;;  %632 = vmatpush1.msra.mxu1 %v205_v22  ;;  %v340_v21 = vld [vmem:[#allocation2 + $0x768] sm:$0xff]  ;;  %v342_v22 = vld [vmem:[#allocation2 + $0x778] sm:$0xff] }
  0x95   :  { %562 = vmatprep.subr.mxu0 %v196_v23  ;;  %633 = vmatprep.subr.mxu1 %v198_v24  ;;  %v339_v23 = vld [vmem:[#allocation2 + $0x760] sm:$0xff]  ;;  %v341_v24 = vld [vmem:[#allocation2 + $0x770] sm:$0xff] }
  0x96   :  { %563 = vmatpush1.msra.mxu0 %v195_v25  ;;  %634 = vmatpush1.msra.mxu1 %v197_v26  ;;  %v332_v25 = vld [vmem:[#allocation2 + $0x728] sm:$0xff]  ;;  %v334_v26 = vld [vmem:[#allocation2 + $0x738] sm:$0xff] }
  0x97   :  { %564 = vmatprep.subr.mxu0 %v188_v27  ;;  %635 = vmatprep.subr.mxu1 %v190_v28  ;;  %v331_v27 = vld [vmem:[#allocation2 + $0x720] sm:$0xff]  ;;  %v333_v28 = vld [vmem:[#allocation2 + $0x730] sm:$0xff] }
  0x98   :  { %565 = vmatpush1.msra.mxu0 %v187_v29  ;;  %636 = vmatpush1.msra.mxu1 %v189_v30  ;;  %v324_v29 = vld [vmem:[#allocation2 + $0x6e8] sm:$0xff]  ;;  %v326_v30 = vld [vmem:[#allocation2 + $0x6f8] sm:$0xff] }
  0x99   :  { %566 = vmatprep.subr.mxu0 %v180_v31  ;;  %637 = vmatprep.subr.mxu1 %v182_v32  ;;  %v323_v31 = vld [vmem:[#allocation2 + $0x6e0] sm:$0xff]  ;;  %v325_v32 = vld [vmem:[#allocation2 + $0x6f0] sm:$0xff] }
  0x9a   :  { %567 = vmatpush1.msra.mxu0 %v179_v33  ;;  %638 = vmatpush1.msra.mxu1 %v181_v34  ;;  %v316_v33 = vld [vmem:[#allocation2 + $0x6a8] sm:$0xff]  ;;  %v318_v34 = vld [vmem:[#allocation2 + $0x6b8] sm:$0xff] }
  0x9b   :  { %568 = vmatprep.subr.mxu0 %v172_v35  ;;  %639 = vmatprep.subr.mxu1 %v174_v36  ;;  %v315_v35 = vld [vmem:[#allocation2 + $0x6a0] sm:$0xff]  ;;  %v317_v36 = vld [vmem:[#allocation2 + $0x6b0] sm:$0xff] }
  0x9c   :  { %569 = vmatpush1.msra.mxu0 %v171_v37  ;;  %640 = vmatpush1.msra.mxu1 %v173_v39  ;;  %v308_v37 = vld [vmem:[#allocation2 + $0x668] sm:$0xff]  ;;  %v310_v39 = vld [vmem:[#allocation2 + $0x678] sm:$0xff] }
  0x9d   :  { %570 = vmatprep.subr.mxu0 %v164_v40  ;;  %641 = vmatprep.subr.mxu1 %v166_v41  ;;  %v307_v40 = vld [vmem:[#allocation2 + $0x660] sm:$0xff]  ;;  %v309_v41 = vld [vmem:[#allocation2 + $0x670] sm:$0xff] }
  0x9e   :  { %571 = vmatpush1.msra.mxu0 %v163_v42  ;;  %642 = vmatpush1.msra.mxu1 %v165_v43  ;;  %v300_v42 = vld [vmem:[#allocation2 + $0x628] sm:$0xff]  ;;  %v302_v43 = vld [vmem:[#allocation2 + $0x638] sm:$0xff] }
  0x9f   :  { %572 = vmatprep.subr.mxu0 %v156_v44  ;;  %643 = vmatprep.subr.mxu1 %v158_v45  ;;  %v299_v44 = vld [vmem:[#allocation2 + $0x620] sm:$0xff]  ;;  %v301_v45 = vld [vmem:[#allocation2 + $0x630] sm:$0xff] }
  0xa0   :  { %573 = vmatpush1.msra.mxu0 %v155_v46  ;;  %644 = vmatpush1.msra.mxu1 %v157_v48  ;;  %v292_v46 = vld [vmem:[#allocation2 + $0x5e8] sm:$0xff]  ;;  %v294_v48 = vld [vmem:[#allocation2 + $0x5f8] sm:$0xff] }
  0xa1   :  { %574 = vmatprep.subr.mxu0 %v148_v49  ;;  %645 = vmatprep.subr.mxu1 %v150_v50  ;;  %v291_v49 = vld [vmem:[#allocation2 + $0x5e0] sm:$0xff]  ;;  %v293_v50 = vld [vmem:[#allocation2 + $0x5f0] sm:$0xff] }
  0xa2   :  { %575 = vmatpush1.msra.mxu0 %v147_v51  ;;  %646 = vmatpush1.msra.mxu1 %v149_v52  ;;  %v284_v51 = vld [vmem:[#allocation2 + $0x5a8] sm:$0xff]  ;;  %v286_v52 = vld [vmem:[#allocation2 + $0x5b8] sm:$0xff] }
  0xa3   :  { %576 = vmatprep.subr.mxu0 %v140_v53  ;;  %647 = vmatprep.subr.mxu1 %v142_v54  ;;  %v283_v53 = vld [vmem:[#allocation2 + $0x5a0] sm:$0xff]  ;;  %v285_v54 = vld [vmem:[#allocation2 + $0x5b0] sm:$0xff] }
  0xa4   :  { %577 = vmatpush1.msra.mxu0 %v139_v55  ;;  %648 = vmatpush1.msra.mxu1 %v141_v57  ;;  %v276_v55 = vld [vmem:[#allocation2 + $0x568] sm:$0xff]  ;;  %v278_v57 = vld [vmem:[#allocation2 + $0x578] sm:$0xff] }
  0xa5   :  { %578 = vmatprep.subr.mxu0 %v132_v58  ;;  %649 = vmatprep.subr.mxu1 %v134_v59  ;;  %v275_v58 = vld [vmem:[#allocation2 + $0x560] sm:$0xff]  ;;  %v277_v59 = vld [vmem:[#allocation2 + $0x570] sm:$0xff] }
  0xa6   :  { %579 = vmatpush1.msra.mxu0 %v131_v60  ;;  %650 = vmatpush1.msra.mxu1 %v133_v61  ;;  %v268_v60 = vld [vmem:[#allocation2 + $0x528] sm:$0xff]  ;;  %v270_v61 = vld [vmem:[#allocation2 + $0x538] sm:$0xff] }
  0xa7   :  { %580 = vmatprep.subr.mxu0 %v124_v63  ;;  %651 = vmatprep.subr.mxu1 %v126_v0  ;;  %v267_v63 = vld [vmem:[#allocation2 + $0x520] sm:$0xff]  ;;  %v269_v0 = vld [vmem:[#allocation2 + $0x530] sm:$0xff] }
  0xa8   :  { %581 = vmatpush1.msra.mxu0 %v123_v1  ;;  %652 = vmatpush1.msra.mxu1 %v125_v2  ;;  %v260_v1 = vld [vmem:[#allocation2 + $0x4e8] sm:$0xff]  ;;  %v262_v2 = vld [vmem:[#allocation2 + $0x4f8] sm:$0xff] }
  0xa9   :  { %582 = vmatprep.subr.mxu0 %v116_v4  ;;  %653 = vmatprep.subr.mxu1 %v118_v5  ;;  %v259_v4 = vld [vmem:[#allocation2 + $0x4e0] sm:$0xff]  ;;  %v261_v5 = vld [vmem:[#allocation2 + $0x4f0] sm:$0xff] }
  0xaa   :  { %583 = vmatpush1.msra.mxu0 %v115_v7  ;;  %654 = vmatpush1.msra.mxu1 %v117_v8  ;;  %v252_v7 = vld [vmem:[#allocation2 + $0x4a8] sm:$0xff]  ;;  %v254_v8 = vld [vmem:[#allocation2 + $0x4b8] sm:$0xff] }
  0xab   :  { %584 = vmatprep.subr.mxu0 %v108_v9  ;;  %655 = vmatprep.subr.mxu1 %v110_v10  ;;  %v251_v9 = vld [vmem:[#allocation2 + $0x4a0] sm:$0xff]  ;;  %v253_v10 = vld [vmem:[#allocation2 + $0x4b0] sm:$0xff] }
  0xac   :  { %585 = vmatpush1.msra.mxu0 %v107_v11  ;;  %656 = vmatpush1.msra.mxu1 %v109_v12  ;;  %v244_v11 = vld [vmem:[#allocation2 + $0x468] sm:$0xff]  ;;  %v246_v12 = vld [vmem:[#allocation2 + $0x478] sm:$0xff] }
  0xad   :  { %586 = vmatprep.subr.mxu0 %v356_v13  ;;  %657 = vmatprep.subr.mxu1 %v358_v14  ;;  %v243_v13 = vld [vmem:[#allocation2 + $0x460] sm:$0xff]  ;;  %v245_v14 = vld [vmem:[#allocation2 + $0x470] sm:$0xff] }
  0xae   :  { %587 = vmatpush2.msra.mxu0 %v355_v15  ;;  %658 = vmatpush2.msra.mxu1 %v357_v16  ;;  %v236_v15 = vld [vmem:[#allocation2 + $0x428] sm:$0xff]  ;;  %v238_v16 = vld [vmem:[#allocation2 + $0x438] sm:$0xff] }
  0xaf   :  { %588 = vmatprep.subr.mxu0 %v348_v17  ;;  %659 = vmatprep.subr.mxu1 %v350_v18  ;;  %v235_v17 = vld [vmem:[#allocation2 + $0x420] sm:$0xff]  ;;  %v237_v18 = vld [vmem:[#allocation2 + $0x430] sm:$0xff] }
  0xb0   :  { %589 = vmatpush2.msra.mxu0 %v347_v19  ;;  %660 = vmatpush2.msra.mxu1 %v349_v20  ;;  %v825_v19 = vld [vmem:[#allocation6 + $0x3c8] sm:$0xff] }
  0xb1   :  { %590 = vmatprep.subr.mxu0 %v340_v21  ;;  %661 = vmatprep.subr.mxu1 %v342_v22  ;;  %v1081_v20 = vld [vmem:[#allocation6 + $0xbc8] sm:$0xff]  ;;  %v824_v21 = vld [vmem:[#allocation6 + $0x3c0] sm:$0xff] }
  0xb2   :  { %591 = vmatpush2.msra.mxu0 %v339_v23  ;;  %662 = vmatpush2.msra.mxu1 %v341_v24  ;;  %v1080_v22 = vld [vmem:[#allocation6 + $0xbc0] sm:$0xff]  ;;  %v817_v23 = vld [vmem:[#allocation6 + $0x388] sm:$0xff] }
  0xb3   :  { %592 = vmatprep.subr.mxu0 %v332_v25  ;;  %663 = vmatprep.subr.mxu1 %v334_v26  ;;  %v1073_v24 = vld [vmem:[#allocation6 + $0xb88] sm:$0xff]  ;;  %v816_v25 = vld [vmem:[#allocation6 + $0x380] sm:$0xff] }
  0xb4   :  { %593 = vmatpush2.msra.mxu0 %v331_v27  ;;  %664 = vmatpush2.msra.mxu1 %v333_v28  ;;  %v1072_v26 = vld [vmem:[#allocation6 + $0xb80] sm:$0xff]  ;;  %v809_v27 = vld [vmem:[#allocation6 + $0x348] sm:$0xff] }
  0xb5   :  { %594 = vmatprep.subr.mxu0 %v324_v29  ;;  %665 = vmatprep.subr.mxu1 %v326_v30  ;;  %v1065_v28 = vld [vmem:[#allocation6 + $0xb48] sm:$0xff]  ;;  %v808_v29 = vld [vmem:[#allocation6 + $0x340] sm:$0xff] }
  0xb6   :  { %595 = vmatpush2.msra.mxu0 %v323_v31  ;;  %666 = vmatpush2.msra.mxu1 %v325_v32  ;;  %v801_v30 = vld [vmem:[#allocation6 + $0x308] sm:$0xff]  ;;  %v1056_v32 = vld [vmem:[#allocation6 + $0xb00] sm:$0xff] }
  0xb7   :  { %596 = vmatprep.subr.mxu0 %v316_v33  ;;  %667 = vmatprep.subr.mxu1 %v318_v34  ;;  %v1057_v31 = vld [vmem:[#allocation6 + $0xb08] sm:$0xff] }
  0xb8   :  { %597 = vmatpush2.msra.mxu0 %v315_v35  ;;  %668 = vmatpush2.msra.mxu1 %v317_v36  ;;  %v793_v33 = vld [vmem:[#allocation6 + $0x2c8] sm:$0xff]  ;;  %v792_v35 = vld [vmem:[#allocation6 + $0x2c0] sm:$0xff] }
  0xb9   :  { %598 = vmatprep.subr.mxu0 %v308_v37  ;;  %669 = vmatprep.subr.mxu1 %v310_v39  ;;  %v1049_v34 = vld [vmem:[#allocation6 + $0xac8] sm:$0xff]  ;;  %v1048_v36 = vld [vmem:[#allocation6 + $0xac0] sm:$0xff] }
  0xba   :  { %599 = vmatpush2.msra.mxu0 %v307_v40  ;;  %670 = vmatpush2.msra.mxu1 %v309_v41  ;;  %v785_v37 = vld [vmem:[#allocation6 + $0x288] sm:$0xff]  ;;  %v784_v40 = vld [vmem:[#allocation6 + $0x280] sm:$0xff] }
  0xbb   :  { %600 = vmatprep.subr.mxu0 %v300_v42  ;;  %671 = vmatprep.subr.mxu1 %v302_v43  ;;  %v1041_v39 = vld [vmem:[#allocation6 + $0xa88] sm:$0xff]  ;;  %v1040_v41 = vld [vmem:[#allocation6 + $0xa80] sm:$0xff] }
  0xbc   :  { %601 = vmatpush2.msra.mxu0 %v299_v44  ;;  %672 = vmatpush2.msra.mxu1 %v301_v45  ;;  %v777_v42 = vld [vmem:[#allocation6 + $0x248] sm:$0xff]  ;;  %v776_v44 = vld [vmem:[#allocation6 + $0x240] sm:$0xff] }
  0xbd   :  { %602 = vmatprep.subr.mxu0 %v292_v46  ;;  %673 = vmatprep.subr.mxu1 %v294_v48  ;;  %v1033_v43 = vld [vmem:[#allocation6 + $0xa48] sm:$0xff]  ;;  %v1032_v45 = vld [vmem:[#allocation6 + $0xa40] sm:$0xff] }
  0xbe   :  { %603 = vmatpush2.msra.mxu0 %v291_v49  ;;  %674 = vmatpush2.msra.mxu1 %v293_v50  ;;  %v769_v46 = vld [vmem:[#allocation6 + $0x208] sm:$0xff]  ;;  %v768_v49 = vld [vmem:[#allocation6 + $0x200] sm:$0xff] }
  0xbf   :  { %604 = vmatprep.subr.mxu0 %v284_v51  ;;  %675 = vmatprep.subr.mxu1 %v286_v52  ;;  %v1025_v48 = vld [vmem:[#allocation6 + $0xa08] sm:$0xff]  ;;  %v1024_v50 = vld [vmem:[#allocation6 + $0xa00] sm:$0xff] }
  0xc0   :  { %605 = vmatpush2.msra.mxu0 %v283_v53  ;;  %676 = vmatpush2.msra.mxu1 %v285_v54  ;;  %v761_v51 = vld [vmem:[#allocation6 + $0x1c8] sm:$0xff]  ;;  %v760_v53 = vld [vmem:[#allocation6 + $0x1c0] sm:$0xff] }
  0xc1   :  { %606 = vmatprep.subr.mxu0 %v276_v55  ;;  %677 = vmatprep.subr.mxu1 %v278_v57  ;;  %v1017_v52 = vld [vmem:[#allocation6 + $0x9c8] sm:$0xff]  ;;  %v1016_v54 = vld [vmem:[#allocation6 + $0x9c0] sm:$0xff] }
  0xc2   :  { %607 = vmatpush2.msra.mxu0 %v275_v58  ;;  %678 = vmatpush2.msra.mxu1 %v277_v59  ;;  %v753_v55 = vld [vmem:[#allocation6 + $0x188] sm:$0xff]  ;;  %v752_v58 = vld [vmem:[#allocation6 + $0x180] sm:$0xff] }
  0xc3   :  { %608 = vmatprep.subr.mxu0 %v268_v60  ;;  %679 = vmatprep.subr.mxu1 %v270_v61  ;;  %v1009_v57 = vld [vmem:[#allocation6 + $0x988] sm:$0xff]  ;;  %v1008_v59 = vld [vmem:[#allocation6 + $0x980] sm:$0xff] }
  0xc4   :  { %609 = vmatpush2.msra.mxu0 %v267_v63  ;;  %680 = vmatpush2.msra.mxu1 %v269_v0  ;;  %v745_v60 = vld [vmem:[#allocation6 + $0x148] sm:$0xff]  ;;  %v744_v63 = vld [vmem:[#allocation6 + $0x140] sm:$0xff] }
  0xc5   :  { %610 = vmatprep.subr.mxu0 %v260_v1  ;;  %681 = vmatprep.subr.mxu1 %v262_v2  ;;  %v1001_v61 = vld [vmem:[#allocation6 + $0x948] sm:$0xff]  ;;  %v1000_v0 = vld [vmem:[#allocation6 + $0x940] sm:$0xff] }
  0xc6   :  { %611 = vmatpush2.msra.mxu0 %v259_v4  ;;  %682 = vmatpush2.msra.mxu1 %v261_v5  ;;  %v737_v1 = vld [vmem:[#allocation6 + $0x108] sm:$0xff]  ;;  %v736_v4 = vld [vmem:[#allocation6 + $0x100] sm:$0xff] }
  0xc7   :  { %612 = vmatprep.subr.mxu0 %v252_v7  ;;  %683 = vmatprep.subr.mxu1 %v254_v8  ;;  %v993_v2 = vld [vmem:[#allocation6 + $0x908] sm:$0xff]  ;;  %v992_v5 = vld [vmem:[#allocation6 + $0x900] sm:$0xff] }
  0xc8   :  { %613 = vmatpush2.msra.mxu0 %v251_v9  ;;  %684 = vmatpush2.msra.mxu1 %v253_v10  ;;  %v729_v7 = vld [vmem:[#allocation6 + $0xc8] sm:$0xff]  ;;  %v728_v9 = vld [vmem:[#allocation6 + $0xc0] sm:$0xff] }
  0xc9   :  { %614 = vmatprep.subr.mxu0 %v244_v11  ;;  %685 = vmatprep.subr.mxu1 %v246_v12  ;;  %v985_v8 = vld [vmem:[#allocation6 + $0x8c8] sm:$0xff]  ;;  %v984_v10 = vld [vmem:[#allocation6 + $0x8c0] sm:$0xff] }
  0xca   :  { %615 = vmatpush2.msra.mxu0 %v243_v13  ;;  %686 = vmatpush2.msra.mxu1 %v245_v14  ;;  %v721_v11 = vld [vmem:[#allocation6 + $0x88] sm:$0xff]  ;;  %v720_v13 = vld [vmem:[#allocation6 + $0x80] sm:$0xff] }
  0xcb   :  { %616 = vmatprep.subr.mxu0 %v236_v15  ;;  %687 = vmatprep.subr.mxu1 %v238_v16  ;;  %v977_v12 = vld [vmem:[#allocation6 + $0x888] sm:$0xff]  ;;  %v976_v14 = vld [vmem:[#allocation6 + $0x880] sm:$0xff] }
  0xcc   :  { %617 = vmatpush2.msra.mxu0 %v235_v17  ;;  %618 = vmatprep.mubr.f32.mxu0 %v3721_v3  ;;  %v713_v15 = vld [vmem:[#allocation6 + $0x48] sm:$0xff]  ;;  %v712_v17 = vld [vmem:[#allocation6 + $0x40] sm:$0xff] }
  0xcd   :  { %688 = vmatpush2.msra.mxu1 %v237_v18  ;;  %689 = vmatprep.mubr.f32.mxu1 %v3721_v3  ;;  %v1064_v3 = vld [vmem:[#allocation6 + $0xb40] sm:$0xff]  ;;  %v969_v16 = vld [vmem:[#allocation6 + $0x848] sm:$0xff] }
  0xce   :  { %619 = vmatmul.mubr.f32.vlgmr.msra.gmra.mxu0 %v3724_v6  ;;  %690 = vmatmul.mubr.f32.vlgmr.msra.gmra.mxu1 %v3724_v6  ;;  %v800_v6 = vld [vmem:[#allocation6 + $0x300] sm:$0xff] }
  0xcf   :  { %1770 = vmatprep.subr.mxu0 %v825_v19  ;;  %1841 = vmatprep.subr.mxu1 %v1081_v20  ;;  %v968_v18 = vld [vmem:[#allocation6 + $0x840] sm:$0xff]  ;;  %v705_v19 = vld [vmem:[#allocation6 + $0x8] sm:$0xff] }
  0xd0   :  { %1771 = vmatpush1.msra.mxu0 %v824_v21  ;;  %1842 = vmatpush1.msra.mxu1 %v1080_v22  ;;  %v961_v20 = vld [vmem:[#allocation6 + $0x808] sm:$0xff]  ;;  %v704_v21 = vld [vmem:[#allocation6] sm:$0xff] }
  0xd1   :  { %1772 = vmatprep.subr.mxu0 %v817_v23  ;;  %1843 = vmatprep.subr.mxu1 %v1073_v24  ;;  %v960_v22 = vld [vmem:[#allocation6 + $0x800] sm:$0xff]  ;;  %v953_v23 = vld [vmem:[#allocation6 + $0x7c8] sm:$0xff] }
  0xd2   :  { %1773 = vmatpush1.msra.mxu0 %v816_v25  ;;  %1844 = vmatpush1.msra.mxu1 %v1072_v26  ;;  %v1209_v24 = vld [vmem:[#allocation6 + $0xfc8] sm:$0xff]  ;;  %v952_v25 = vld [vmem:[#allocation6 + $0x7c0] sm:$0xff] }
  0xd3   :  { %1774 = vmatprep.subr.mxu0 %v809_v27  ;;  %1845 = vmatprep.subr.mxu1 %v1065_v28  ;;  %v1208_v26 = vld [vmem:[#allocation6 + $0xfc0] sm:$0xff]  ;;  %v945_v27 = vld [vmem:[#allocation6 + $0x788] sm:$0xff] }
  0xd4   :  { %1775 = vmatpush1.msra.mxu0 %v808_v29  ;;  %1846 = vmatpush1.msra.mxu1 %v1064_v3  ;;  %v1201_v28 = vld [vmem:[#allocation6 + $0xf88] sm:$0xff]  ;;  %v944_v29 = vld [vmem:[#allocation6 + $0x780] sm:$0xff] }
  0xd5   :  { %1776 = vmatprep.subr.mxu0 %v801_v30  ;;  %1847 = vmatprep.subr.mxu1 %v1057_v31  ;;  %v1200_v3 = vld [vmem:[#allocation6 + $0xf80] sm:$0xff]  ;;  %v937_v30 = vld [vmem:[#allocation6 + $0x748] sm:$0xff] }
  0xd6   :  { %1777 = vmatpush1.msra.mxu0 %v800_v6  ;;  %1848 = vmatpush1.msra.mxu1 %v1056_v32  ;;  %v1193_v31 = vld [vmem:[#allocation6 + $0xf48] sm:$0xff]  ;;  %v936_v6 = vld [vmem:[#allocation6 + $0x740] sm:$0xff] }
  0xd7   :  { %1778 = vmatprep.subr.mxu0 %v793_v33  ;;  %1849 = vmatprep.subr.mxu1 %v1049_v34  ;;  %v1192_v32 = vld [vmem:[#allocation6 + $0xf40] sm:$0xff]  ;;  %v929_v33 = vld [vmem:[#allocation6 + $0x708] sm:$0xff] }
  0xd8   :  { %1779 = vmatpush1.msra.mxu0 %v792_v35  ;;  %1850 = vmatpush1.msra.mxu1 %v1048_v36  ;;  %v1185_v34 = vld [vmem:[#allocation6 + $0xf08] sm:$0xff]  ;;  %v928_v35 = vld [vmem:[#allocation6 + $0x700] sm:$0xff] }
  0xd9   :  { %1780 = vmatprep.subr.mxu0 %v785_v37  ;;  %1851 = vmatprep.subr.mxu1 %v1041_v39  ;;  %v1184_v36 = vld [vmem:[#allocation6 + $0xf00] sm:$0xff]  ;;  %v921_v37 = vld [vmem:[#allocation6 + $0x6c8] sm:$0xff] }
  0xda   :  { %1781 = vmatpush1.msra.mxu0 %v784_v40  ;;  %1852 = vmatpush1.msra.mxu1 %v1040_v41  ;;  %v1177_v39 = vld [vmem:[#allocation6 + $0xec8] sm:$0xff]  ;;  %v920_v40 = vld [vmem:[#allocation6 + $0x6c0] sm:$0xff] }
  0xdb   :  { %1782 = vmatprep.subr.mxu0 %v777_v42  ;;  %1853 = vmatprep.subr.mxu1 %v1033_v43  ;;  %v1176_v41 = vld [vmem:[#allocation6 + $0xec0] sm:$0xff]  ;;  %v913_v42 = vld [vmem:[#allocation6 + $0x688] sm:$0xff] }
  0xdc   :  { %1783 = vmatpush1.msra.mxu0 %v776_v44  ;;  %1854 = vmatpush1.msra.mxu1 %v1032_v45  ;;  %v1169_v43 = vld [vmem:[#allocation6 + $0xe88] sm:$0xff]  ;;  %v912_v44 = vld [vmem:[#allocation6 + $0x680] sm:$0xff] }
  0xdd   :  { %1784 = vmatprep.subr.mxu0 %v769_v46  ;;  %1855 = vmatprep.subr.mxu1 %v1025_v48  ;;  %v1168_v45 = vld [vmem:[#allocation6 + $0xe80] sm:$0xff]  ;;  %v905_v46 = vld [vmem:[#allocation6 + $0x648] sm:$0xff] }
  0xde   :  { %1785 = vmatpush1.msra.mxu0 %v768_v49  ;;  %1856 = vmatpush1.msra.mxu1 %v1024_v50  ;;  %v1161_v48 = vld [vmem:[#allocation6 + $0xe48] sm:$0xff]  ;;  %v904_v49 = vld [vmem:[#allocation6 + $0x640] sm:$0xff] }
  0xdf   :  { %1786 = vmatprep.subr.mxu0 %v761_v51  ;;  %1857 = vmatprep.subr.mxu1 %v1017_v52  ;;  %v1160_v50 = vld [vmem:[#allocation6 + $0xe40] sm:$0xff]  ;;  %v897_v51 = vld [vmem:[#allocation6 + $0x608] sm:$0xff] }
  0xe0   :  { %1787 = vmatpush1.msra.mxu0 %v760_v53  ;;  %1858 = vmatpush1.msra.mxu1 %v1016_v54  ;;  %v1153_v52 = vld [vmem:[#allocation6 + $0xe08] sm:$0xff]  ;;  %v896_v53 = vld [vmem:[#allocation6 + $0x600] sm:$0xff] }
  0xe1   :  { %1788 = vmatprep.subr.mxu0 %v753_v55  ;;  %1859 = vmatprep.subr.mxu1 %v1009_v57  ;;  %v1152_v54 = vld [vmem:[#allocation6 + $0xe00] sm:$0xff]  ;;  %v889_v55 = vld [vmem:[#allocation6 + $0x5c8] sm:$0xff] }
  0xe2   :  { %1789 = vmatpush1.msra.mxu0 %v752_v58  ;;  %1860 = vmatpush1.msra.mxu1 %v1008_v59  ;;  %v1145_v57 = vld [vmem:[#allocation6 + $0xdc8] sm:$0xff]  ;;  %v888_v58 = vld [vmem:[#allocation6 + $0x5c0] sm:$0xff] }
  0xe3   :  { %1790 = vmatprep.subr.mxu0 %v745_v60  ;;  %1861 = vmatprep.subr.mxu1 %v1001_v61  ;;  %v1144_v59 = vld [vmem:[#allocation6 + $0xdc0] sm:$0xff]  ;;  %v881_v60 = vld [vmem:[#allocation6 + $0x588] sm:$0xff] }
  0xe4   :  { %1791 = vmatpush1.msra.mxu0 %v744_v63  ;;  %1862 = vmatpush1.msra.mxu1 %v1000_v0  ;;  %v1137_v61 = vld [vmem:[#allocation6 + $0xd88] sm:$0xff]  ;;  %v880_v63 = vld [vmem:[#allocation6 + $0x580] sm:$0xff] }
  0xe5   :  { %1792 = vmatprep.subr.mxu0 %v737_v1  ;;  %1863 = vmatprep.subr.mxu1 %v993_v2  ;;  %v1136_v0 = vld [vmem:[#allocation6 + $0xd80] sm:$0xff]  ;;  %v873_v1 = vld [vmem:[#allocation6 + $0x548] sm:$0xff] }
  0xe6   :  { %1793 = vmatpush1.msra.mxu0 %v736_v4  ;;  %1864 = vmatpush1.msra.mxu1 %v992_v5  ;;  %v1129_v2 = vld [vmem:[#allocation6 + $0xd48] sm:$0xff]  ;;  %v872_v4 = vld [vmem:[#allocation6 + $0x540] sm:$0xff] }
  0xe7   :  { %1794 = vmatprep.subr.mxu0 %v729_v7  ;;  %1865 = vmatprep.subr.mxu1 %v985_v8  ;;  %v1128_v5 = vld [vmem:[#allocation6 + $0xd40] sm:$0xff]  ;;  %v865_v7 = vld [vmem:[#allocation6 + $0x508] sm:$0xff] }
  0xe8   :  { %1795 = vmatpush1.msra.mxu0 %v728_v9  ;;  %1866 = vmatpush1.msra.mxu1 %v984_v10  ;;  %v1121_v8 = vld [vmem:[#allocation6 + $0xd08] sm:$0xff]  ;;  %v864_v9 = vld [vmem:[#allocation6 + $0x500] sm:$0xff] }
  0xe9   :  { %1796 = vmatprep.subr.mxu0 %v721_v11  ;;  %1867 = vmatprep.subr.mxu1 %v977_v12  ;;  %v1120_v10 = vld [vmem:[#allocation6 + $0xd00] sm:$0xff]  ;;  %v857_v11 = vld [vmem:[#allocation6 + $0x4c8] sm:$0xff] }
  0xea   :  { %1797 = vmatpush1.msra.mxu0 %v720_v13  ;;  %1868 = vmatpush1.msra.mxu1 %v976_v14  ;;  %v1113_v12 = vld [vmem:[#allocation6 + $0xcc8] sm:$0xff]  ;;  %v856_v13 = vld [vmem:[#allocation6 + $0x4c0] sm:$0xff] }
  0xeb   :  { %1798 = vmatprep.subr.mxu0 %v713_v15  ;;  %1869 = vmatprep.subr.mxu1 %v969_v16  ;;  %v1112_v14 = vld [vmem:[#allocation6 + $0xcc0] sm:$0xff]  ;;  %v849_v15 = vld [vmem:[#allocation6 + $0x488] sm:$0xff] }
  0xec   :  { %1799 = vmatpush1.msra.mxu0 %v712_v17  ;;  %1870 = vmatpush1.msra.mxu1 %v968_v18  ;;  %v1105_v16 = vld [vmem:[#allocation6 + $0xc88] sm:$0xff]  ;;  %v848_v17 = vld [vmem:[#allocation6 + $0x480] sm:$0xff] }
  0xed   :  { %1800 = vmatprep.subr.mxu0 %v705_v19  ;;  %1871 = vmatprep.subr.mxu1 %v961_v20  ;;  %v1104_v18 = vld [vmem:[#allocation6 + $0xc80] sm:$0xff]  ;;  %v841_v19 = vld [vmem:[#allocation6 + $0x448] sm:$0xff] }
  0xee   :  { %1801 = vmatpush1.msra.mxu0 %v704_v21  ;;  %1872 = vmatpush1.msra.mxu1 %v960_v22  ;;  %v1097_v20 = vld [vmem:[#allocation6 + $0xc48] sm:$0xff]  ;;  %v840_v21 = vld [vmem:[#allocation6 + $0x440] sm:$0xff] }
  0xef   :  { %1802 = vmatprep.subr.mxu0 %v953_v23  ;;  %1873 = vmatprep.subr.mxu1 %v1209_v24  ;;  %v1096_v22 = vld [vmem:[#allocation6 + $0xc40] sm:$0xff]  ;;  %v833_v23 = vld [vmem:[#allocation6 + $0x408] sm:$0xff] }
  0xf0   :  { %1803 = vmatpush2.msra.mxu0 %v952_v25  ;;  %1874 = vmatpush2.msra.mxu1 %v1208_v26  ;;  %v1089_v24 = vld [vmem:[#allocation6 + $0xc08] sm:$0xff]  ;;  %v832_v25 = vld [vmem:[#allocation6 + $0x400] sm:$0xff] }
  0xf1   :  { %1804 = vmatprep.subr.mxu0 %v945_v27  ;;  %1875 = vmatprep.subr.mxu1 %v1201_v28  ;;  %v1088_v26 = vld [vmem:[#allocation6 + $0xc00] sm:$0xff]  ;;  %v1337_v27 = vld [vmem:[#allocation6 + $0x13c8] sm:$0xff] }
  0xf2   :  { %1805 = vmatpush2.msra.mxu0 %v944_v29  ;;  %1876 = vmatpush2.msra.mxu1 %v1200_v3  ;;  %v1593_v28 = vld [vmem:[#allocation6 + $0x1bc8] sm:$0xff]  ;;  %v382_v29 = vsub.s32 2, %v3709_v47  ;;  %v3735_v3 = vld [vmem:[#allocation4] sm:$0xff] }
  0xf3   :  { %1806 = vmatprep.subr.mxu0 %v937_v30  ;;  %1877 = vmatprep.subr.mxu1 %v1193_v31  ;;  %v386_v30 = vsub.s32 3, %v3709_v47 }
  0xf4   :  { %1807 = vmatpush2.msra.mxu0 %v936_v6  ;;  %1878 = vmatpush2.msra.mxu1 %v1192_v32  ;;  %v383_v31 = vrot.slane %v3735_v3, %v382_v29  ;;  %v375_v6 = vrot.slane %v3735_v3, %v3718_v62  ;;  %v379_v32 = vrot.slane %v3735_v3, %v3712_v56 }
  0xf5   :  { %1808 = vmatprep.subr.mxu0 %v929_v33  ;;  %1879 = vmatprep.subr.mxu1 %v1185_v34  ;;  %v387_v33 = vrot.slane %v3735_v3, %v386_v30 }
  0xf6   :  { %1809 = vmatpush2.msra.mxu0 %v928_v35  ;;  %1880 = vmatpush2.msra.mxu1 %v1184_v36 }
  0xf7   :  { %1810 = vmatprep.subr.mxu0 %v921_v37  ;;  %1881 = vmatprep.subr.mxu1 %v1177_v39 }
  0xf8   :  { %1811 = vmatpush2.msra.mxu0 %v920_v40  ;;  %1882 = vmatpush2.msra.mxu1 %v1176_v41 }
  0xf9   :  { %1812 = vmatprep.subr.mxu0 %v913_v42  ;;  %1883 = vmatprep.subr.mxu1 %v1169_v43 }
  0xfa   :  { %1813 = vmatpush2.msra.mxu0 %v912_v44  ;;  %1884 = vmatpush2.msra.mxu1 %v1168_v45 }
  0xfb   :  { %1814 = vmatprep.subr.mxu0 %v905_v46  ;;  %1885 = vmatprep.subr.mxu1 %v1161_v48  ;;  %v1336_v48 = vld [vmem:[#allocation6 + $0x13c0] sm:$0xff] }
  0xfc   :  { %1815 = vmatpush2.msra.mxu0 %v904_v49  ;;  %1886 = vmatpush2.msra.mxu1 %v1160_v50  ;;  %v1592_v49 = vld [vmem:[#allocation6 + $0x1bc0] sm:$0xff]  ;;  %v1329_v50 = vld [vmem:[#allocation6 + $0x1388] sm:$0xff] }
  0xfd   :  { %1816 = vmatprep.subr.mxu0 %v897_v51  ;;  %1887 = vmatprep.subr.mxu1 %v1153_v52  ;;  %v1585_v51 = vld [vmem:[#allocation6 + $0x1b88] sm:$0xff]  ;;  %v1328_v52 = vld [vmem:[#allocation6 + $0x1380] sm:$0xff] }
  0xfe   :  { %1817 = vmatpush2.msra.mxu0 %v896_v53  ;;  %1888 = vmatpush2.msra.mxu1 %v1152_v54  ;;  %v1584_v53 = vld [vmem:[#allocation6 + $0x1b80] sm:$0xff]  ;;  %v1321_v54 = vld [vmem:[#allocation6 + $0x1348] sm:$0xff] }
  0xff   :  { %1818 = vmatprep.subr.mxu0 %v889_v55  ;;  %1889 = vmatprep.subr.mxu1 %v1145_v57  ;;  %v1577_v55 = vld [vmem:[#allocation6 + $0x1b48] sm:$0xff]  ;;  %v1320_v57 = vld [vmem:[#allocation6 + $0x1340] sm:$0xff] }
 0x100   :  { %1819 = vmatpush2.msra.mxu0 %v888_v58  ;;  %1890 = vmatpush2.msra.mxu1 %v1144_v59  ;;  %v1576_v58 = vld [vmem:[#allocation6 + $0x1b40] sm:$0xff]  ;;  %v1313_v59 = vld [vmem:[#allocation6 + $0x1308] sm:$0xff] }
 0x101   :  { %1820 = vmatprep.subr.mxu0 %v881_v60  ;;  %1891 = vmatprep.subr.mxu1 %v1137_v61  ;;  %v1569_v60 = vld [vmem:[#allocation6 + $0x1b08] sm:$0xff]  ;;  %v1312_v61 = vld [vmem:[#allocation6 + $0x1300] sm:$0xff] }
 0x102   :  { %1821 = vmatpush2.msra.mxu0 %v880_v63  ;;  %1892 = vmatpush2.msra.mxu1 %v1136_v0  ;;  %v1568_v63 = vld [vmem:[#allocation6 + $0x1b00] sm:$0xff]  ;;  %v1305_v0 = vld [vmem:[#allocation6 + $0x12c8] sm:$0xff] }
 0x103   :  { %1822 = vmatprep.subr.mxu0 %v873_v1  ;;  %1893 = vmatprep.subr.mxu1 %v1129_v2  ;;  %v1561_v1 = vld [vmem:[#allocation6 + $0x1ac8] sm:$0xff]  ;;  %v1304_v2 = vld [vmem:[#allocation6 + $0x12c0] sm:$0xff] }
 0x104   :  { %1823 = vmatpush2.msra.mxu0 %v872_v4  ;;  %1894 = vmatpush2.msra.mxu1 %v1128_v5  ;;  %v1560_v4 = vld [vmem:[#allocation6 + $0x1ac0] sm:$0xff]  ;;  %v1297_v5 = vld [vmem:[#allocation6 + $0x1288] sm:$0xff] }
 0x105   :  { %1824 = vmatprep.subr.mxu0 %v865_v7  ;;  %1895 = vmatprep.subr.mxu1 %v1121_v8  ;;  %v1553_v7 = vld [vmem:[#allocation6 + $0x1a88] sm:$0xff]  ;;  %v1296_v8 = vld [vmem:[#allocation6 + $0x1280] sm:$0xff] }
 0x106   :  { %1825 = vmatpush2.msra.mxu0 %v864_v9  ;;  %1896 = vmatpush2.msra.mxu1 %v1120_v10  ;;  %v1552_v9 = vld [vmem:[#allocation6 + $0x1a80] sm:$0xff]  ;;  %v1289_v10 = vld [vmem:[#allocation6 + $0x1248] sm:$0xff] }
 0x107   :  { %1826 = vmatprep.subr.mxu0 %v857_v11  ;;  %1897 = vmatprep.subr.mxu1 %v1113_v12  ;;  %v1545_v11 = vld [vmem:[#allocation6 + $0x1a48] sm:$0xff]  ;;  %v1288_v12 = vld [vmem:[#allocation6 + $0x1240] sm:$0xff] }
 0x108   :  { %1827 = vmatpush2.msra.mxu0 %v856_v13  ;;  %1898 = vmatpush2.msra.mxu1 %v1112_v14  ;;  %v1544_v13 = vld [vmem:[#allocation6 + $0x1a40] sm:$0xff]  ;;  %v1281_v14 = vld [vmem:[#allocation6 + $0x1208] sm:$0xff] }
 0x109   :  { %1828 = vmatprep.subr.mxu0 %v849_v15  ;;  %1899 = vmatprep.subr.mxu1 %v1105_v16  ;;  %v1537_v15 = vld [vmem:[#allocation6 + $0x1a08] sm:$0xff]  ;;  %v1280_v16 = vld [vmem:[#allocation6 + $0x1200] sm:$0xff] }
 0x10a   :  { %1829 = vmatpush2.msra.mxu0 %v848_v17  ;;  %1900 = vmatpush2.msra.mxu1 %v1104_v18  ;;  %v1536_v17 = vld [vmem:[#allocation6 + $0x1a00] sm:$0xff]  ;;  %v1273_v18 = vld [vmem:[#allocation6 + $0x11c8] sm:$0xff] }
 0x10b   :  { %1830 = vmatprep.subr.mxu0 %v841_v19  ;;  %1901 = vmatprep.subr.mxu1 %v1097_v20  ;;  %v1529_v19 = vld [vmem:[#allocation6 + $0x19c8] sm:$0xff]  ;;  %v1272_v20 = vld [vmem:[#allocation6 + $0x11c0] sm:$0xff] }
 0x10c   :  { %1831 = vmatpush2.msra.mxu0 %v840_v21  ;;  %1902 = vmatpush2.msra.mxu1 %v1096_v22  ;;  %v1528_v21 = vld [vmem:[#allocation6 + $0x19c0] sm:$0xff]  ;;  %v1265_v22 = vld [vmem:[#allocation6 + $0x1188] sm:$0xff] }
 0x10d   :  { %1832 = vmatprep.subr.mxu0 %v833_v23  ;;  %1903 = vmatprep.subr.mxu1 %v1089_v24  ;;  %v1521_v23 = vld [vmem:[#allocation6 + $0x1988] sm:$0xff]  ;;  %v1264_v24 = vld [vmem:[#allocation6 + $0x1180] sm:$0xff] }
 0x10e   :  { %1833 = vmatpush2.msra.mxu0 %v832_v25  ;;  %1904 = vmatpush2.msra.mxu1 %v1088_v26  ;;  %v1520_v25 = vld [vmem:[#allocation6 + $0x1980] sm:$0xff]  ;;  %v1257_v26 = vld [vmem:[#allocation6 + $0x1148] sm:$0xff] }
 0x10f   :  { %1912 = vmatprep.subr.mxu0 %v1337_v27  ;;  %1983 = vmatprep.subr.mxu1 %v1593_v28  ;;  %v1513_v27 = vld [vmem:[#allocation6 + $0x1948] sm:$0xff]  ;;  %v1256_v28 = vld [vmem:[#allocation6 + $0x1140] sm:$0xff] }
 0x14c   :  { %v478_v34 = vpop.f32.mrf.mxu0  ;;  %v549_v35 = vpop.f32.mrf.mxu1 }
 0x14d   :  { %v550_v36 = vadd.f32 %v549_v35, %v383_v31  ;;  %v479_v37 = vadd.f32 %v478_v34, %v375_v6  ;;  %v1512_v31 = vld [vmem:[#allocation6 + $0x1940] sm:$0xff]  ;;  %v1249_v6 = vld [vmem:[#allocation6 + $0x1108] sm:$0xff] }
 0x14e   :  { %v480_v39 = vpop.f32.mrf.mxu0  ;;  %v551_v40 = vpop.f32.mrf.mxu1  ;;  %v1504_v34 = vld [vmem:[#allocation6 + $0x1900] sm:$0xff]  ;;  %v1241_v35 = vld [vmem:[#allocation6 + $0x10c8] sm:$0xff] }
 0x14f   :  { %v481_v41 = vadd.f32 %v480_v39, %v379_v32  ;;  %v552_v42 = vadd.f32 %v551_v40, %v387_v33  ;;  %v3748_v43 = vmax.f32 %v550_v36, 0.0  ;;  %v3754_v46 = vmax.f32 %v479_v37, 0.0  ;;  %v1505_v32 = vld [vmem:[#allocation6 + $0x1908] sm:$0xff]  ;;  %v1248_v33 = vld [vmem:[#allocation6 + $0x1100] sm:$0xff] }
 0x150   :  { %v1497_v36 = vld [vmem:[#allocation6 + $0x18c8] sm:$0xff]  ;;  %v1240_v37 = vld [vmem:[#allocation6 + $0x10c0] sm:$0xff] }
 0x151   :  { %v3750_v44 = vmax.f32 %v481_v41, 0.0  ;;  %v3752_v45 = vmax.f32 %v552_v42, 0.0  ;;  %v1496_v39 = vld [vmem:[#allocation6 + $0x18c0] sm:$0xff]  ;;  %v1233_v40 = vld [vmem:[#allocation6 + $0x1088] sm:$0xff] }
 0x152   :  { %v1489_v41 = vld [vmem:[#allocation6 + $0x1888] sm:$0xff]  ;;  %v1232_v42 = vld [vmem:[#allocation6 + $0x1080] sm:$0xff] }
 0x153   :  { %1834 = vmatprep.mubr.f32.mxu0 %v3750_v44  ;;  %1905 = vmatprep.mubr.f32.mxu1 %v3752_v45 }
 0x154   :  { %1835 = vmatmul.mubr.f32.vlgmr.msra.gmra.mxu0 %v3754_v46  ;;  %1906 = vmatmul.mubr.f32.vlgmr.msra.gmra.mxu1 %v3748_v43 }
 0x155   :  { %1913 = vmatpush1.msra.mxu0 %v1336_v48  ;;  %1984 = vmatpush1.msra.mxu1 %v1592_v49  ;;  %v1488_v48 = vld [vmem:[#allocation6 + $0x1880] sm:$0xff]  ;;  %v1225_v49 = vld [vmem:[#allocation6 + $0x1048] sm:$0xff] }
 0x156   :  { %1914 = vmatprep.subr.mxu0 %v1329_v50  ;;  %1985 = vmatprep.subr.mxu1 %v1585_v51  ;;  %v1481_v50 = vld [vmem:[#allocation6 + $0x1848] sm:$0xff]  ;;  %v1224_v51 = vld [vmem:[#allocation6 + $0x1040] sm:$0xff] }
 0x157   :  { %1915 = vmatpush1.msra.mxu0 %v1328_v52  ;;  %1986 = vmatpush1.msra.mxu1 %v1584_v53  ;;  %v1480_v52 = vld [vmem:[#allocation6 + $0x1840] sm:$0xff]  ;;  %v1217_v53 = vld [vmem:[#allocation6 + $0x1008] sm:$0xff] }
 0x158   :  { %1916 = vmatprep.subr.mxu0 %v1321_v54  ;;  %1987 = vmatprep.subr.mxu1 %v1577_v55  ;;  %v1473_v54 = vld [vmem:[#allocation6 + $0x1808] sm:$0xff]  ;;  %v1216_v55 = vld [vmem:[#allocation6 + $0x1000] sm:$0xff] }
 0x159   :  { %1917 = vmatpush1.msra.mxu0 %v1320_v57  ;;  %1988 = vmatpush1.msra.mxu1 %v1576_v58  ;;  %v1472_v57 = vld [vmem:[#allocation6 + $0x1800] sm:$0xff]  ;;  %v1465_v58 = vld [vmem:[#allocation6 + $0x17c8] sm:$0xff] }
 0x15a   :  { %1918 = vmatprep.subr.mxu0 %v1313_v59  ;;  %1989 = vmatprep.subr.mxu1 %v1569_v60  ;;  %v1721_v59 = vld [vmem:[#allocation6 + $0x1fc8] sm:$0xff]  ;;  %v1464_v60 = vld [vmem:[#allocation6 + $0x17c0] sm:$0xff] }
 0x15b   :  { %1919 = vmatpush1.msra.mxu0 %v1312_v61  ;;  %1990 = vmatpush1.msra.mxu1 %v1568_v63  ;;  %v1720_v61 = vld [vmem:[#allocation6 + $0x1fc0] sm:$0xff]  ;;  %v1457_v63 = vld [vmem:[#allocation6 + $0x1788] sm:$0xff] }
 0x15c   :  { %1920 = vmatprep.subr.mxu0 %v1305_v0  ;;  %1991 = vmatprep.subr.mxu1 %v1561_v1  ;;  %v1713_v0 = vld [vmem:[#allocation6 + $0x1f88] sm:$0xff]  ;;  %v1456_v1 = vld [vmem:[#allocation6 + $0x1780] sm:$0xff] }
 0x15d   :  { %1921 = vmatpush1.msra.mxu0 %v1304_v2  ;;  %1992 = vmatpush1.msra.mxu1 %v1560_v4  ;;  %v1712_v2 = vld [vmem:[#allocation6 + $0x1f80] sm:$0xff]  ;;  %v1449_v4 = vld [vmem:[#allocation6 + $0x1748] sm:$0xff] }
 0x15e   :  { %1922 = vmatprep.subr.mxu0 %v1297_v5  ;;  %1993 = vmatprep.subr.mxu1 %v1553_v7  ;;  %v1705_v5 = vld [vmem:[#allocation6 + $0x1f48] sm:$0xff]  ;;  %v1448_v7 = vld [vmem:[#allocation6 + $0x1740] sm:$0xff] }
 0x15f   :  { %1923 = vmatpush1.msra.mxu0 %v1296_v8  ;;  %1994 = vmatpush1.msra.mxu1 %v1552_v9  ;;  %v1704_v8 = vld [vmem:[#allocation6 + $0x1f40] sm:$0xff]  ;;  %v1441_v9 = vld [vmem:[#allocation6 + $0x1708] sm:$0xff] }
 0x160   :  { %1924 = vmatprep.subr.mxu0 %v1289_v10  ;;  %1995 = vmatprep.subr.mxu1 %v1545_v11  ;;  %v1697_v10 = vld [vmem:[#allocation6 + $0x1f08] sm:$0xff]  ;;  %v1440_v11 = vld [vmem:[#allocation6 + $0x1700] sm:$0xff] }
 0x161   :  { %1925 = vmatpush1.msra.mxu0 %v1288_v12  ;;  %1996 = vmatpush1.msra.mxu1 %v1544_v13  ;;  %v1696_v12 = vld [vmem:[#allocation6 + $0x1f00] sm:$0xff]  ;;  %v1433_v13 = vld [vmem:[#allocation6 + $0x16c8] sm:$0xff] }
 0x162   :  { %1926 = vmatprep.subr.mxu0 %v1281_v14  ;;  %1997 = vmatprep.subr.mxu1 %v1537_v15  ;;  %v1689_v14 = vld [vmem:[#allocation6 + $0x1ec8] sm:$0xff]  ;;  %v1432_v15 = vld [vmem:[#allocation6 + $0x16c0] sm:$0xff] }
 0x163   :  { %1927 = vmatpush1.msra.mxu0 %v1280_v16  ;;  %1998 = vmatpush1.msra.mxu1 %v1536_v17  ;;  %v1688_v16 = vld [vmem:[#allocation6 + $0x1ec0] sm:$0xff]  ;;  %v1425_v17 = vld [vmem:[#allocation6 + $0x1688] sm:$0xff] }
 0x164   :  { %1928 = vmatprep.subr.mxu0 %v1273_v18  ;;  %1999 = vmatprep.subr.mxu1 %v1529_v19  ;;  %v1681_v18 = vld [vmem:[#allocation6 + $0x1e88] sm:$0xff]  ;;  %v1424_v19 = vld [vmem:[#allocation6 + $0x1680] sm:$0xff] }
 0x165   :  { %1929 = vmatpush1.msra.mxu0 %v1272_v20  ;;  %2000 = vmatpush1.msra.mxu1 %v1528_v21  ;;  %v1680_v20 = vld [vmem:[#allocation6 + $0x1e80] sm:$0xff]  ;;  %v1417_v21 = vld [vmem:[#allocation6 + $0x1648] sm:$0xff] }
 0x166   :  { %1930 = vmatprep.subr.mxu0 %v1265_v22  ;;  %2001 = vmatprep.subr.mxu1 %v1521_v23  ;;  %v1673_v22 = vld [vmem:[#allocation6 + $0x1e48] sm:$0xff]  ;;  %v1416_v23 = vld [vmem:[#allocation6 + $0x1640] sm:$0xff] }
 0x167   :  { %1931 = vmatpush1.msra.mxu0 %v1264_v24  ;;  %2002 = vmatpush1.msra.mxu1 %v1520_v25  ;;  %v1672_v24 = vld [vmem:[#allocation6 + $0x1e40] sm:$0xff]  ;;  %v1409_v25 = vld [vmem:[#allocation6 + $0x1608] sm:$0xff] }
 0x168   :  { %1932 = vmatprep.subr.mxu0 %v1257_v26  ;;  %2003 = vmatprep.subr.mxu1 %v1513_v27  ;;  %v1665_v26 = vld [vmem:[#allocation6 + $0x1e08] sm:$0xff]  ;;  %v1408_v27 = vld [vmem:[#allocation6 + $0x1600] sm:$0xff] }
 0x169   :  { %1933 = vmatpush1.msra.mxu0 %v1256_v28  ;;  %2004 = vmatpush1.msra.mxu1 %v1512_v31  ;;  %v1664_v28 = vld [vmem:[#allocation6 + $0x1e00] sm:$0xff]  ;;  %v1401_v31 = vld [vmem:[#allocation6 + $0x15c8] sm:$0xff] }
 0x16a   :  { %1934 = vmatprep.subr.mxu0 %v1249_v6  ;;  %2005 = vmatprep.subr.mxu1 %v1505_v32  ;;  %v1657_v6 = vld [vmem:[#allocation6 + $0x1dc8] sm:$0xff]  ;;  %v1400_v32 = vld [vmem:[#allocation6 + $0x15c0] sm:$0xff] }
 0x16b   :  { %1935 = vmatpush1.msra.mxu0 %v1248_v33  ;;  %2006 = vmatpush1.msra.mxu1 %v1504_v34  ;;  %v1656_v33 = vld [vmem:[#allocation6 + $0x1dc0] sm:$0xff]  ;;  %v1393_v34 = vld [vmem:[#allocation6 + $0x1588] sm:$0xff] }
 0x16c   :  { %1936 = vmatprep.subr.mxu0 %v1241_v35  ;;  %2007 = vmatprep.subr.mxu1 %v1497_v36  ;;  %v1649_v35 = vld [vmem:[#allocation6 + $0x1d88] sm:$0xff]  ;;  %v1392_v36 = vld [vmem:[#allocation6 + $0x1580] sm:$0xff] }
 0x16d   :  { %1937 = vmatpush1.msra.mxu0 %v1240_v37  ;;  %2008 = vmatpush1.msra.mxu1 %v1496_v39  ;;  %v1648_v37 = vld [vmem:[#allocation6 + $0x1d80] sm:$0xff]  ;;  %v1385_v39 = vld [vmem:[#allocation6 + $0x1548] sm:$0xff] }
 0x16e   :  { %1938 = vmatprep.subr.mxu0 %v1233_v40  ;;  %2009 = vmatprep.subr.mxu1 %v1489_v41  ;;  %v1641_v40 = vld [vmem:[#allocation6 + $0x1d48] sm:$0xff]  ;;  %v1384_v41 = vld [vmem:[#allocation6 + $0x1540] sm:$0xff] }
 0x16f   :  { %1939 = vmatpush1.msra.mxu0 %v1232_v42  ;;  %2010 = vmatpush1.msra.mxu1 %v1488_v48  ;;  %v1640_v42 = vld [vmem:[#allocation6 + $0x1d40] sm:$0xff]  ;;  %v1377_v48 = vld [vmem:[#allocation6 + $0x1508] sm:$0xff] }
 0x170   :  { %1940 = vmatprep.subr.mxu0 %v1225_v49  ;;  %2011 = vmatprep.subr.mxu1 %v1481_v50  ;;  %v1633_v49 = vld [vmem:[#allocation6 + $0x1d08] sm:$0xff]  ;;  %v398_v50 = vsub.s32 6, %v3709_v47 }
 0x171   :  { %1941 = vmatpush1.msra.mxu0 %v1224_v51  ;;  %2012 = vmatpush1.msra.mxu1 %v1480_v52  ;;  %v1376_v51 = vld [vmem:[#allocation6 + $0x1500] sm:$0xff] }
 0x172   :  { %1942 = vmatprep.subr.mxu0 %v1217_v53  ;;  %2013 = vmatprep.subr.mxu1 %v1473_v54  ;;  %v1632_v52 = vld [vmem:[#allocation6 + $0x1d00] sm:$0xff]  ;;  %v390_v53 = vsub.s32 4, %v3709_v47  ;;  %v1369_v54 = vld [vmem:[#allocation6 + $0x14c8] sm:$0xff] }
 0x173   :  { %1943 = vmatpush1.msra.mxu0 %v1216_v55  ;;  %2014 = vmatpush1.msra.mxu1 %v1472_v57  ;;  %v1625_v55 = vld [vmem:[#allocation6 + $0x1cc8] sm:$0xff]  ;;  %v394_v57 = vsub.s32 5, %v3709_v47 }
 0x174   :  { %1944 = vmatprep.subr.mxu0 %v1465_v58  ;;  %2015 = vmatprep.subr.mxu1 %v1721_v59  ;;  %v402_v58 = vsub.s32 7, %v3709_v47  ;;  %v1368_v59 = vld [vmem:[#allocation6 + $0x14c0] sm:$0xff] }
 0x175   :  { %1945 = vmatpush2.msra.mxu0 %v1464_v60  ;;  %2016 = vmatpush2.msra.mxu1 %v1720_v61  ;;  %v1624_v60 = vld [vmem:[#allocation6 + $0x1cc0] sm:$0xff]  ;;  %v399_v61 = vrot.slane %v3735_v3, %v398_v50 }
 0x176   :  { %1946 = vmatprep.subr.mxu0 %v1457_v63  ;;  %2017 = vmatprep.subr.mxu1 %v1713_v0  ;;  %v1361_v63 = vld [vmem:[#allocation6 + $0x1488] sm:$0xff] }
 0x177   :  { %1947 = vmatpush2.msra.mxu0 %v1456_v1  ;;  %2018 = vmatpush2.msra.mxu1 %v1712_v2  ;;  %v1617_v0 = vld [vmem:[#allocation6 + $0x1c88] sm:$0xff]  ;;  %v391_v1 = vrot.slane %v3735_v3, %v390_v53  ;;  %v1360_v2 = vld [vmem:[#allocation6 + $0x1480] sm:$0xff] }
 0x178   :  { %1948 = vmatprep.subr.mxu0 %v1449_v4  ;;  %2019 = vmatprep.subr.mxu1 %v1705_v5  ;;  %v1616_v4 = vld [vmem:[#allocation6 + $0x1c80] sm:$0xff]  ;;  %v395_v5 = vrot.slane %v3735_v3, %v394_v57 }
 0x179   :  { %1949 = vmatpush2.msra.mxu0 %v1448_v7  ;;  %2020 = vmatpush2.msra.mxu1 %v1704_v8  ;;  %v403_v7 = vrot.slane %v3735_v3, %v402_v58  ;;  %v1353_v8 = vld [vmem:[#allocation6 + $0x1448] sm:$0xff]  ;;  %v1600_v3 = vld [vmem:[#allocation6 + $0x1c00] sm:$0xff] }
 0x17a   :  { %1950 = vmatprep.subr.mxu0 %v1441_v9  ;;  %2021 = vmatprep.subr.mxu1 %v1697_v10  ;;  %v1609_v9 = vld [vmem:[#allocation6 + $0x1c48] sm:$0xff] }
 0x17b   :  { %1951 = vmatpush2.msra.mxu0 %v1440_v11  ;;  %2022 = vmatpush2.msra.mxu1 %v1696_v12  ;;  %v1352_v12 = vld [vmem:[#allocation6 + $0x1440] sm:$0xff] }
 0x17c   :  { %1952 = vmatprep.subr.mxu0 %v1433_v13  ;;  %2023 = vmatprep.subr.mxu1 %v1689_v14  ;;  %v1608_v13 = vld [vmem:[#allocation6 + $0x1c40] sm:$0xff] }
 0x17d   :  { %1953 = vmatpush2.msra.mxu0 %v1432_v15  ;;  %2024 = vmatpush2.msra.mxu1 %v1688_v16  ;;  %v1345_v15 = vld [vmem:[#allocation6 + $0x1408] sm:$0xff] }
 0x17e   :  { %1954 = vmatprep.subr.mxu0 %v1425_v17  ;;  %2025 = vmatprep.subr.mxu1 %v1681_v18  ;;  %v1601_v16 = vld [vmem:[#allocation6 + $0x1c08] sm:$0xff] }
 0x17f   :  { %1955 = vmatpush2.msra.mxu0 %v1424_v19  ;;  %2026 = vmatpush2.msra.mxu1 %v1680_v20  ;;  %v1344_v20 = vld [vmem:[#allocation6 + $0x1400] sm:$0xff] }
 0x180   :  { %1956 = vmatprep.subr.mxu0 %v1417_v21  ;;  %2027 = vmatprep.subr.mxu1 %v1673_v22 }
 0x181   :  { %1957 = vmatpush2.msra.mxu0 %v1416_v23  ;;  %2028 = vmatpush2.msra.mxu1 %v1672_v24  ;;  %v827_v23 = vld [vmem:[#allocation6 + $0x3d8] sm:$0xff] }
 0x182   :  { %1958 = vmatprep.subr.mxu0 %v1409_v25  ;;  %2029 = vmatprep.subr.mxu1 %v1665_v26  ;;  %v1083_v24 = vld [vmem:[#allocation6 + $0xbd8] sm:$0xff] }
 0x183   :  { %1959 = vmatpush2.msra.mxu0 %v1408_v27  ;;  %2030 = vmatpush2.msra.mxu1 %v1664_v28 }
 0x184   :  { %1960 = vmatprep.subr.mxu0 %v1401_v31  ;;  %2031 = vmatprep.subr.mxu1 %v1657_v6  ;;  %v826_v31 = vld [vmem:[#allocation6 + $0x3d0] sm:$0xff] }
 0x185   :  { %1961 = vmatpush2.msra.mxu0 %v1400_v32  ;;  %2032 = vmatpush2.msra.mxu1 %v1656_v33  ;;  %v1082_v6 = vld [vmem:[#allocation6 + $0xbd0] sm:$0xff]  ;;  %v819_v32 = vld [vmem:[#allocation6 + $0x398] sm:$0xff] }
 0x186   :  { %1962 = vmatprep.subr.mxu0 %v1393_v34  ;;  %2033 = vmatprep.subr.mxu1 %v1649_v35  ;;  %v1075_v33 = vld [vmem:[#allocation6 + $0xb98] sm:$0xff]  ;;  %v818_v34 = vld [vmem:[#allocation6 + $0x390] sm:$0xff] }
 0x187   :  { %1963 = vmatpush2.msra.mxu0 %v1392_v36  ;;  %2034 = vmatpush2.msra.mxu1 %v1648_v37  ;;  %v1074_v35 = vld [vmem:[#allocation6 + $0xb90] sm:$0xff]  ;;  %v811_v36 = vld [vmem:[#allocation6 + $0x358] sm:$0xff] }
 0x188   :  { %1964 = vmatprep.subr.mxu0 %v1385_v39  ;;  %2035 = vmatprep.subr.mxu1 %v1641_v40  ;;  %v1067_v37 = vld [vmem:[#allocation6 + $0xb58] sm:$0xff]  ;;  %v810_v39 = vld [vmem:[#allocation6 + $0x350] sm:$0xff] }
 0x189   :  { %1965 = vmatpush2.msra.mxu0 %v1384_v41  ;;  %2036 = vmatpush2.msra.mxu1 %v1640_v42  ;;  %v1066_v40 = vld [vmem:[#allocation6 + $0xb50] sm:$0xff]  ;;  %v803_v41 = vld [vmem:[#allocation6 + $0x318] sm:$0xff] }
 0x18a   :  { %1966 = vmatprep.subr.mxu0 %v1377_v48  ;;  %2037 = vmatprep.subr.mxu1 %v1633_v49  ;;  %v1059_v42 = vld [vmem:[#allocation6 + $0xb18] sm:$0xff]  ;;  %v802_v48 = vld [vmem:[#allocation6 + $0x310] sm:$0xff] }
 0x18b   :  { %1967 = vmatpush2.msra.mxu0 %v1376_v51  ;;  %2038 = vmatpush2.msra.mxu1 %v1632_v52  ;;  %v1058_v49 = vld [vmem:[#allocation6 + $0xb10] sm:$0xff]  ;;  %v795_v51 = vld [vmem:[#allocation6 + $0x2d8] sm:$0xff] }
 0x18c   :  { %1968 = vmatprep.subr.mxu0 %v1369_v54  ;;  %2039 = vmatprep.subr.mxu1 %v1625_v55  ;;  %v1051_v52 = vld [vmem:[#allocation6 + $0xad8] sm:$0xff]  ;;  %v794_v54 = vld [vmem:[#allocation6 + $0x2d0] sm:$0xff] }
 0x18d   :  { %1969 = vmatpush2.msra.mxu0 %v1368_v59  ;;  %2040 = vmatpush2.msra.mxu1 %v1624_v60  ;;  %v1050_v55 = vld [vmem:[#allocation6 + $0xad0] sm:$0xff]  ;;  %v787_v59 = vld [vmem:[#allocation6 + $0x298] sm:$0xff] }
 0x18e   :  { %v620_v10 = vpop.f32.mrf.mxu0  ;;  %v691_v11 = vpop.f32.mrf.mxu1  ;;  %1970 = vmatprep.subr.mxu0 %v1361_v63  ;;  %2041 = vmatprep.subr.mxu1 %v1617_v0  ;;  %v1043_v60 = vld [vmem:[#allocation6 + $0xa98] sm:$0xff]  ;;  %v1042_v63 = vld [vmem:[#allocation6 + $0xa90] sm:$0xff] }
 0x18f   :  { %v692_v14 = vadd.f32 %v691_v11, %v399_v61  ;;  %1971 = vmatpush2.msra.mxu0 %v1360_v2  ;;  %2042 = vmatpush2.msra.mxu1 %v1616_v4  ;;  %v621_v17 = vadd.f32 %v620_v10, %v391_v1  ;;  %v786_v61 = vld [vmem:[#allocation6 + $0x290] sm:$0xff]  ;;  %v779_v0 = vld [vmem:[#allocation6 + $0x258] sm:$0xff] }
 0x190   :  { %v622_v18 = vpop.f32.mrf.mxu0  ;;  %v693_v19 = vpop.f32.mrf.mxu1  ;;  %1972 = vmatprep.subr.mxu0 %v1353_v8  ;;  %2043 = vmatprep.subr.mxu1 %v1609_v9  ;;  %v1035_v1 = vld [vmem:[#allocation6 + $0xa58] sm:$0xff]  ;;  %v778_v2 = vld [vmem:[#allocation6 + $0x250] sm:$0xff] }
 0x191   :  { %v623_v21 = vadd.f32 %v622_v18, %v395_v5  ;;  %v694_v22 = vadd.f32 %v693_v19, %v403_v7  ;;  %1973 = vmatpush2.msra.mxu0 %v1352_v12  ;;  %2044 = vmatpush2.msra.mxu1 %v1608_v13  ;;  %v3776_v25 = vmax.f32 %v692_v14, 0.0  ;;  %v3782_v28 = vmax.f32 %v621_v17, 0.0  ;;  %v1034_v4 = vld [vmem:[#allocation6 + $0xa50] sm:$0xff]  ;;  %v771_v5 = vld [vmem:[#allocation6 + $0x218] sm:$0xff] }
 0x192   :  { %1974 = vmatprep.subr.mxu0 %v1345_v15  ;;  %2045 = vmatprep.subr.mxu1 %v1601_v16  ;;  %v1027_v7 = vld [vmem:[#allocation6 + $0xa18] sm:$0xff]  ;;  %v770_v8 = vld [vmem:[#allocation6 + $0x210] sm:$0xff] }
 0x193   :  { %v3778_v26 = vmax.f32 %v623_v21, 0.0  ;;  %v3780_v27 = vmax.f32 %v694_v22, 0.0  ;;  %1975 = vmatpush2.msra.mxu0 %v1344_v20  ;;  %2046 = vmatpush2.msra.mxu1 %v1600_v3  ;;  %v1026_v9 = vld [vmem:[#allocation6 + $0xa10] sm:$0xff]  ;;  %v763_v10 = vld [vmem:[#allocation6 + $0x1d8] sm:$0xff] }
 0x194   :  { %2054 = vmatprep.subr.mxu0 %v827_v23  ;;  %2125 = vmatprep.subr.mxu1 %v1083_v24  ;;  %v1019_v11 = vld [vmem:[#allocation6 + $0x9d8] sm:$0xff]  ;;  %v762_v12 = vld [vmem:[#allocation6 + $0x1d0] sm:$0xff] }
 0x195   :  { %1976 = vmatprep.mubr.f32.mxu0 %v3778_v26  ;;  %2047 = vmatprep.mubr.f32.mxu1 %v3780_v27  ;;  %v1018_v13 = vld [vmem:[#allocation6 + $0x9d0] sm:$0xff]  ;;  %v755_v14 = vld [vmem:[#allocation6 + $0x198] sm:$0xff] }
 0x196   :  { %1977 = vmatmul.mubr.f32.vlgmr.msra.gmra.mxu0 %v3782_v28  ;;  %2048 = vmatmul.mubr.f32.vlgmr.msra.gmra.mxu1 %v3776_v25  ;;  %v1011_v15 = vld [vmem:[#allocation6 + $0x998] sm:$0xff]  ;;  %v754_v16 = vld [vmem:[#allocation6 + $0x190] sm:$0xff] }
 0x197   :  { %2055 = vmatpush1.msra.mxu0 %v826_v31  ;;  %2126 = vmatpush1.msra.mxu1 %v1082_v6  ;;  %v1010_v17 = vld [vmem:[#allocation6 + $0x990] sm:$0xff]  ;;  %v747_v18 = vld [vmem:[#allocation6 + $0x158] sm:$0xff] }
 0x198   :  { %2056 = vmatprep.subr.mxu0 %v819_v32  ;;  %2118 = vmatprep.mubr.f32.mxu0 %v3750_v44  ;;  %v1003_v19 = vld [vmem:[#allocation6 + $0x958] sm:$0xff]  ;;  %v746_v20 = vld [vmem:[#allocation6 + $0x150] sm:$0xff] }
 0x199   :  { %2127 = vmatprep.subr.mxu1 %v1075_v33  ;;  %2189 = vmatprep.mubr.f32.mxu1 %v3752_v45  ;;  %v1002_v3 = vld [vmem:[#allocation6 + $0x950] sm:$0xff]  ;;  %v739_v21 = vld [vmem:[#allocation6 + $0x118] sm:$0xff] }
 0x19a   :  { %2057 = vmatpush1.msra.mxu0 %v818_v34  ;;  %2128 = vmatpush1.msra.mxu1 %v1074_v35  ;;  %v995_v22 = vld [vmem:[#allocation6 + $0x918] sm:$0xff]  ;;  %v738_v23 = vld [vmem:[#allocation6 + $0x110] sm:$0xff] }
 0x19b   :  { %2058 = vmatprep.subr.mxu0 %v811_v36  ;;  %2129 = vmatprep.subr.mxu1 %v1067_v37  ;;  %v994_v24 = vld [vmem:[#allocation6 + $0x910] sm:$0xff]  ;;  %v731_v31 = vld [vmem:[#allocation6 + $0xd8] sm:$0xff] }
 0x19c   :  { %2059 = vmatpush1.msra.mxu0 %v810_v39  ;;  %2130 = vmatpush1.msra.mxu1 %v1066_v40  ;;  %v987_v6 = vld [vmem:[#allocation6 + $0x8d8] sm:$0xff]  ;;  %v730_v32 = vld [vmem:[#allocation6 + $0xd0] sm:$0xff] }
 0x19d   :  { %2060 = vmatprep.subr.mxu0 %v803_v41  ;;  %2131 = vmatprep.subr.mxu1 %v1059_v42  ;;  %v986_v33 = vld [vmem:[#allocation6 + $0x8d0] sm:$0xff]  ;;  %v723_v34 = vld [vmem:[#allocation6 + $0x98] sm:$0xff] }
 0x19e   :  { %2061 = vmatpush1.msra.mxu0 %v802_v48  ;;  %2132 = vmatpush1.msra.mxu1 %v1058_v49  ;;  %v979_v35 = vld [vmem:[#allocation6 + $0x898] sm:$0xff]  ;;  %v722_v36 = vld [vmem:[#allocation6 + $0x90] sm:$0xff] }
 0x19f   :  { %2062 = vmatprep.subr.mxu0 %v795_v51  ;;  %2133 = vmatprep.subr.mxu1 %v1051_v52  ;;  %v978_v37 = vld [vmem:[#allocation6 + $0x890] sm:$0xff]  ;;  %v715_v39 = vld [vmem:[#allocation6 + $0x58] sm:$0xff] }
 0x1a0   :  { %2063 = vmatpush1.msra.mxu0 %v794_v54  ;;  %2134 = vmatpush1.msra.mxu1 %v1050_v55  ;;  %v971_v40 = vld [vmem:[#allocation6 + $0x858] sm:$0xff]  ;;  %v714_v41 = vld [vmem:[#allocation6 + $0x50] sm:$0xff] }
 0x1a1   :  { %2064 = vmatprep.subr.mxu0 %v787_v59  ;;  %2135 = vmatprep.subr.mxu1 %v1043_v60  ;;  %v970_v42 = vld [vmem:[#allocation6 + $0x850] sm:$0xff]  ;;  %v707_v48 = vld [vmem:[#allocation6 + $0x18] sm:$0xff] }
 0x1a2   :  { %2065 = vmatpush1.msra.mxu0 %v786_v61  ;;  %2136 = vmatpush1.msra.mxu1 %v1042_v63  ;;  %v963_v49 = vld [vmem:[#allocation6 + $0x818] sm:$0xff]  ;;  %v706_v51 = vld [vmem:[#allocation6 + $0x10] sm:$0xff] }
 0x1a3   :  { %2066 = vmatprep.subr.mxu0 %v779_v0  ;;  %2137 = vmatprep.subr.mxu1 %v1035_v1  ;;  %v962_v52 = vld [vmem:[#allocation6 + $0x810] sm:$0xff]  ;;  %v955_v54 = vld [vmem:[#allocation6 + $0x7d8] sm:$0xff] }
 0x1a4   :  { %2067 = vmatpush1.msra.mxu0 %v778_v2  ;;  %2138 = vmatpush1.msra.mxu1 %v1034_v4  ;;  %v1211_v55 = vld [vmem:[#allocation6 + $0xfd8] sm:$0xff]  ;;  %v954_v59 = vld [vmem:[#allocation6 + $0x7d0] sm:$0xff] }
 0x1a5   :  { %2068 = vmatprep.subr.mxu0 %v771_v5  ;;  %2139 = vmatprep.subr.mxu1 %v1027_v7  ;;  %v1210_v60 = vld [vmem:[#allocation6 + $0xfd0] sm:$0xff]  ;;  %v947_v61 = vld [vmem:[#allocation6 + $0x798] sm:$0xff] }
 0x1a6   :  { %2069 = vmatpush1.msra.mxu0 %v770_v8  ;;  %2140 = vmatpush1.msra.mxu1 %v1026_v9  ;;  %v1203_v63 = vld [vmem:[#allocation6 + $0xf98] sm:$0xff]  ;;  %v946_v0 = vld [vmem:[#allocation6 + $0x790] sm:$0xff] }
 0x1a7   :  { %2070 = vmatprep.subr.mxu0 %v763_v10  ;;  %2141 = vmatprep.subr.mxu1 %v1019_v11  ;;  %v1202_v1 = vld [vmem:[#allocation6 + $0xf90] sm:$0xff]  ;;  %v939_v2 = vld [vmem:[#allocation6 + $0x758] sm:$0xff] }
 0x1a8   :  { %2071 = vmatpush1.msra.mxu0 %v762_v12  ;;  %2142 = vmatpush1.msra.mxu1 %v1018_v13  ;;  %v1195_v4 = vld [vmem:[#allocation6 + $0xf58] sm:$0xff]  ;;  %v938_v5 = vld [vmem:[#allocation6 + $0x750] sm:$0xff] }
 0x1a9   :  { %2072 = vmatprep.subr.mxu0 %v755_v14  ;;  %2143 = vmatprep.subr.mxu1 %v1011_v15  ;;  %v1194_v7 = vld [vmem:[#allocation6 + $0xf50] sm:$0xff]  ;;  %v931_v8 = vld [vmem:[#allocation6 + $0x718] sm:$0xff] }
 0x1aa   :  { %2073 = vmatpush1.msra.mxu0 %v754_v16  ;;  %2144 = vmatpush1.msra.mxu1 %v1010_v17  ;;  %v1187_v9 = vld [vmem:[#allocation6 + $0xf18] sm:$0xff]  ;;  %v930_v10 = vld [vmem:[#allocation6 + $0x710] sm:$0xff] }
 0x1ab   :  { %2074 = vmatprep.subr.mxu0 %v747_v18  ;;  %2145 = vmatprep.subr.mxu1 %v1003_v19  ;;  %v1186_v11 = vld [vmem:[#allocation6 + $0xf10] sm:$0xff]  ;;  %v923_v12 = vld [vmem:[#allocation6 + $0x6d8] sm:$0xff] }
 0x1ac   :  { %2075 = vmatpush1.msra.mxu0 %v746_v20  ;;  %2146 = vmatpush1.msra.mxu1 %v1002_v3  ;;  %v1179_v13 = vld [vmem:[#allocation6 + $0xed8] sm:$0xff]  ;;  %v922_v14 = vld [vmem:[#allocation6 + $0x6d0] sm:$0xff] }
 0x1ad   :  { %2076 = vmatprep.subr.mxu0 %v739_v21  ;;  %2147 = vmatprep.subr.mxu1 %v995_v22  ;;  %v1178_v15 = vld [vmem:[#allocation6 + $0xed0] sm:$0xff]  ;;  %v915_v16 = vld [vmem:[#allocation6 + $0x698] sm:$0xff] }
 0x1ae   :  { %2077 = vmatpush1.msra.mxu0 %v738_v23  ;;  %2148 = vmatpush1.msra.mxu1 %v994_v24  ;;  %v1171_v17 = vld [vmem:[#allocation6 + $0xe98] sm:$0xff]  ;;  %v914_v18 = vld [vmem:[#allocation6 + $0x690] sm:$0xff] }
 0x1af   :  { %2078 = vmatprep.subr.mxu0 %v731_v31  ;;  %2149 = vmatprep.subr.mxu1 %v987_v6  ;;  %v1170_v19 = vld [vmem:[#allocation6 + $0xe90] sm:$0xff]  ;;  %v907_v20 = vld [vmem:[#allocation6 + $0x658] sm:$0xff] }
 0x1b0   :  { %2079 = vmatpush1.msra.mxu0 %v730_v32  ;;  %2150 = vmatpush1.msra.mxu1 %v986_v33  ;;  %v1163_v3 = vld [vmem:[#allocation6 + $0xe58] sm:$0xff]  ;;  %v906_v21 = vld [vmem:[#allocation6 + $0x650] sm:$0xff] }
 0x1b1   :  { %2080 = vmatprep.subr.mxu0 %v723_v34  ;;  %2151 = vmatprep.subr.mxu1 %v979_v35  ;;  %v1162_v22 = vld [vmem:[#allocation6 + $0xe50] sm:$0xff]  ;;  %v899_v23 = vld [vmem:[#allocation6 + $0x618] sm:$0xff] }
 0x1b2   :  { %2081 = vmatpush1.msra.mxu0 %v722_v36  ;;  %2152 = vmatpush1.msra.mxu1 %v978_v37  ;;  %v1155_v24 = vld [vmem:[#allocation6 + $0xe18] sm:$0xff]  ;;  %v898_v31 = vld [vmem:[#allocation6 + $0x610] sm:$0xff] }
 0x1b3   :  { %2082 = vmatprep.subr.mxu0 %v715_v39  ;;  %2153 = vmatprep.subr.mxu1 %v971_v40  ;;  %v1154_v6 = vld [vmem:[#allocation6 + $0xe10] sm:$0xff]  ;;  %v891_v32 = vld [vmem:[#allocation6 + $0x5d8] sm:$0xff] }
 0x1b4   :  { %2083 = vmatpush1.msra.mxu0 %v714_v41  ;;  %2154 = vmatpush1.msra.mxu1 %v970_v42  ;;  %v1147_v33 = vld [vmem:[#allocation6 + $0xdd8] sm:$0xff]  ;;  %v890_v34 = vld [vmem:[#allocation6 + $0x5d0] sm:$0xff] }
 0x1b5   :  { %2084 = vmatprep.subr.mxu0 %v707_v48  ;;  %2155 = vmatprep.subr.mxu1 %v963_v49  ;;  %v1146_v35 = vld [vmem:[#allocation6 + $0xdd0] sm:$0xff]  ;;  %v883_v36 = vld [vmem:[#allocation6 + $0x598] sm:$0xff] }
 0x1b6   :  { %2085 = vmatpush1.msra.mxu0 %v706_v51  ;;  %2156 = vmatpush1.msra.mxu1 %v962_v52  ;;  %v1139_v37 = vld [vmem:[#allocation6 + $0xd98] sm:$0xff]  ;;  %v882_v39 = vld [vmem:[#allocation6 + $0x590] sm:$0xff] }
 0x1b7   :  { %2086 = vmatprep.subr.mxu0 %v955_v54  ;;  %2157 = vmatprep.subr.mxu1 %v1211_v55  ;;  %v1138_v40 = vld [vmem:[#allocation6 + $0xd90] sm:$0xff]  ;;  %v875_v41 = vld [vmem:[#allocation6 + $0x558] sm:$0xff] }
 0x1b8   :  { %2087 = vmatpush2.msra.mxu0 %v954_v59  ;;  %2158 = vmatpush2.msra.mxu1 %v1210_v60  ;;  %v1131_v42 = vld [vmem:[#allocation6 + $0xd58] sm:$0xff]  ;;  %v874_v48 = vld [vmem:[#allocation6 + $0x550] sm:$0xff] }
 0x1b9   :  { %2088 = vmatprep.subr.mxu0 %v947_v61  ;;  %2159 = vmatprep.subr.mxu1 %v1203_v63  ;;  %v1130_v49 = vld [vmem:[#allocation6 + $0xd50] sm:$0xff]  ;;  %v867_v51 = vld [vmem:[#allocation6 + $0x518] sm:$0xff] }
 0x1ba   :  { %2089 = vmatpush2.msra.mxu0 %v946_v0  ;;  %2160 = vmatpush2.msra.mxu1 %v1202_v1  ;;  %v1123_v52 = vld [vmem:[#allocation6 + $0xd18] sm:$0xff]  ;;  %v866_v54 = vld [vmem:[#allocation6 + $0x510] sm:$0xff] }
 0x1bb   :  { %2090 = vmatprep.subr.mxu0 %v939_v2  ;;  %2161 = vmatprep.subr.mxu1 %v1195_v4  ;;  %v1122_v55 = vld [vmem:[#allocation6 + $0xd10] sm:$0xff]  ;;  %v859_v59 = vld [vmem:[#allocation6 + $0x4d8] sm:$0xff] }
 0x1bc   :  { %2091 = vmatpush2.msra.mxu0 %v938_v5  ;;  %2162 = vmatpush2.msra.mxu1 %v1194_v7  ;;  %v1115_v60 = vld [vmem:[#allocation6 + $0xcd8] sm:$0xff]  ;;  %v858_v61 = vld [vmem:[#allocation6 + $0x4d0] sm:$0xff] }
 0x1bd   :  { %2092 = vmatprep.subr.mxu0 %v931_v8  ;;  %2163 = vmatprep.subr.mxu1 %v1187_v9  ;;  %v1114_v63 = vld [vmem:[#allocation6 + $0xcd0] sm:$0xff]  ;;  %v851_v0 = vld [vmem:[#allocation6 + $0x498] sm:$0xff] }
 0x1be   :  { %2093 = vmatpush2.msra.mxu0 %v930_v10  ;;  %2164 = vmatpush2.msra.mxu1 %v1186_v11  ;;  %v1107_v1 = vld [vmem:[#allocation6 + $0xc98] sm:$0xff]  ;;  %v850_v2 = vld [vmem:[#allocation6 + $0x490] sm:$0xff] }
 0x1bf   :  { %2094 = vmatprep.subr.mxu0 %v923_v12  ;;  %2165 = vmatprep.subr.mxu1 %v1179_v13  ;;  %v1106_v4 = vld [vmem:[#allocation6 + $0xc90] sm:$0xff]  ;;  %v843_v5 = vld [vmem:[#allocation6 + $0x458] sm:$0xff] }
 0x1c0   :  { %2095 = vmatpush2.msra.mxu0 %v922_v14  ;;  %2166 = vmatpush2.msra.mxu1 %v1178_v15  ;;  %v1099_v7 = vld [vmem:[#allocation6 + $0xc58] sm:$0xff]  ;;  %v842_v8 = vld [vmem:[#allocation6 + $0x450] sm:$0xff] }
 0x1c1   :  { %2096 = vmatprep.subr.mxu0 %v915_v16  ;;  %2167 = vmatprep.subr.mxu1 %v1171_v17  ;;  %v1098_v9 = vld [vmem:[#allocation6 + $0xc50] sm:$0xff]  ;;  %v835_v10 = vld [vmem:[#allocation6 + $0x418] sm:$0xff] }
 0x1c2   :  { %2097 = vmatpush2.msra.mxu0 %v914_v18  ;;  %2168 = vmatpush2.msra.mxu1 %v1170_v19  ;;  %v1091_v11 = vld [vmem:[#allocation6 + $0xc18] sm:$0xff]  ;;  %v834_v12 = vld [vmem:[#allocation6 + $0x410] sm:$0xff] }
 0x1c3   :  { %2098 = vmatprep.subr.mxu0 %v907_v20  ;;  %2169 = vmatprep.subr.mxu1 %v1163_v3  ;;  %v1090_v13 = vld [vmem:[#allocation6 + $0xc10] sm:$0xff]  ;;  %v1339_v14 = vld [vmem:[#allocation6 + $0x13d8] sm:$0xff] }
 0x1c4   :  { %2099 = vmatpush2.msra.mxu0 %v906_v21  ;;  %2170 = vmatpush2.msra.mxu1 %v1162_v22  ;;  %v1595_v15 = vld [vmem:[#allocation6 + $0x1bd8] sm:$0xff]  ;;  %v1338_v16 = vld [vmem:[#allocation6 + $0x13d0] sm:$0xff] }
 0x1c5   :  { %2100 = vmatprep.subr.mxu0 %v899_v23  ;;  %2171 = vmatprep.subr.mxu1 %v1155_v24  ;;  %v1594_v17 = vld [vmem:[#allocation6 + $0x1bd0] sm:$0xff]  ;;  %v1331_v18 = vld [vmem:[#allocation6 + $0x1398] sm:$0xff] }
 0x1c6   :  { %2101 = vmatpush2.msra.mxu0 %v898_v31  ;;  %2172 = vmatpush2.msra.mxu1 %v1154_v6  ;;  %v1587_v19 = vld [vmem:[#allocation6 + $0x1b98] sm:$0xff]  ;;  %v1330_v20 = vld [vmem:[#allocation6 + $0x1390] sm:$0xff] }
 0x1c7   :  { %2102 = vmatprep.subr.mxu0 %v891_v32  ;;  %2173 = vmatprep.subr.mxu1 %v1147_v33  ;;  %v1586_v3 = vld [vmem:[#allocation6 + $0x1b90] sm:$0xff]  ;;  %v1323_v21 = vld [vmem:[#allocation6 + $0x1358] sm:$0xff] }
 0x1c8   :  { %2103 = vmatpush2.msra.mxu0 %v890_v34  ;;  %2174 = vmatpush2.msra.mxu1 %v1146_v35  ;;  %v1579_v22 = vld [vmem:[#allocation6 + $0x1b58] sm:$0xff]  ;;  %v1322_v23 = vld [vmem:[#allocation6 + $0x1350] sm:$0xff] }
 0x1c9   :  { %2104 = vmatprep.subr.mxu0 %v883_v36  ;;  %2175 = vmatprep.subr.mxu1 %v1139_v37  ;;  %v1578_v24 = vld [vmem:[#allocation6 + $0x1b50] sm:$0xff]  ;;  %v1315_v31 = vld [vmem:[#allocation6 + $0x1318] sm:$0xff] }
 0x1ca   :  { %2105 = vmatpush2.msra.mxu0 %v882_v39  ;;  %2176 = vmatpush2.msra.mxu1 %v1138_v40  ;;  %v1571_v6 = vld [vmem:[#allocation6 + $0x1b18] sm:$0xff]  ;;  %v1314_v32 = vld [vmem:[#allocation6 + $0x1310] sm:$0xff] }
 0x1cb   :  { %2106 = vmatprep.subr.mxu0 %v875_v41  ;;  %2177 = vmatprep.subr.mxu1 %v1131_v42  ;;  %v1570_v33 = vld [vmem:[#allocation6 + $0x1b10] sm:$0xff]  ;;  %v1307_v34 = vld [vmem:[#allocation6 + $0x12d8] sm:$0xff] }
 0x1cc   :  { %2107 = vmatpush2.msra.mxu0 %v874_v48  ;;  %2178 = vmatpush2.msra.mxu1 %v1130_v49  ;;  %v1563_v35 = vld [vmem:[#allocation6 + $0x1ad8] sm:$0xff]  ;;  %v1306_v36 = vld [vmem:[#allocation6 + $0x12d0] sm:$0xff] }
 0x1cd   :  { %2108 = vmatprep.subr.mxu0 %v867_v51  ;;  %2179 = vmatprep.subr.mxu1 %v1123_v52  ;;  %v1562_v37 = vld [vmem:[#allocation6 + $0x1ad0] sm:$0xff]  ;;  %v1299_v39 = vld [vmem:[#allocation6 + $0x1298] sm:$0xff] }
 0x1ce   :  { %2109 = vmatpush2.msra.mxu0 %v866_v54  ;;  %2180 = vmatpush2.msra.mxu1 %v1122_v55  ;;  %v1555_v40 = vld [vmem:[#allocation6 + $0x1a98] sm:$0xff]  ;;  %v1298_v41 = vld [vmem:[#allocation6 + $0x1290] sm:$0xff] }
 0x1cf   :  { %2110 = vmatprep.subr.mxu0 %v859_v59  ;;  %2181 = vmatprep.subr.mxu1 %v1115_v60  ;;  %v1554_v42 = vld [vmem:[#allocation6 + $0x1a90] sm:$0xff]  ;;  %v1291_v48 = vld [vmem:[#allocation6 + $0x1258] sm:$0xff] }
 0x1d0   :  { %2111 = vmatpush2.msra.mxu0 %v858_v61  ;;  %2182 = vmatpush2.msra.mxu1 %v1114_v63  ;;  %v1547_v49 = vld [vmem:[#allocation6 + $0x1a58] sm:$0xff]  ;;  %v1290_v51 = vld [vmem:[#allocation6 + $0x1250] sm:$0xff] }
 0x1d1   :  { %2112 = vmatprep.subr.mxu0 %v851_v0  ;;  %2183 = vmatprep.subr.mxu1 %v1107_v1  ;;  %v1546_v52 = vld [vmem:[#allocation6 + $0x1a50] sm:$0xff]  ;;  %v1283_v54 = vld [vmem:[#allocation6 + $0x1218] sm:$0xff] }
 0x1d2   :  { %2113 = vmatpush2.msra.mxu0 %v850_v2  ;;  %2184 = vmatpush2.msra.mxu1 %v1106_v4  ;;  %v1539_v55 = vld [vmem:[#allocation6 + $0x1a18] sm:$0xff]  ;;  %v1282_v59 = vld [vmem:[#allocation6 + $0x1210] sm:$0xff] }
 0x1d3   :  { %2114 = vmatprep.subr.mxu0 %v843_v5  ;;  %2185 = vmatprep.subr.mxu1 %v1099_v7  ;;  %v1538_v60 = vld [vmem:[#allocation6 + $0x1a10] sm:$0xff]  ;;  %v1275_v61 = vld [vmem:[#allocation6 + $0x11d8] sm:$0xff] }
 0x1d4   :  { %2115 = vmatpush2.msra.mxu0 %v842_v8  ;;  %2186 = vmatpush2.msra.mxu1 %v1098_v9  ;;  %v1531_v63 = vld [vmem:[#allocation6 + $0x19d8] sm:$0xff]  ;;  %v1274_v0 = vld [vmem:[#allocation6 + $0x11d0] sm:$0xff] }
 0x1d5   :  { %2116 = vmatprep.subr.mxu0 %v835_v10  ;;  %2187 = vmatprep.subr.mxu1 %v1091_v11  ;;  %v1530_v1 = vld [vmem:[#allocation6 + $0x19d0] sm:$0xff]  ;;  %v1267_v2 = vld [vmem:[#allocation6 + $0x1198] sm:$0xff] }
 0x1d6   :  { %2117 = vmatpush2.msra.mxu0 %v834_v12  ;;  %2188 = vmatpush2.msra.mxu1 %v1090_v13  ;;  %v1523_v4 = vld [vmem:[#allocation6 + $0x1998] sm:$0xff]  ;;  %v1266_v5 = vld [vmem:[#allocation6 + $0x1190] sm:$0xff] }
 0x1d7   :  { %2119 = vmatmul.mubr.f32.vlgmr.msra.gmra.mxu0 %v3754_v46  ;;  %2190 = vmatmul.mubr.f32.vlgmr.msra.gmra.mxu1 %v3748_v43  ;;  %v1522_v7 = vld [vmem:[#allocation6 + $0x1990] sm:$0xff]  ;;  %v1259_v8 = vld [vmem:[#allocation6 + $0x1158] sm:$0xff] }
 0x1d8   :  { %2196 = vmatprep.subr.mxu0 %v1339_v14  ;;  %2267 = vmatprep.subr.mxu1 %v1595_v15  ;;  %v1515_v9 = vld [vmem:[#allocation6 + $0x1958] sm:$0xff]  ;;  %v1258_v10 = vld [vmem:[#allocation6 + $0x1150] sm:$0xff] }
 0x1d9   :  { %2197 = vmatpush1.msra.mxu0 %v1338_v16  ;;  %2260 = vmatprep.mubr.f32.mxu0 %v3778_v26  ;;  %v1514_v11 = vld [vmem:[#allocation6 + $0x1950] sm:$0xff]  ;;  %v1251_v12 = vld [vmem:[#allocation6 + $0x1118] sm:$0xff] }
 0x1da   :  { %2268 = vmatpush1.msra.mxu1 %v1594_v17  ;;  %2331 = vmatprep.mubr.f32.mxu1 %v3780_v27  ;;  %v1507_v13 = vld [vmem:[#allocation6 + $0x1918] sm:$0xff]  ;;  %v1250_v14 = vld [vmem:[#allocation6 + $0x1110] sm:$0xff] }
 0x1db   :  { %2198 = vmatprep.subr.mxu0 %v1331_v18  ;;  %2269 = vmatprep.subr.mxu1 %v1587_v19  ;;  %v1506_v15 = vld [vmem:[#allocation6 + $0x1910] sm:$0xff]  ;;  %v1243_v16 = vld [vmem:[#allocation6 + $0x10d8] sm:$0xff] }
 0x1dc   :  { %2199 = vmatpush1.msra.mxu0 %v1330_v20  ;;  %2270 = vmatpush1.msra.mxu1 %v1586_v3  ;;  %v1499_v17 = vld [vmem:[#allocation6 + $0x18d8] sm:$0xff]  ;;  %v1242_v18 = vld [vmem:[#allocation6 + $0x10d0] sm:$0xff] }
 0x1dd   :  { %2200 = vmatprep.subr.mxu0 %v1323_v21  ;;  %2271 = vmatprep.subr.mxu1 %v1579_v22  ;;  %v1498_v19 = vld [vmem:[#allocation6 + $0x18d0] sm:$0xff]  ;;  %v1235_v20 = vld [vmem:[#allocation6 + $0x1098] sm:$0xff] }
 0x1de   :  { %2201 = vmatpush1.msra.mxu0 %v1322_v23  ;;  %2272 = vmatpush1.msra.mxu1 %v1578_v24  ;;  %v1491_v3 = vld [vmem:[#allocation6 + $0x1898] sm:$0xff]  ;;  %v1234_v21 = vld [vmem:[#allocation6 + $0x1090] sm:$0xff] }
 0x1df   :  { %2202 = vmatprep.subr.mxu0 %v1315_v31  ;;  %2273 = vmatprep.subr.mxu1 %v1571_v6  ;;  %v1490_v22 = vld [vmem:[#allocation6 + $0x1890] sm:$0xff]  ;;  %v1227_v23 = vld [vmem:[#allocation6 + $0x1058] sm:$0xff] }
 0x1e0   :  { %2203 = vmatpush1.msra.mxu0 %v1314_v32  ;;  %2274 = vmatpush1.msra.mxu1 %v1570_v33  ;;  %v1483_v24 = vld [vmem:[#allocation6 + $0x1858] sm:$0xff]  ;;  %v1226_v31 = vld [vmem:[#allocation6 + $0x1050] sm:$0xff] }
 0x1e1   :  { %2204 = vmatprep.subr.mxu0 %v1307_v34  ;;  %2275 = vmatprep.subr.mxu1 %v1563_v35  ;;  %v1482_v6 = vld [vmem:[#allocation6 + $0x1850] sm:$0xff]  ;;  %v1219_v32 = vld [vmem:[#allocation6 + $0x1018] sm:$0xff] }
 0x1e2   :  { %2205 = vmatpush1.msra.mxu0 %v1306_v36  ;;  %2276 = vmatpush1.msra.mxu1 %v1562_v37  ;;  %v1475_v33 = vld [vmem:[#allocation6 + $0x1818] sm:$0xff]  ;;  %v1218_v34 = vld [vmem:[#allocation6 + $0x1010] sm:$0xff] }
 0x1e3   :  { %2206 = vmatprep.subr.mxu0 %v1299_v39  ;;  %2277 = vmatprep.subr.mxu1 %v1555_v40  ;;  %v1474_v35 = vld [vmem:[#allocation6 + $0x1810] sm:$0xff]  ;;  %v1467_v36 = vld [vmem:[#allocation6 + $0x17d8] sm:$0xff] }
 0x1e4   :  { %2207 = vmatpush1.msra.mxu0 %v1298_v41  ;;  %2278 = vmatpush1.msra.mxu1 %v1554_v42  ;;  %v1723_v37 = vld [vmem:[#allocation6 + $0x1fd8] sm:$0xff]  ;;  %v1466_v39 = vld [vmem:[#allocation6 + $0x17d0] sm:$0xff] }
 0x1e5   :  { %2208 = vmatprep.subr.mxu0 %v1291_v48  ;;  %2279 = vmatprep.subr.mxu1 %v1547_v49  ;;  %v1722_v40 = vld [vmem:[#allocation6 + $0x1fd0] sm:$0xff]  ;;  %v1459_v41 = vld [vmem:[#allocation6 + $0x1798] sm:$0xff] }
 0x1e6   :  { %2209 = vmatpush1.msra.mxu0 %v1290_v51  ;;  %2280 = vmatpush1.msra.mxu1 %v1546_v52  ;;  %v1715_v42 = vld [vmem:[#allocation6 + $0x1f98] sm:$0xff]  ;;  %v1458_v48 = vld [vmem:[#allocation6 + $0x1790] sm:$0xff] }
 0x1e7   :  { %2210 = vmatprep.subr.mxu0 %v1283_v54  ;;  %2281 = vmatprep.subr.mxu1 %v1539_v55  ;;  %v1714_v49 = vld [vmem:[#allocation6 + $0x1f90] sm:$0xff]  ;;  %v1451_v51 = vld [vmem:[#allocation6 + $0x1758] sm:$0xff] }
 0x1e8   :  { %2211 = vmatpush1.msra.mxu0 %v1282_v59  ;;  %2282 = vmatpush1.msra.mxu1 %v1538_v60  ;;  %v1707_v52 = vld [vmem:[#allocation6 + $0x1f58] sm:$0xff]  ;;  %v1450_v54 = vld [vmem:[#allocation6 + $0x1750] sm:$0xff] }
 0x1e9   :  { %2212 = vmatprep.subr.mxu0 %v1275_v61  ;;  %2283 = vmatprep.subr.mxu1 %v1531_v63  ;;  %v1706_v55 = vld [vmem:[#allocation6 + $0x1f50] sm:$0xff]  ;;  %v1443_v59 = vld [vmem:[#allocation6 + $0x1718] sm:$0xff] }
 0x1ea   :  { %2213 = vmatpush1.msra.mxu0 %v1274_v0  ;;  %2284 = vmatpush1.msra.mxu1 %v1530_v1  ;;  %v1699_v60 = vld [vmem:[#allocation6 + $0x1f18] sm:$0xff]  ;;  %v1442_v61 = vld [vmem:[#allocation6 + $0x1710] sm:$0xff] }
 0x1eb   :  { %2214 = vmatprep.subr.mxu0 %v1267_v2  ;;  %2285 = vmatprep.subr.mxu1 %v1523_v4  ;;  %v1698_v63 = vld [vmem:[#allocation6 + $0x1f10] sm:$0xff]  ;;  %v1435_v0 = vld [vmem:[#allocation6 + $0x16d8] sm:$0xff] }
 0x1ec   :  { %2215 = vmatpush1.msra.mxu0 %v1266_v5  ;;  %2286 = vmatpush1.msra.mxu1 %v1522_v7  ;;  %v1691_v1 = vld [vmem:[#allocation6 + $0x1ed8] sm:$0xff]  ;;  %v1434_v2 = vld [vmem:[#allocation6 + $0x16d0] sm:$0xff] }
 0x1ed   :  { %2216 = vmatprep.subr.mxu0 %v1259_v8  ;;  %2287 = vmatprep.subr.mxu1 %v1515_v9  ;;  %v1690_v4 = vld [vmem:[#allocation6 + $0x1ed0] sm:$0xff]  ;;  %v1427_v5 = vld [vmem:[#allocation6 + $0x1698] sm:$0xff] }
 0x1ee   :  { %2217 = vmatpush1.msra.mxu0 %v1258_v10  ;;  %2288 = vmatpush1.msra.mxu1 %v1514_v11  ;;  %v1683_v7 = vld [vmem:[#allocation6 + $0x1e98] sm:$0xff]  ;;  %v1426_v8 = vld [vmem:[#allocation6 + $0x1690] sm:$0xff] }
 0x1ef   :  { %2218 = vmatprep.subr.mxu0 %v1251_v12  ;;  %2289 = vmatprep.subr.mxu1 %v1507_v13  ;;  %v1682_v9 = vld [vmem:[#allocation6 + $0x1e90] sm:$0xff]  ;;  %v1419_v10 = vld [vmem:[#allocation6 + $0x1658] sm:$0xff] }
 0x1f0   :  { %2219 = vmatpush1.msra.mxu0 %v1250_v14  ;;  %2290 = vmatpush1.msra.mxu1 %v1506_v15  ;;  %v1675_v11 = vld [vmem:[#allocation6 + $0x1e58] sm:$0xff]  ;;  %v1418_v12 = vld [vmem:[#allocation6 + $0x1650] sm:$0xff] }
 0x1f1   :  { %2220 = vmatprep.subr.mxu0 %v1243_v16  ;;  %2291 = vmatprep.subr.mxu1 %v1499_v17  ;;  %v1674_v13 = vld [vmem:[#allocation6 + $0x1e50] sm:$0xff]  ;;  %v1411_v14 = vld [vmem:[#allocation6 + $0x1618] sm:$0xff] }
 0x1f2   :  { %2221 = vmatpush1.msra.mxu0 %v1242_v18  ;;  %2292 = vmatpush1.msra.mxu1 %v1498_v19  ;;  %v1667_v15 = vld [vmem:[#allocation6 + $0x1e18] sm:$0xff]  ;;  %v1410_v16 = vld [vmem:[#allocation6 + $0x1610] sm:$0xff] }
 0x1f3   :  { %2222 = vmatprep.subr.mxu0 %v1235_v20  ;;  %2293 = vmatprep.subr.mxu1 %v1491_v3  ;;  %v1666_v17 = vld [vmem:[#allocation6 + $0x1e10] sm:$0xff]  ;;  %v1403_v18 = vld [vmem:[#allocation6 + $0x15d8] sm:$0xff] }
 0x1f4   :  { %2223 = vmatpush1.msra.mxu0 %v1234_v21  ;;  %2294 = vmatpush1.msra.mxu1 %v1490_v22  ;;  %v1659_v19 = vld [vmem:[#allocation6 + $0x1dd8] sm:$0xff]  ;;  %v1402_v20 = vld [vmem:[#allocation6 + $0x15d0] sm:$0xff] }
 0x1f5   :  { %2224 = vmatprep.subr.mxu0 %v1227_v23  ;;  %2295 = vmatprep.subr.mxu1 %v1483_v24  ;;  %v1658_v3 = vld [vmem:[#allocation6 + $0x1dd0] sm:$0xff]  ;;  %v1395_v21 = vld [vmem:[#allocation6 + $0x1598] sm:$0xff] }
 0x1f6   :  { %2225 = vmatpush1.msra.mxu0 %v1226_v31  ;;  %2296 = vmatpush1.msra.mxu1 %v1482_v6  ;;  %v1651_v22 = vld [vmem:[#allocation6 + $0x1d98] sm:$0xff]  ;;  %v1394_v23 = vld [vmem:[#allocation6 + $0x1590] sm:$0xff] }
 0x1f7   :  { %2226 = vmatprep.subr.mxu0 %v1219_v32  ;;  %2297 = vmatprep.subr.mxu1 %v1475_v33  ;;  %v1650_v24 = vld [vmem:[#allocation6 + $0x1d90] sm:$0xff]  ;;  %v1387_v31 = vld [vmem:[#allocation6 + $0x1558] sm:$0xff] }
 0x1f8   :  { %2227 = vmatpush1.msra.mxu0 %v1218_v34  ;;  %2298 = vmatpush1.msra.mxu1 %v1474_v35  ;;  %v1643_v6 = vld [vmem:[#allocation6 + $0x1d58] sm:$0xff]  ;;  %v1386_v32 = vld [vmem:[#allocation6 + $0x1550] sm:$0xff] }
 0x1f9   :  { %2228 = vmatprep.subr.mxu0 %v1467_v36  ;;  %2299 = vmatprep.subr.mxu1 %v1723_v37  ;;  %v1642_v33 = vld [vmem:[#allocation6 + $0x1d50] sm:$0xff]  ;;  %v1379_v34 = vld [vmem:[#allocation6 + $0x1518] sm:$0xff] }
 0x1fa   :  { %2229 = vmatpush2.msra.mxu0 %v1466_v39  ;;  %2300 = vmatpush2.msra.mxu1 %v1722_v40  ;;  %v1635_v35 = vld [vmem:[#allocation6 + $0x1d18] sm:$0xff]  ;;  %v1378_v36 = vld [vmem:[#allocation6 + $0x1510] sm:$0xff] }
 0x1fb   :  { %2230 = vmatprep.subr.mxu0 %v1459_v41  ;;  %2301 = vmatprep.subr.mxu1 %v1715_v42  ;;  %v1634_v37 = vld [vmem:[#allocation6 + $0x1d10] sm:$0xff]  ;;  %v1371_v39 = vld [vmem:[#allocation6 + $0x14d8] sm:$0xff]  ;;  %v1728_v41 = vld [vmem:[#allocation7] sm:$0xff] }
 0x1fc   :  { %2231 = vmatpush2.msra.mxu0 %v1458_v48  ;;  %2302 = vmatpush2.msra.mxu1 %v1714_v49  ;;  %v1627_v40 = vld [vmem:[#allocation6 + $0x1cd8] sm:$0xff]  ;;  %v1370_v42 = vld [vmem:[#allocation6 + $0x14d0] sm:$0xff] }
 0x1fd   :  { %2232 = vmatprep.subr.mxu0 %v1451_v51  ;;  %2303 = vmatprep.subr.mxu1 %v1707_v52  ;;  %v1626_v48 = vld [vmem:[#allocation6 + $0x1cd0] sm:$0xff]  ;;  %v1363_v49 = vld [vmem:[#allocation6 + $0x1498] sm:$0xff] }
 0x1fe   :  { %2233 = vmatpush2.msra.mxu0 %v1450_v54  ;;  %2304 = vmatpush2.msra.mxu1 %v1706_v55  ;;  %v1619_v51 = vld [vmem:[#allocation6 + $0x1c98] sm:$0xff]  ;;  %v1362_v52 = vld [vmem:[#allocation6 + $0x1490] sm:$0xff]  ;;  %v1733_v55 = vrot.slane %v1728_v41, %v3718_v62  ;;  %v780_v41 = vld [vmem:[#allocation6 + $0x260] sm:$0xff] }
 0x1ff   :  { %2234 = vmatprep.subr.mxu0 %v1443_v59  ;;  %2305 = vmatprep.subr.mxu1 %v1699_v60  ;;  %v1618_v54 = vld [vmem:[#allocation6 + $0x1c90] sm:$0xff]  ;;  %v1355_v59 = vld [vmem:[#allocation6 + $0x1458] sm:$0xff] }
 0x200   :  { %2235 = vmatpush2.msra.mxu0 %v1442_v61  ;;  %2306 = vmatpush2.msra.mxu1 %v1698_v63  ;;  %v1611_v60 = vld [vmem:[#allocation6 + $0x1c58] sm:$0xff]  ;;  %v1354_v61 = vld [vmem:[#allocation6 + $0x1450] sm:$0xff] }
 0x201   :  { %2236 = vmatprep.subr.mxu0 %v1435_v0  ;;  %2307 = vmatprep.subr.mxu1 %v1691_v1  ;;  %v1610_v63 = vld [vmem:[#allocation6 + $0x1c50] sm:$0xff]  ;;  %v1347_v0 = vld [vmem:[#allocation6 + $0x1418] sm:$0xff] }
 0x202   :  { %2237 = vmatpush2.msra.mxu0 %v1434_v2  ;;  %2308 = vmatpush2.msra.mxu1 %v1690_v4  ;;  %v1603_v1 = vld [vmem:[#allocation6 + $0x1c18] sm:$0xff]  ;;  %v1346_v4 = vld [vmem:[#allocation6 + $0x1410] sm:$0xff] }
 0x203   :  { %2238 = vmatprep.subr.mxu0 %v1427_v5  ;;  %2309 = vmatprep.subr.mxu1 %v1683_v7  ;;  %v1602_v5 = vld [vmem:[#allocation6 + $0x1c10] sm:$0xff] }
 0x204   :  { %2239 = vmatpush2.msra.mxu0 %v1426_v8  ;;  %2310 = vmatpush2.msra.mxu1 %v1682_v9  ;;  %v829_v9 = vld [vmem:[#allocation6 + $0x3e8] sm:$0xff] }
 0x205   :  { %2240 = vmatprep.subr.mxu0 %v1419_v10  ;;  %2311 = vmatprep.subr.mxu1 %v1675_v11  ;;  %v1085_v10 = vld [vmem:[#allocation6 + $0xbe8] sm:$0xff] }
 0x206   :  { %2241 = vmatpush2.msra.mxu0 %v1418_v12  ;;  %2312 = vmatpush2.msra.mxu1 %v1674_v13  ;;  %v828_v12 = vld [vmem:[#allocation6 + $0x3e0] sm:$0xff] }
 0x207   :  { %2242 = vmatprep.subr.mxu0 %v1411_v14  ;;  %2313 = vmatprep.subr.mxu1 %v1667_v15  ;;  %v1084_v13 = vld [vmem:[#allocation6 + $0xbe0] sm:$0xff]  ;;  %v821_v14 = vld [vmem:[#allocation6 + $0x3a8] sm:$0xff] }
 0x208   :  { %2243 = vmatpush2.msra.mxu0 %v1410_v16  ;;  %2314 = vmatpush2.msra.mxu1 %v1666_v17  ;;  %v1077_v15 = vld [vmem:[#allocation6 + $0xba8] sm:$0xff]  ;;  %v820_v16 = vld [vmem:[#allocation6 + $0x3a0] sm:$0xff] }
 0x209   :  { %2244 = vmatprep.subr.mxu0 %v1403_v18  ;;  %2315 = vmatprep.subr.mxu1 %v1659_v19  ;;  %v1076_v17 = vld [vmem:[#allocation6 + $0xba0] sm:$0xff]  ;;  %v813_v18 = vld [vmem:[#allocation6 + $0x368] sm:$0xff] }
 0x20a   :  { %2245 = vmatpush2.msra.mxu0 %v1402_v20  ;;  %2316 = vmatpush2.msra.mxu1 %v1658_v3  ;;  %v1069_v19 = vld [vmem:[#allocation6 + $0xb68] sm:$0xff]  ;;  %v812_v20 = vld [vmem:[#allocation6 + $0x360] sm:$0xff] }
 0x20b   :  { %2246 = vmatprep.subr.mxu0 %v1395_v21  ;;  %2317 = vmatprep.subr.mxu1 %v1651_v22  ;;  %v1068_v3 = vld [vmem:[#allocation6 + $0xb60] sm:$0xff]  ;;  %v805_v21 = vld [vmem:[#allocation6 + $0x328] sm:$0xff] }
 0x20c   :  { %2247 = vmatpush2.msra.mxu0 %v1394_v23  ;;  %2318 = vmatpush2.msra.mxu1 %v1650_v24  ;;  %v1061_v22 = vld [vmem:[#allocation6 + $0xb28] sm:$0xff]  ;;  %v804_v23 = vld [vmem:[#allocation6 + $0x320] sm:$0xff] }
 0x20d   :  { %2248 = vmatprep.subr.mxu0 %v1387_v31  ;;  %2319 = vmatprep.subr.mxu1 %v1643_v6  ;;  %v1060_v24 = vld [vmem:[#allocation6 + $0xb20] sm:$0xff]  ;;  %v797_v31 = vld [vmem:[#allocation6 + $0x2e8] sm:$0xff] }
 0x20e   :  { %2249 = vmatpush2.msra.mxu0 %v1386_v32  ;;  %2320 = vmatpush2.msra.mxu1 %v1642_v33  ;;  %v1053_v6 = vld [vmem:[#allocation6 + $0xae8] sm:$0xff]  ;;  %v796_v32 = vld [vmem:[#allocation6 + $0x2e0] sm:$0xff] }
 0x20f   :  { %2250 = vmatprep.subr.mxu0 %v1379_v34  ;;  %2321 = vmatprep.subr.mxu1 %v1635_v35  ;;  %v1052_v33 = vld [vmem:[#allocation6 + $0xae0] sm:$0xff]  ;;  %v789_v34 = vld [vmem:[#allocation6 + $0x2a8] sm:$0xff] }
 0x210   :  { %2251 = vmatpush2.msra.mxu0 %v1378_v36  ;;  %2322 = vmatpush2.msra.mxu1 %v1634_v37  ;;  %v1045_v35 = vld [vmem:[#allocation6 + $0xaa8] sm:$0xff]  ;;  %v788_v36 = vld [vmem:[#allocation6 + $0x2a0] sm:$0xff] }
 0x211   :  { %2252 = vmatprep.subr.mxu0 %v1371_v39  ;;  %2323 = vmatprep.subr.mxu1 %v1627_v40  ;;  %v1044_v37 = vld [vmem:[#allocation6 + $0xaa0] sm:$0xff]  ;;  %v781_v39 = vld [vmem:[#allocation6 + $0x268] sm:$0xff] }
 0x212   :  { %2253 = vmatpush2.msra.mxu0 %v1370_v42  ;;  %2324 = vmatpush2.msra.mxu1 %v1626_v48  ;;  %v1037_v40 = vld [vmem:[#allocation6 + $0xa68] sm:$0xff]  ;;  %v1036_v42 = vld [vmem:[#allocation6 + $0xa60] sm:$0xff] }
 0x213   :  { %2254 = vmatprep.subr.mxu0 %v1363_v49  ;;  %2325 = vmatprep.subr.mxu1 %v1619_v51  ;;  %v773_v48 = vld [vmem:[#allocation6 + $0x228] sm:$0xff]  ;;  %v772_v51 = vld [vmem:[#allocation6 + $0x220] sm:$0xff] }
 0x214   :  { %2255 = vmatpush2.msra.mxu0 %v1362_v52  ;;  %2326 = vmatpush2.msra.mxu1 %v1618_v54  ;;  %v1836_v2 = vpop.f32.mrf.mxu0  ;;  %v1907_v8 = vpop.f32.mrf.mxu1  ;;  %v1029_v49 = vld [vmem:[#allocation6 + $0xa28] sm:$0xff]  ;;  %v1028_v52 = vld [vmem:[#allocation6 + $0xa20] sm:$0xff] }
 0x215   :  { %2256 = vmatprep.subr.mxu0 %v1355_v59  ;;  %2327 = vmatprep.subr.mxu1 %v1611_v60  ;;  %v1837_v7 = vadd.f32 %v1836_v2, %v1733_v55  ;;  %v765_v54 = vld [vmem:[#allocation6 + $0x1e8] sm:$0xff]  ;;  %v764_v59 = vld [vmem:[#allocation6 + $0x1e0] sm:$0xff] }
 0x216   :  { %2257 = vmatpush2.msra.mxu0 %v1354_v61  ;;  %2328 = vmatpush2.msra.mxu1 %v1610_v63  ;;  %v1021_v55 = vld [vmem:[#allocation6 + $0x9e8] sm:$0xff]  ;;  %v1020_v60 = vld [vmem:[#allocation6 + $0x9e0] sm:$0xff] }
 0x217   :  { %2258 = vmatprep.subr.mxu0 %v1347_v0  ;;  %2329 = vmatprep.subr.mxu1 %v1603_v1  ;;  %v3795_v11 = vadd.f32 %v1907_v8, %v1837_v7  ;;  %v757_v61 = vld [vmem:[#allocation6 + $0x1a8] sm:$0xff]  ;;  %v756_v0 = vld [vmem:[#allocation6 + $0x1a0] sm:$0xff] }
 0x218   :  { %2259 = vmatpush2.msra.mxu0 %v1346_v4  ;;  %2330 = vmatpush2.msra.mxu1 %v1602_v5  ;;  %v1013_v63 = vld [vmem:[#allocation6 + $0x9a8] sm:$0xff]  ;;  %v1012_v1 = vld [vmem:[#allocation6 + $0x9a0] sm:$0xff] }
 0x219   :  { %2261 = vmatmul.mubr.f32.vlgmr.msra.gmra.mxu0 %v3782_v28  ;;  %2332 = vmatmul.mubr.f32.vlgmr.msra.gmra.mxu1 %v3776_v25  ;;  %v749_v2 = vld [vmem:[#allocation6 + $0x168] sm:$0xff]  ;;  %v748_v5 = vld [vmem:[#allocation6 + $0x160] sm:$0xff] }
 0x21a   :  { %2338 = vmatprep.subr.mxu0 %v829_v9  ;;  %2409 = vmatprep.subr.mxu1 %v1085_v10  ;;  %v1005_v4 = vld [vmem:[#allocation6 + $0x968] sm:$0xff]  ;;  %v1004_v7 = vld [vmem:[#allocation6 + $0x960] sm:$0xff] }
 0x21b   :  { %2339 = vmatpush1.msra.mxu0 %v828_v12  ;;  %2402 = vmatprep.mubr.f32.mxu0 %v3750_v44  ;;  %v741_v8 = vld [vmem:[#allocation6 + $0x128] sm:$0xff]  ;;  %v740_v10 = vld [vmem:[#allocation6 + $0x120] sm:$0xff] }
 0x21c   :  { %2410 = vmatpush1.msra.mxu1 %v1084_v13  ;;  %2473 = vmatprep.mubr.f32.mxu1 %v3752_v45  ;;  %v997_v9 = vld [vmem:[#allocation6 + $0x928] sm:$0xff]  ;;  %v996_v12 = vld [vmem:[#allocation6 + $0x920] sm:$0xff] }
 0x21d   :  { %2340 = vmatprep.subr.mxu0 %v821_v14  ;;  %2411 = vmatprep.subr.mxu1 %v1077_v15  ;;  %v733_v13 = vld [vmem:[#allocation6 + $0xe8] sm:$0xff]  ;;  %v732_v15 = vld [vmem:[#allocation6 + $0xe0] sm:$0xff] }
 0x21e   :  { %2341 = vmatpush1.msra.mxu0 %v820_v16  ;;  %2412 = vmatpush1.msra.mxu1 %v1076_v17  ;;  %v989_v14 = vld [vmem:[#allocation6 + $0x8e8] sm:$0xff]  ;;  %v988_v16 = vld [vmem:[#allocation6 + $0x8e0] sm:$0xff] }
 0x21f   :  { %2342 = vmatprep.subr.mxu0 %v813_v18  ;;  %2413 = vmatprep.subr.mxu1 %v1069_v19  ;;  %v725_v17 = vld [vmem:[#allocation6 + $0xa8] sm:$0xff]  ;;  %v724_v19 = vld [vmem:[#allocation6 + $0xa0] sm:$0xff] }
 0x220   :  { %2343 = vmatpush1.msra.mxu0 %v812_v20  ;;  %2414 = vmatpush1.msra.mxu1 %v1068_v3  ;;  %v981_v18 = vld [vmem:[#allocation6 + $0x8a8] sm:$0xff]  ;;  %v980_v20 = vld [vmem:[#allocation6 + $0x8a0] sm:$0xff] }
 0x221   :  { %2344 = vmatprep.subr.mxu0 %v805_v21  ;;  %2415 = vmatprep.subr.mxu1 %v1061_v22  ;;  %v717_v3 = vld [vmem:[#allocation6 + $0x68] sm:$0xff]  ;;  %v716_v22 = vld [vmem:[#allocation6 + $0x60] sm:$0xff] }
 0x222   :  { %2345 = vmatpush1.msra.mxu0 %v804_v23  ;;  %2416 = vmatpush1.msra.mxu1 %v1060_v24  ;;  %v973_v21 = vld [vmem:[#allocation6 + $0x868] sm:$0xff]  ;;  %v972_v23 = vld [vmem:[#allocation6 + $0x860] sm:$0xff] }
 0x223   :  { %2346 = vmatprep.subr.mxu0 %v797_v31  ;;  %2417 = vmatprep.subr.mxu1 %v1053_v6  ;;  %v709_v24 = vld [vmem:[#allocation6 + $0x28] sm:$0xff]  ;;  %v708_v6 = vld [vmem:[#allocation6 + $0x20] sm:$0xff] }
 0x224   :  { %2347 = vmatpush1.msra.mxu0 %v796_v32  ;;  %2418 = vmatpush1.msra.mxu1 %v1052_v33  ;;  %v965_v31 = vld [vmem:[#allocation6 + $0x828] sm:$0xff]  ;;  %v964_v32 = vld [vmem:[#allocation6 + $0x820] sm:$0xff] }
 0x225   :  { %2348 = vmatprep.subr.mxu0 %v789_v34  ;;  %2419 = vmatprep.subr.mxu1 %v1045_v35  ;;  %v957_v33 = vld [vmem:[#allocation6 + $0x7e8] sm:$0xff]  ;;  %v956_v35 = vld [vmem:[#allocation6 + $0x7e0] sm:$0xff] }
 0x226   :  { %2349 = vmatpush1.msra.mxu0 %v788_v36  ;;  %2420 = vmatpush1.msra.mxu1 %v1044_v37  ;;  %v1213_v34 = vld [vmem:[#allocation6 + $0xfe8] sm:$0xff]  ;;  %v1212_v36 = vld [vmem:[#allocation6 + $0xfe0] sm:$0xff] }
 0x227   :  { %2350 = vmatprep.subr.mxu0 %v781_v39  ;;  %2421 = vmatprep.subr.mxu1 %v1037_v40  ;;  %v949_v37 = vld [vmem:[#allocation6 + $0x7a8] sm:$0xff]  ;;  %v948_v40 = vld [vmem:[#allocation6 + $0x7a0] sm:$0xff] }
 0x228   :  { %2351 = vmatpush1.msra.mxu0 %v780_v41  ;;  %2422 = vmatpush1.msra.mxu1 %v1036_v42  ;;  %v1205_v39 = vld [vmem:[#allocation6 + $0xfa8] sm:$0xff]  ;;  %v1204_v41 = vld [vmem:[#allocation6 + $0xfa0] sm:$0xff] }
 0x229   :  { %2352 = vmatprep.subr.mxu0 %v773_v48  ;;  %2423 = vmatprep.subr.mxu1 %v1029_v49  ;;  %v941_v42 = vld [vmem:[#allocation6 + $0x768] sm:$0xff]  ;;  %v940_v49 = vld [vmem:[#allocation6 + $0x760] sm:$0xff] }
 0x22a   :  { %2353 = vmatpush1.msra.mxu0 %v772_v51  ;;  %2424 = vmatpush1.msra.mxu1 %v1028_v52  ;;  %v1197_v48 = vld [vmem:[#allocation6 + $0xf68] sm:$0xff]  ;;  %v1196_v51 = vld [vmem:[#allocation6 + $0xf60] sm:$0xff] }
 0x22b   :  { %2354 = vmatprep.subr.mxu0 %v765_v54  ;;  %2425 = vmatprep.subr.mxu1 %v1021_v55  ;;  %v933_v52 = vld [vmem:[#allocation6 + $0x728] sm:$0xff]  ;;  %v932_v55 = vld [vmem:[#allocation6 + $0x720] sm:$0xff] }
 0x22c   :  { %2355 = vmatpush1.msra.mxu0 %v764_v59  ;;  %2426 = vmatpush1.msra.mxu1 %v1020_v60  ;;  %v1189_v54 = vld [vmem:[#allocation6 + $0xf28] sm:$0xff]  ;;  %v1188_v59 = vld [vmem:[#allocation6 + $0xf20] sm:$0xff] }
 0x22d   :  { %2356 = vmatprep.subr.mxu0 %v757_v61  ;;  %2427 = vmatprep.subr.mxu1 %v1013_v63  ;;  %v925_v60 = vld [vmem:[#allocation6 + $0x6e8] sm:$0xff]  ;;  %v924_v63 = vld [vmem:[#allocation6 + $0x6e0] sm:$0xff] }
 0x22e   :  { %2357 = vmatpush1.msra.mxu0 %v756_v0  ;;  %2428 = vmatpush1.msra.mxu1 %v1012_v1  ;;  %v1181_v61 = vld [vmem:[#allocation6 + $0xee8] sm:$0xff]  ;;  %v1180_v0 = vld [vmem:[#allocation6 + $0xee0] sm:$0xff] }
 0x22f   :  { %2358 = vmatprep.subr.mxu0 %v749_v2  ;;  %2429 = vmatprep.subr.mxu1 %v1005_v4  ;;  %v917_v1 = vld [vmem:[#allocation6 + $0x6a8] sm:$0xff]  ;;  %v916_v4 = vld [vmem:[#allocation6 + $0x6a0] sm:$0xff] }
 0x230   :  { %2359 = vmatpush1.msra.mxu0 %v748_v5  ;;  %2430 = vmatpush1.msra.mxu1 %v1004_v7  ;;  %v1173_v2 = vld [vmem:[#allocation6 + $0xea8] sm:$0xff]  ;;  %v1172_v5 = vld [vmem:[#allocation6 + $0xea0] sm:$0xff] }
 0x231   :  { %2360 = vmatprep.subr.mxu0 %v741_v8  ;;  %2431 = vmatprep.subr.mxu1 %v997_v9  ;;  %v909_v7 = vld [vmem:[#allocation6 + $0x668] sm:$0xff]  ;;  %v908_v9 = vld [vmem:[#allocation6 + $0x660] sm:$0xff] }
 0x232   :  { %2361 = vmatpush1.msra.mxu0 %v740_v10  ;;  %2432 = vmatpush1.msra.mxu1 %v996_v12  ;;  %v1165_v8 = vld [vmem:[#allocation6 + $0xe68] sm:$0xff]  ;;  %v1164_v10 = vld [vmem:[#allocation6 + $0xe60] sm:$0xff] }
 0x233   :  { %2362 = vmatprep.subr.mxu0 %v733_v13  ;;  %2433 = vmatprep.subr.mxu1 %v989_v14  ;;  %v901_v12 = vld [vmem:[#allocation6 + $0x628] sm:$0xff]  ;;  %v900_v14 = vld [vmem:[#allocation6 + $0x620] sm:$0xff] }
 0x234   :  { %2363 = vmatpush1.msra.mxu0 %v732_v15  ;;  %2434 = vmatpush1.msra.mxu1 %v988_v16  ;;  %v1157_v13 = vld [vmem:[#allocation6 + $0xe28] sm:$0xff]  ;;  %v1156_v15 = vld [vmem:[#allocation6 + $0xe20] sm:$0xff] }
 0x235   :  { %2364 = vmatprep.subr.mxu0 %v725_v17  ;;  %2435 = vmatprep.subr.mxu1 %v981_v18  ;;  %v893_v16 = vld [vmem:[#allocation6 + $0x5e8] sm:$0xff]  ;;  %v892_v18 = vld [vmem:[#allocation6 + $0x5e0] sm:$0xff] }
 0x236   :  { %2365 = vmatpush1.msra.mxu0 %v724_v19  ;;  %2436 = vmatpush1.msra.mxu1 %v980_v20  ;;  %v1149_v17 = vld [vmem:[#allocation6 + $0xde8] sm:$0xff]  ;;  %v1148_v19 = vld [vmem:[#allocation6 + $0xde0] sm:$0xff] }
 0x237   :  { %2366 = vmatprep.subr.mxu0 %v717_v3  ;;  %2437 = vmatprep.subr.mxu1 %v973_v21  ;;  %v885_v20 = vld [vmem:[#allocation6 + $0x5a8] sm:$0xff]  ;;  %v884_v21 = vld [vmem:[#allocation6 + $0x5a0] sm:$0xff] }
 0x238   :  { %2367 = vmatpush1.msra.mxu0 %v716_v22  ;;  %2438 = vmatpush1.msra.mxu1 %v972_v23  ;;  %v1141_v3 = vld [vmem:[#allocation6 + $0xda8] sm:$0xff]  ;;  %v1140_v22 = vld [vmem:[#allocation6 + $0xda0] sm:$0xff] }
 0x239   :  { %2368 = vmatprep.subr.mxu0 %v709_v24  ;;  %2439 = vmatprep.subr.mxu1 %v965_v31  ;;  %v877_v23 = vld [vmem:[#allocation6 + $0x568] sm:$0xff]  ;;  %v876_v31 = vld [vmem:[#allocation6 + $0x560] sm:$0xff] }
 0x23a   :  { %2369 = vmatpush1.msra.mxu0 %v708_v6  ;;  %2440 = vmatpush1.msra.mxu1 %v964_v32  ;;  %v1133_v24 = vld [vmem:[#allocation6 + $0xd68] sm:$0xff]  ;;  %v1132_v6 = vld [vmem:[#allocation6 + $0xd60] sm:$0xff] }
 0x23b   :  { %2370 = vmatprep.subr.mxu0 %v957_v33  ;;  %2441 = vmatprep.subr.mxu1 %v1213_v34  ;;  %v869_v32 = vld [vmem:[#allocation6 + $0x528] sm:$0xff]  ;;  %v868_v34 = vld [vmem:[#allocation6 + $0x520] sm:$0xff] }
 0x23c   :  { %2371 = vmatpush2.msra.mxu0 %v956_v35  ;;  %2442 = vmatpush2.msra.mxu1 %v1212_v36  ;;  %v1125_v33 = vld [vmem:[#allocation6 + $0xd28] sm:$0xff]  ;;  %v1124_v35 = vld [vmem:[#allocation6 + $0xd20] sm:$0xff] }
 0x23d   :  { %2372 = vmatprep.subr.mxu0 %v949_v37  ;;  %2443 = vmatprep.subr.mxu1 %v1205_v39  ;;  %v861_v36 = vld [vmem:[#allocation6 + $0x4e8] sm:$0xff]  ;;  %v860_v39 = vld [vmem:[#allocation6 + $0x4e0] sm:$0xff] }
 0x23e   :  { %2373 = vmatpush2.msra.mxu0 %v948_v40  ;;  %2444 = vmatpush2.msra.mxu1 %v1204_v41  ;;  %v1117_v37 = vld [vmem:[#allocation6 + $0xce8] sm:$0xff]  ;;  %v1116_v40 = vld [vmem:[#allocation6 + $0xce0] sm:$0xff] }
 0x23f   :  { %2374 = vmatprep.subr.mxu0 %v941_v42  ;;  %2445 = vmatprep.subr.mxu1 %v1197_v48  ;;  %v853_v41 = vld [vmem:[#allocation6 + $0x4a8] sm:$0xff]  ;;  %v852_v48 = vld [vmem:[#allocation6 + $0x4a0] sm:$0xff] }
 0x240   :  { %2375 = vmatpush2.msra.mxu0 %v940_v49  ;;  %2446 = vmatpush2.msra.mxu1 %v1196_v51  ;;  %v1109_v42 = vld [vmem:[#allocation6 + $0xca8] sm:$0xff]  ;;  %v1108_v49 = vld [vmem:[#allocation6 + $0xca0] sm:$0xff]  ;;  %v3801_v51 = vpop.f32.mrf.mxu0 }
 0x241   :  { %2376 = vmatprep.subr.mxu0 %v933_v52  ;;  %2447 = vmatprep.subr.mxu1 %v1189_v54  ;;  %v845_v52 = vld [vmem:[#allocation6 + $0x468] sm:$0xff] }
 0x242   :  { %2377 = vmatpush2.msra.mxu0 %v932_v55  ;;  %2448 = vmatpush2.msra.mxu1 %v1188_v59  ;;  %v1101_v54 = vld [vmem:[#allocation6 + $0xc68] sm:$0xff]  ;;  %v844_v55 = vld [vmem:[#allocation6 + $0x460] sm:$0xff] }
 0x243   :  { %2378 = vmatprep.subr.mxu0 %v925_v60  ;;  %2449 = vmatprep.subr.mxu1 %v1181_v61  ;;  %v1100_v59 = vld [vmem:[#allocation6 + $0xc60] sm:$0xff]  ;;  %v3803_v60 = vpop.f32.mrf.mxu1  ;;  %v837_v61 = vld [vmem:[#allocation6 + $0x428] sm:$0xff] }
 0x244   :  { %2379 = vmatpush2.msra.mxu0 %v924_v63  ;;  %2450 = vmatpush2.msra.mxu1 %v1180_v0  ;;  %v1093_v63 = vld [vmem:[#allocation6 + $0xc28] sm:$0xff] }
 0x245   :  { %2380 = vmatprep.subr.mxu0 %v917_v1  ;;  %2451 = vmatprep.subr.mxu1 %v1173_v2  ;;  %v836_v1 = vld [vmem:[#allocation6 + $0x420] sm:$0xff] }
 0x246   :  { %2381 = vmatpush2.msra.mxu0 %v916_v4  ;;  %2452 = vmatpush2.msra.mxu1 %v1172_v5  ;;  %v1092_v2 = vld [vmem:[#allocation6 + $0xc20] sm:$0xff] }
 0x247   :  { %2382 = vmatprep.subr.mxu0 %v909_v7  ;;  %2453 = vmatprep.subr.mxu1 %v1165_v8  ;;  %v1341_v7 = vld [vmem:[#allocation6 + $0x13e8] sm:$0xff] }
 0x248   :  { %2383 = vmatpush2.msra.mxu0 %v908_v9  ;;  %2454 = vmatpush2.msra.mxu1 %v1164_v10  ;;  %v1597_v8 = vld [vmem:[#allocation6 + $0x1be8] sm:$0xff]  ;;  %v1340_v10 = vld [vmem:[#allocation6 + $0x13e0] sm:$0xff] }
 0x249   :  { %2384 = vmatprep.subr.mxu0 %v901_v12  ;;  %2455 = vmatprep.subr.mxu1 %v1157_v13  ;;  %v1596_v12 = vld [vmem:[#allocation6 + $0x1be0] sm:$0xff]  ;;  %v1589_v13 = vld [vmem:[#allocation6 + $0x1ba8] sm:$0xff] }
 0x24a   :  { %2385 = vmatpush2.msra.mxu0 %v900_v14  ;;  %2456 = vmatpush2.msra.mxu1 %v1156_v15  ;;  %v1332_v14 = vld [vmem:[#allocation6 + $0x13a0] sm:$0xff] }
 0x24b   :  { %2386 = vmatprep.subr.mxu0 %v893_v16  ;;  %2457 = vmatprep.subr.mxu1 %v1149_v17  ;;  %v1588_v15 = vld [vmem:[#allocation6 + $0x1ba0] sm:$0xff]  ;;  %v1325_v16 = vld [vmem:[#allocation6 + $0x1368] sm:$0xff] }
 0x24c   :  { %2387 = vmatpush2.msra.mxu0 %v892_v18  ;;  %2458 = vmatpush2.msra.mxu1 %v1148_v19  ;;  %v1581_v17 = vld [vmem:[#allocation6 + $0x1b68] sm:$0xff]  ;;  %v1324_v18 = vld [vmem:[#allocation6 + $0x1360] sm:$0xff] }
 0x24d   :  { %2388 = vmatprep.subr.mxu0 %v885_v20  ;;  %2459 = vmatprep.subr.mxu1 %v1141_v3  ;;  %v1580_v19 = vld [vmem:[#allocation6 + $0x1b60] sm:$0xff]  ;;  %v1317_v20 = vld [vmem:[#allocation6 + $0x1328] sm:$0xff] }
 0x24e   :  { %2389 = vmatpush2.msra.mxu0 %v884_v21  ;;  %2460 = vmatpush2.msra.mxu1 %v1140_v22  ;;  %v1573_v3 = vld [vmem:[#allocation6 + $0x1b28] sm:$0xff]  ;;  %v1316_v21 = vld [vmem:[#allocation6 + $0x1320] sm:$0xff] }
 0x24f   :  { %2390 = vmatprep.subr.mxu0 %v877_v23  ;;  %2461 = vmatprep.subr.mxu1 %v1133_v24  ;;  %v1572_v22 = vld [vmem:[#allocation6 + $0x1b20] sm:$0xff]  ;;  %v1309_v23 = vld [vmem:[#allocation6 + $0x12e8] sm:$0xff] }
 0x250   :  { %2391 = vmatpush2.msra.mxu0 %v876_v31  ;;  %2462 = vmatpush2.msra.mxu1 %v1132_v6  ;;  %v1565_v24 = vld [vmem:[#allocation6 + $0x1ae8] sm:$0xff]  ;;  %v1308_v31 = vld [vmem:[#allocation6 + $0x12e0] sm:$0xff] }
 0x251   :  { %2392 = vmatprep.subr.mxu0 %v869_v32  ;;  %2463 = vmatprep.subr.mxu1 %v1125_v33  ;;  %v1564_v6 = vld [vmem:[#allocation6 + $0x1ae0] sm:$0xff]  ;;  %v1301_v32 = vld [vmem:[#allocation6 + $0x12a8] sm:$0xff] }
 0x252   :  { %2393 = vmatpush2.msra.mxu0 %v868_v34  ;;  %2464 = vmatpush2.msra.mxu1 %v1124_v35  ;;  %v1557_v33 = vld [vmem:[#allocation6 + $0x1aa8] sm:$0xff]  ;;  %v1300_v34 = vld [vmem:[#allocation6 + $0x12a0] sm:$0xff] }
 0x253   :  { %2394 = vmatprep.subr.mxu0 %v861_v36  ;;  %2465 = vmatprep.subr.mxu1 %v1117_v37  ;;  %v1556_v35 = vld [vmem:[#allocation6 + $0x1aa0] sm:$0xff]  ;;  %v1293_v36 = vld [vmem:[#allocation6 + $0x1268] sm:$0xff] }
 0x254   :  { %2395 = vmatpush2.msra.mxu0 %v860_v39  ;;  %2466 = vmatpush2.msra.mxu1 %v1116_v40  ;;  %v1549_v37 = vld [vmem:[#allocation6 + $0x1a68] sm:$0xff]  ;;  %v1292_v39 = vld [vmem:[#allocation6 + $0x1260] sm:$0xff] }
 0x255   :  { %2396 = vmatprep.subr.mxu0 %v853_v41  ;;  %2467 = vmatprep.subr.mxu1 %v1109_v42  ;;  %v1548_v40 = vld [vmem:[#allocation6 + $0x1a60] sm:$0xff]  ;;  %v1285_v41 = vld [vmem:[#allocation6 + $0x1228] sm:$0xff] }
 0x256   :  { %2397 = vmatpush2.msra.mxu0 %v852_v48  ;;  %2468 = vmatpush2.msra.mxu1 %v1108_v49  ;;  %v1978_v0 = vpop.f32.mrf.mxu0  ;;  %v2049_v5 = vpop.f32.mrf.mxu1  ;;  %v1541_v42 = vld [vmem:[#allocation6 + $0x1a28] sm:$0xff]  ;;  %v1284_v48 = vld [vmem:[#allocation6 + $0x1220] sm:$0xff] }
 0x257   :  { %2398 = vmatprep.subr.mxu0 %v845_v52  ;;  %2469 = vmatprep.subr.mxu1 %v1101_v54  ;;  %v1979_v4 = vadd.f32 %v1978_v0, %v3795_v11  ;;  %v1333_v11 = vld [vmem:[#allocation6 + $0x13a8] sm:$0xff]  ;;  %v1540_v49 = vld [vmem:[#allocation6 + $0x1a20] sm:$0xff] }
 0x258   :  { %2399 = vmatpush2.msra.mxu0 %v844_v55  ;;  %2470 = vmatpush2.msra.mxu1 %v1100_v59  ;;  %v1277_v52 = vld [vmem:[#allocation6 + $0x11e8] sm:$0xff]  ;;  %v1276_v55 = vld [vmem:[#allocation6 + $0x11e0] sm:$0xff] }
 0x259   :  { %2400 = vmatprep.subr.mxu0 %v837_v61  ;;  %2471 = vmatprep.subr.mxu1 %v1093_v63  ;;  %v3806_v9 = vadd.f32 %v2049_v5, %v1979_v4  ;;  %v1533_v54 = vld [vmem:[#allocation6 + $0x19e8] sm:$0xff]  ;;  %v1532_v59 = vld [vmem:[#allocation6 + $0x19e0] sm:$0xff] }
 0x25a   :  { %2401 = vmatpush2.msra.mxu0 %v836_v1  ;;  %2472 = vmatpush2.msra.mxu1 %v1092_v2  ;;  %v1269_v61 = vld [vmem:[#allocation6 + $0x11a8] sm:$0xff]  ;;  %v1268_v0 = vld [vmem:[#allocation6 + $0x11a0] sm:$0xff] }
 0x25b   :  { %2403 = vmatmul.mubr.f32.vlgmr.msra.gmra.mxu0 %v3754_v46  ;;  %2474 = vmatmul.mubr.f32.vlgmr.msra.gmra.mxu1 %v3748_v43  ;;  %v1525_v63 = vld [vmem:[#allocation6 + $0x19a8] sm:$0xff]  ;;  %v1524_v1 = vld [vmem:[#allocation6 + $0x19a0] sm:$0xff] }
 0x25c   :  { %2480 = vmatprep.subr.mxu0 %v1341_v7  ;;  %2551 = vmatprep.subr.mxu1 %v1597_v8  ;;  %v1261_v2 = vld [vmem:[#allocation6 + $0x1168] sm:$0xff]  ;;  %v1260_v5 = vld [vmem:[#allocation6 + $0x1160] sm:$0xff] }
 0x25d   :  { %2481 = vmatpush1.msra.mxu0 %v1340_v10  ;;  %2544 = vmatprep.mubr.f32.mxu0 %v3778_v26  ;;  %v1517_v4 = vld [vmem:[#allocation6 + $0x1968] sm:$0xff]  ;;  %v1516_v7 = vld [vmem:[#allocation6 + $0x1960] sm:$0xff] }
 0x25e   :  { %2552 = vmatpush1.msra.mxu1 %v1596_v12  ;;  %2615 = vmatprep.mubr.f32.mxu1 %v3780_v27  ;;  %v1253_v8 = vld [vmem:[#allocation6 + $0x1128] sm:$0xff]  ;;  %v1252_v12 = vld [vmem:[#allocation6 + $0x1120] sm:$0xff] }
 0x25f   :  { %2482 = vmatprep.subr.mxu0 %v1333_v11  ;;  %2553 = vmatprep.subr.mxu1 %v1589_v13  ;;  %v1509_v10 = vld [vmem:[#allocation6 + $0x1928] sm:$0xff]  ;;  %v1508_v11 = vld [vmem:[#allocation6 + $0x1920] sm:$0xff] }
 0x260   :  { %2483 = vmatpush1.msra.mxu0 %v1332_v14  ;;  %2554 = vmatpush1.msra.mxu1 %v1588_v15  ;;  %v1245_v13 = vld [vmem:[#allocation6 + $0x10e8] sm:$0xff]  ;;  %v1244_v15 = vld [vmem:[#allocation6 + $0x10e0] sm:$0xff] }
 0x261   :  { %2484 = vmatprep.subr.mxu0 %v1325_v16  ;;  %2555 = vmatprep.subr.mxu1 %v1581_v17  ;;  %v1501_v14 = vld [vmem:[#allocation6 + $0x18e8] sm:$0xff]  ;;  %v1500_v16 = vld [vmem:[#allocation6 + $0x18e0] sm:$0xff] }
 0x262   :  { %2485 = vmatpush1.msra.mxu0 %v1324_v18  ;;  %2556 = vmatpush1.msra.mxu1 %v1580_v19  ;;  %v1237_v17 = vld [vmem:[#allocation6 + $0x10a8] sm:$0xff]  ;;  %v1236_v19 = vld [vmem:[#allocation6 + $0x10a0] sm:$0xff] }
 0x263   :  { %2486 = vmatprep.subr.mxu0 %v1317_v20  ;;  %2557 = vmatprep.subr.mxu1 %v1573_v3  ;;  %v1493_v18 = vld [vmem:[#allocation6 + $0x18a8] sm:$0xff]  ;;  %v1492_v20 = vld [vmem:[#allocation6 + $0x18a0] sm:$0xff] }
 0x264   :  { %2487 = vmatpush1.msra.mxu0 %v1316_v21  ;;  %2558 = vmatpush1.msra.mxu1 %v1572_v22  ;;  %v1229_v3 = vld [vmem:[#allocation6 + $0x1068] sm:$0xff]  ;;  %v1228_v22 = vld [vmem:[#allocation6 + $0x1060] sm:$0xff] }
 0x265   :  { %2488 = vmatprep.subr.mxu0 %v1309_v23  ;;  %2559 = vmatprep.subr.mxu1 %v1565_v24  ;;  %v1485_v21 = vld [vmem:[#allocation6 + $0x1868] sm:$0xff]  ;;  %v1484_v23 = vld [vmem:[#allocation6 + $0x1860] sm:$0xff] }
 0x266   :  { %2489 = vmatpush1.msra.mxu0 %v1308_v31  ;;  %2560 = vmatpush1.msra.mxu1 %v1564_v6  ;;  %v1221_v24 = vld [vmem:[#allocation6 + $0x1028] sm:$0xff]  ;;  %v1220_v6 = vld [vmem:[#allocation6 + $0x1020] sm:$0xff] }
 0x267   :  { %2490 = vmatprep.subr.mxu0 %v1301_v32  ;;  %2561 = vmatprep.subr.mxu1 %v1557_v33  ;;  %v1477_v31 = vld [vmem:[#allocation6 + $0x1828] sm:$0xff]  ;;  %v1476_v32 = vld [vmem:[#allocation6 + $0x1820] sm:$0xff] }
 0x268   :  { %2491 = vmatpush1.msra.mxu0 %v1300_v34  ;;  %2562 = vmatpush1.msra.mxu1 %v1556_v35  ;;  %v1469_v33 = vld [vmem:[#allocation6 + $0x17e8] sm:$0xff]  ;;  %v1468_v35 = vld [vmem:[#allocation6 + $0x17e0] sm:$0xff] }
 0x269   :  { %2492 = vmatprep.subr.mxu0 %v1293_v36  ;;  %2563 = vmatprep.subr.mxu1 %v1549_v37  ;;  %v1725_v34 = vld [vmem:[#allocation6 + $0x1fe8] sm:$0xff]  ;;  %v1724_v36 = vld [vmem:[#allocation6 + $0x1fe0] sm:$0xff] }
 0x26a   :  { %2493 = vmatpush1.msra.mxu0 %v1292_v39  ;;  %2564 = vmatpush1.msra.mxu1 %v1548_v40  ;;  %v1461_v37 = vld [vmem:[#allocation6 + $0x17a8] sm:$0xff]  ;;  %v1460_v40 = vld [vmem:[#allocation6 + $0x17a0] sm:$0xff] }
 0x26b   :  { %2494 = vmatprep.subr.mxu0 %v1285_v41  ;;  %2565 = vmatprep.subr.mxu1 %v1541_v42  ;;  %v1717_v39 = vld [vmem:[#allocation6 + $0x1fa8] sm:$0xff]  ;;  %v1716_v41 = vld [vmem:[#allocation6 + $0x1fa0] sm:$0xff] }
 0x26c   :  { %2495 = vmatpush1.msra.mxu0 %v1284_v48  ;;  %2566 = vmatpush1.msra.mxu1 %v1540_v49  ;;  %v1453_v42 = vld [vmem:[#allocation6 + $0x1768] sm:$0xff]  ;;  %v1452_v49 = vld [vmem:[#allocation6 + $0x1760] sm:$0xff] }
 0x26d   :  { %2496 = vmatprep.subr.mxu0 %v1277_v52  ;;  %2567 = vmatprep.subr.mxu1 %v1533_v54  ;;  %v1709_v48 = vld [vmem:[#allocation6 + $0x1f68] sm:$0xff]  ;;  %v1708_v52 = vld [vmem:[#allocation6 + $0x1f60] sm:$0xff] }
 0x26e   :  { %2497 = vmatpush1.msra.mxu0 %v1276_v55  ;;  %2568 = vmatpush1.msra.mxu1 %v1532_v59  ;;  %v1445_v54 = vld [vmem:[#allocation6 + $0x1728] sm:$0xff]  ;;  %v1444_v59 = vld [vmem:[#allocation6 + $0x1720] sm:$0xff] }
 0x26f   :  { %2498 = vmatprep.subr.mxu0 %v1269_v61  ;;  %2569 = vmatprep.subr.mxu1 %v1525_v63  ;;  %v1701_v55 = vld [vmem:[#allocation6 + $0x1f28] sm:$0xff]  ;;  %v1700_v61 = vld [vmem:[#allocation6 + $0x1f20] sm:$0xff] }
 0x270   :  { %2499 = vmatpush1.msra.mxu0 %v1268_v0  ;;  %2570 = vmatpush1.msra.mxu1 %v1524_v1  ;;  %v1437_v63 = vld [vmem:[#allocation6 + $0x16e8] sm:$0xff]  ;;  %v1436_v1 = vld [vmem:[#allocation6 + $0x16e0] sm:$0xff] }
 0x271   :  { %2500 = vmatprep.subr.mxu0 %v1261_v2  ;;  %2571 = vmatprep.subr.mxu1 %v1517_v4  ;;  %v1693_v0 = vld [vmem:[#allocation6 + $0x1ee8] sm:$0xff]  ;;  %v1692_v2 = vld [vmem:[#allocation6 + $0x1ee0] sm:$0xff] }
 0x272   :  { %2501 = vmatpush1.msra.mxu0 %v1260_v5  ;;  %2572 = vmatpush1.msra.mxu1 %v1516_v7  ;;  %v1429_v4 = vld [vmem:[#allocation6 + $0x16a8] sm:$0xff]  ;;  %v1428_v7 = vld [vmem:[#allocation6 + $0x16a0] sm:$0xff] }
 0x273   :  { %2502 = vmatprep.subr.mxu0 %v1253_v8  ;;  %2573 = vmatprep.subr.mxu1 %v1509_v10  ;;  %v1685_v5 = vld [vmem:[#allocation6 + $0x1ea8] sm:$0xff]  ;;  %v1684_v8 = vld [vmem:[#allocation6 + $0x1ea0] sm:$0xff] }
 0x274   :  { %2503 = vmatpush1.msra.mxu0 %v1252_v12  ;;  %2574 = vmatpush1.msra.mxu1 %v1508_v11  ;;  %v1421_v10 = vld [vmem:[#allocation6 + $0x1668] sm:$0xff]  ;;  %v1420_v11 = vld [vmem:[#allocation6 + $0x1660] sm:$0xff] }
 0x275   :  { %2504 = vmatprep.subr.mxu0 %v1245_v13  ;;  %2575 = vmatprep.subr.mxu1 %v1501_v14  ;;  %v1677_v12 = vld [vmem:[#allocation6 + $0x1e68] sm:$0xff]  ;;  %v1676_v13 = vld [vmem:[#allocation6 + $0x1e60] sm:$0xff] }
 0x276   :  { %2505 = vmatpush1.msra.mxu0 %v1244_v15  ;;  %2576 = vmatpush1.msra.mxu1 %v1500_v16  ;;  %v1413_v14 = vld [vmem:[#allocation6 + $0x1628] sm:$0xff]  ;;  %v1412_v16 = vld [vmem:[#allocation6 + $0x1620] sm:$0xff] }
 0x277   :  { %2506 = vmatprep.subr.mxu0 %v1237_v17  ;;  %2577 = vmatprep.subr.mxu1 %v1493_v18  ;;  %v1669_v15 = vld [vmem:[#allocation6 + $0x1e28] sm:$0xff]  ;;  %v1668_v17 = vld [vmem:[#allocation6 + $0x1e20] sm:$0xff] }
 0x278   :  { %2507 = vmatpush1.msra.mxu0 %v1236_v19  ;;  %2578 = vmatpush1.msra.mxu1 %v1492_v20  ;;  %v1405_v18 = vld [vmem:[#allocation6 + $0x15e8] sm:$0xff]  ;;  %v1404_v20 = vld [vmem:[#allocation6 + $0x15e0] sm:$0xff] }
 0x279   :  { %2508 = vmatprep.subr.mxu0 %v1229_v3  ;;  %2579 = vmatprep.subr.mxu1 %v1485_v21  ;;  %v1661_v19 = vld [vmem:[#allocation6 + $0x1de8] sm:$0xff]  ;;  %v1660_v3 = vld [vmem:[#allocation6 + $0x1de0] sm:$0xff] }
 0x27a   :  { %2509 = vmatpush1.msra.mxu0 %v1228_v22  ;;  %2580 = vmatpush1.msra.mxu1 %v1484_v23  ;;  %v1397_v21 = vld [vmem:[#allocation6 + $0x15a8] sm:$0xff]  ;;  %v1396_v23 = vld [vmem:[#allocation6 + $0x15a0] sm:$0xff] }
 0x27b   :  { %2510 = vmatprep.subr.mxu0 %v1221_v24  ;;  %2581 = vmatprep.subr.mxu1 %v1477_v31  ;;  %v1653_v22 = vld [vmem:[#allocation6 + $0x1da8] sm:$0xff]  ;;  %v1652_v24 = vld [vmem:[#allocation6 + $0x1da0] sm:$0xff] }
 0x27c   :  { %2511 = vmatpush1.msra.mxu0 %v1220_v6  ;;  %2582 = vmatpush1.msra.mxu1 %v1476_v32  ;;  %v1389_v31 = vld [vmem:[#allocation6 + $0x1568] sm:$0xff]  ;;  %v1388_v32 = vld [vmem:[#allocation6 + $0x1560] sm:$0xff] }
 0x27d   :  { %2512 = vmatprep.subr.mxu0 %v1469_v33  ;;  %2583 = vmatprep.subr.mxu1 %v1725_v34  ;;  %v1645_v6 = vld [vmem:[#allocation6 + $0x1d68] sm:$0xff]  ;;  %v1644_v33 = vld [vmem:[#allocation6 + $0x1d60] sm:$0xff] }
 0x27e   :  { %2513 = vmatpush2.msra.mxu0 %v1468_v35  ;;  %2584 = vmatpush2.msra.mxu1 %v1724_v36  ;;  %v1381_v34 = vld [vmem:[#allocation6 + $0x1528] sm:$0xff]  ;;  %v1380_v36 = vld [vmem:[#allocation6 + $0x1520] sm:$0xff] }
 0x27f   :  { %2514 = vmatprep.subr.mxu0 %v1461_v37  ;;  %2585 = vmatprep.subr.mxu1 %v1717_v39  ;;  %v1637_v35 = vld [vmem:[#allocation6 + $0x1d28] sm:$0xff]  ;;  %v1636_v37 = vld [vmem:[#allocation6 + $0x1d20] sm:$0xff] }
 0x280   :  { %2515 = vmatpush2.msra.mxu0 %v1460_v40  ;;  %2586 = vmatpush2.msra.mxu1 %v1716_v41  ;;  %v1373_v39 = vld [vmem:[#allocation6 + $0x14e8] sm:$0xff]  ;;  %v1372_v41 = vld [vmem:[#allocation6 + $0x14e0] sm:$0xff] }
 0x281   :  { %2516 = vmatprep.subr.mxu0 %v1453_v42  ;;  %2587 = vmatprep.subr.mxu1 %v1709_v48  ;;  %v1629_v40 = vld [vmem:[#allocation6 + $0x1ce8] sm:$0xff]  ;;  %v1628_v42 = vld [vmem:[#allocation6 + $0x1ce0] sm:$0xff] }
 0x282   :  { %2517 = vmatpush2.msra.mxu0 %v1452_v49  ;;  %2588 = vmatpush2.msra.mxu1 %v1708_v52  ;;  %v1365_v48 = vld [vmem:[#allocation6 + $0x14a8] sm:$0xff]  ;;  %v3812_v52 = vld [vmem:[#allocation7] sm:$0xff] }
 0x283   :  { %2518 = vmatprep.subr.mxu0 %v1445_v54  ;;  %2589 = vmatprep.subr.mxu1 %v1701_v55  ;;  %v1621_v49 = vld [vmem:[#allocation6 + $0x1ca8] sm:$0xff]  ;;  %v1741_v54 = vrot.slane %v3812_v52, %v382_v29  ;;  %v3817_v55 = vpop.f32.mrf.mxu0 }
 0x284   :  { %2519 = vmatpush2.msra.mxu0 %v1444_v59  ;;  %2590 = vmatpush2.msra.mxu1 %v1700_v61  ;;  %v1364_v59 = vld [vmem:[#allocation6 + $0x14a0] sm:$0xff]  ;;  %v1349_v29 = vld [vmem:[#allocation6 + $0x1428] sm:$0xff] }
 0x285   :  { %2520 = vmatprep.subr.mxu0 %v1437_v63  ;;  %2591 = vmatprep.subr.mxu1 %v1693_v0  ;;  %v1620_v61 = vld [vmem:[#allocation6 + $0x1ca0] sm:$0xff]  ;;  %v1357_v63 = vld [vmem:[#allocation6 + $0x1468] sm:$0xff] }
 0x286   :  { %2521 = vmatpush2.msra.mxu0 %v1436_v1  ;;  %2592 = vmatpush2.msra.mxu1 %v1692_v2  ;;  %v1613_v0 = vld [vmem:[#allocation6 + $0x1c68] sm:$0xff]  ;;  %v3819_v1 = vpop.f32.mrf.mxu1  ;;  %v1356_v2 = vld [vmem:[#allocation6 + $0x1460] sm:$0xff] }
 0x287   :  { %2522 = vmatprep.subr.mxu0 %v1429_v4  ;;  %2593 = vmatprep.subr.mxu1 %v1685_v5  ;;  %v1612_v4 = vld [vmem:[#allocation6 + $0x1c60] sm:$0xff] }
 0x288   :  { %2523 = vmatpush2.msra.mxu0 %v1428_v7  ;;  %2594 = vmatpush2.msra.mxu1 %v1684_v8  ;;  %v1605_v7 = vld [vmem:[#allocation6 + $0x1c28] sm:$0xff] }
 0x289   :  { %2524 = vmatprep.subr.mxu0 %v1421_v10  ;;  %2595 = vmatprep.subr.mxu1 %v1677_v12  ;;  %v1348_v10 = vld [vmem:[#allocation6 + $0x1420] sm:$0xff] }
 0x28a   :  { %2525 = vmatpush2.msra.mxu0 %v1420_v11  ;;  %2596 = vmatpush2.msra.mxu1 %v1676_v13  ;;  %v1604_v12 = vld [vmem:[#allocation6 + $0x1c20] sm:$0xff] }
 0x28b   :  { %2526 = vmatprep.subr.mxu0 %v1413_v14  ;;  %2597 = vmatprep.subr.mxu1 %v1669_v15  ;;  %v831_v14 = vld [vmem:[#allocation6 + $0x3f8] sm:$0xff] }
 0x28c   :  { %2527 = vmatpush2.msra.mxu0 %v1412_v16  ;;  %2598 = vmatpush2.msra.mxu1 %v1668_v17  ;;  %v1087_v15 = vld [vmem:[#allocation6 + $0xbf8] sm:$0xff]  ;;  %v830_v16 = vld [vmem:[#allocation6 + $0x3f0] sm:$0xff] }
 0x28d   :  { %2528 = vmatprep.subr.mxu0 %v1405_v18  ;;  %2599 = vmatprep.subr.mxu1 %v1661_v19  ;;  %v1086_v17 = vld [vmem:[#allocation6 + $0xbf0] sm:$0xff]  ;;  %v823_v18 = vld [vmem:[#allocation6 + $0x3b8] sm:$0xff] }
 0x28e   :  { %2529 = vmatpush2.msra.mxu0 %v1404_v20  ;;  %2600 = vmatpush2.msra.mxu1 %v1660_v3  ;;  %v1079_v19 = vld [vmem:[#allocation6 + $0xbb8] sm:$0xff]  ;;  %v822_v20 = vld [vmem:[#allocation6 + $0x3b0] sm:$0xff] }
 0x28f   :  { %2530 = vmatprep.subr.mxu0 %v1397_v21  ;;  %2601 = vmatprep.subr.mxu1 %v1653_v22  ;;  %v1078_v3 = vld [vmem:[#allocation6 + $0xbb0] sm:$0xff]  ;;  %v815_v21 = vld [vmem:[#allocation6 + $0x378] sm:$0xff] }
 0x290   :  { %2531 = vmatpush2.msra.mxu0 %v1396_v23  ;;  %2602 = vmatpush2.msra.mxu1 %v1652_v24  ;;  %v1071_v22 = vld [vmem:[#allocation6 + $0xb78] sm:$0xff]  ;;  %v814_v23 = vld [vmem:[#allocation6 + $0x370] sm:$0xff] }
 0x291   :  { %2532 = vmatprep.subr.mxu0 %v1389_v31  ;;  %2603 = vmatprep.subr.mxu1 %v1645_v6  ;;  %v1070_v24 = vld [vmem:[#allocation6 + $0xb70] sm:$0xff]  ;;  %v807_v31 = vld [vmem:[#allocation6 + $0x338] sm:$0xff] }
 0x292   :  { %2533 = vmatpush2.msra.mxu0 %v1388_v32  ;;  %2604 = vmatpush2.msra.mxu1 %v1644_v33  ;;  %v1063_v6 = vld [vmem:[#allocation6 + $0xb38] sm:$0xff]  ;;  %v806_v32 = vld [vmem:[#allocation6 + $0x330] sm:$0xff] }
 0x293   :  { %2534 = vmatprep.subr.mxu0 %v1381_v34  ;;  %2605 = vmatprep.subr.mxu1 %v1637_v35  ;;  %v1062_v33 = vld [vmem:[#allocation6 + $0xb30] sm:$0xff]  ;;  %v1055_v34 = vld [vmem:[#allocation6 + $0xaf8] sm:$0xff] }
 0x294   :  { %2535 = vmatpush2.msra.mxu0 %v1380_v36  ;;  %2606 = vmatpush2.msra.mxu1 %v1636_v37  ;;  %v1054_v35 = vld [vmem:[#allocation6 + $0xaf0] sm:$0xff]  ;;  %v791_v36 = vld [vmem:[#allocation6 + $0x2b8] sm:$0xff] }
 0x295   :  { %2536 = vmatprep.subr.mxu0 %v1373_v39  ;;  %2607 = vmatprep.subr.mxu1 %v1629_v40  ;;  %v1047_v37 = vld [vmem:[#allocation6 + $0xab8] sm:$0xff]  ;;  %v790_v39 = vld [vmem:[#allocation6 + $0x2b0] sm:$0xff] }
 0x296   :  { %2537 = vmatpush2.msra.mxu0 %v1372_v41  ;;  %2608 = vmatpush2.msra.mxu1 %v1628_v42  ;;  %v1046_v40 = vld [vmem:[#allocation6 + $0xab0] sm:$0xff]  ;;  %v783_v41 = vld [vmem:[#allocation6 + $0x278] sm:$0xff] }
 0x297   :  { %2538 = vmatprep.subr.mxu0 %v1365_v48  ;;  %2609 = vmatprep.subr.mxu1 %v1621_v49  ;;  %v2120_v5 = vpop.f32.mrf.mxu0  ;;  %v2191_v11 = vpop.f32.mrf.mxu1  ;;  %v1039_v42 = vld [vmem:[#allocation6 + $0xa78] sm:$0xff]  ;;  %v782_v48 = vld [vmem:[#allocation6 + $0x270] sm:$0xff] }
 0x298   :  { %2539 = vmatpush2.msra.mxu0 %v1364_v59  ;;  %2610 = vmatpush2.msra.mxu1 %v1620_v61  ;;  %v2121_v8 = vadd.f32 %v2120_v5, %v1741_v54  ;;  %v1038_v49 = vld [vmem:[#allocation6 + $0xa70] sm:$0xff]  ;;  %v775_v54 = vld [vmem:[#allocation6 + $0x238] sm:$0xff] }
 0x299   :  { %2540 = vmatprep.subr.mxu0 %v1357_v63  ;;  %2611 = vmatprep.subr.mxu1 %v1613_v0  ;;  %v1031_v59 = vld [vmem:[#allocation6 + $0xa38] sm:$0xff]  ;;  %v774_v61 = vld [vmem:[#allocation6 + $0x230] sm:$0xff] }
 0x29a   :  { %2541 = vmatpush2.msra.mxu0 %v1356_v2  ;;  %2612 = vmatpush2.msra.mxu1 %v1612_v4  ;;  %v3821_v13 = vadd.f32 %v2191_v11, %v2121_v8  ;;  %v1030_v63 = vld [vmem:[#allocation6 + $0xa30] sm:$0xff]  ;;  %v767_v0 = vld [vmem:[#allocation6 + $0x1f8] sm:$0xff] }
 0x29b   :  { %2542 = vmatprep.subr.mxu0 %v1349_v29  ;;  %2613 = vmatprep.subr.mxu1 %v1605_v7  ;;  %v1023_v2 = vld [vmem:[#allocation6 + $0x9f8] sm:$0xff]  ;;  %v766_v4 = vld [vmem:[#allocation6 + $0x1f0] sm:$0xff] }
 0x29c   :  { %2543 = vmatpush2.msra.mxu0 %v1348_v10  ;;  %2614 = vmatpush2.msra.mxu1 %v1604_v12  ;;  %v1022_v5 = vld [vmem:[#allocation6 + $0x9f0] sm:$0xff]  ;;  %v759_v29 = vld [vmem:[#allocation6 + $0x1b8] sm:$0xff] }
 0x29d   :  { %2545 = vmatmul.mubr.f32.vlgmr.msra.gmra.mxu0 %v3782_v28  ;;  %2616 = vmatmul.mubr.f32.vlgmr.msra.gmra.mxu1 %v3776_v25  ;;  %v1015_v7 = vld [vmem:[#allocation6 + $0x9b8] sm:$0xff]  ;;  %v758_v8 = vld [vmem:[#allocation6 + $0x1b0] sm:$0xff] }
 0x29e   :  { %2622 = vmatprep.subr.mxu0 %v831_v14  ;;  %2693 = vmatprep.subr.mxu1 %v1087_v15  ;;  %v1014_v10 = vld [vmem:[#allocation6 + $0x9b0] sm:$0xff]  ;;  %v751_v12 = vld [vmem:[#allocation6 + $0x178] sm:$0xff] }
 0x29f   :  { %2623 = vmatpush1.msra.mxu0 %v830_v16  ;;  %2686 = vmatprep.mubr.f32.mxu0 %v3750_v44  ;;  %v799_v44 = vld [vmem:[#allocation6 + $0x2f8] sm:$0xff]  ;;  %v750_v14 = vld [vmem:[#allocation6 + $0x170] sm:$0xff] }
 0x2a0   :  { %2694 = vmatpush1.msra.mxu1 %v1086_v17  ;;  %2757 = vmatprep.mubr.f32.mxu1 %v3752_v45  ;;  %v798_v45 = vld [vmem:[#allocation6 + $0x2f0] sm:$0xff]  ;;  %v1007_v11 = vld [vmem:[#allocation6 + $0x978] sm:$0xff] }
 0x2a1   :  { %2624 = vmatprep.subr.mxu0 %v823_v18  ;;  %2695 = vmatprep.subr.mxu1 %v1079_v19  ;;  %v1006_v15 = vld [vmem:[#allocation6 + $0x970] sm:$0xff]  ;;  %v743_v16 = vld [vmem:[#allocation6 + $0x138] sm:$0xff] }
 0x2a2   :  { %2625 = vmatpush1.msra.mxu0 %v822_v20  ;;  %2696 = vmatpush1.msra.mxu1 %v1078_v3  ;;  %v999_v17 = vld [vmem:[#allocation6 + $0x938] sm:$0xff]  ;;  %v742_v18 = vld [vmem:[#allocation6 + $0x130] sm:$0xff] }
 0x2a3   :  { %2626 = vmatprep.subr.mxu0 %v815_v21  ;;  %2697 = vmatprep.subr.mxu1 %v1071_v22  ;;  %v998_v19 = vld [vmem:[#allocation6 + $0x930] sm:$0xff]  ;;  %v735_v20 = vld [vmem:[#allocation6 + $0xf8] sm:$0xff] }
 0x2a4   :  { %2627 = vmatpush1.msra.mxu0 %v814_v23  ;;  %2698 = vmatpush1.msra.mxu1 %v1070_v24  ;;  %v991_v3 = vld [vmem:[#allocation6 + $0x8f8] sm:$0xff]  ;;  %v734_v21 = vld [vmem:[#allocation6 + $0xf0] sm:$0xff] }
 0x2a5   :  { %2628 = vmatprep.subr.mxu0 %v807_v31  ;;  %2699 = vmatprep.subr.mxu1 %v1063_v6  ;;  %v990_v22 = vld [vmem:[#allocation6 + $0x8f0] sm:$0xff]  ;;  %v727_v23 = vld [vmem:[#allocation6 + $0xb8] sm:$0xff] }
 0x2a6   :  { %2629 = vmatpush1.msra.mxu0 %v806_v32  ;;  %2700 = vmatpush1.msra.mxu1 %v1062_v33  ;;  %v983_v24 = vld [vmem:[#allocation6 + $0x8b8] sm:$0xff]  ;;  %v726_v31 = vld [vmem:[#allocation6 + $0xb0] sm:$0xff] }
 0x2a7   :  { %2630 = vmatprep.subr.mxu0 %v799_v44  ;;  %2701 = vmatprep.subr.mxu1 %v1055_v34  ;;  %v982_v6 = vld [vmem:[#allocation6 + $0x8b0] sm:$0xff]  ;;  %v719_v32 = vld [vmem:[#allocation6 + $0x78] sm:$0xff] }
 0x2a8   :  { %2631 = vmatpush1.msra.mxu0 %v798_v45  ;;  %2702 = vmatpush1.msra.mxu1 %v1054_v35  ;;  %v975_v33 = vld [vmem:[#allocation6 + $0x878] sm:$0xff]  ;;  %v718_v44 = vld [vmem:[#allocation6 + $0x70] sm:$0xff] }
 0x2a9   :  { %2632 = vmatprep.subr.mxu0 %v791_v36  ;;  %2703 = vmatprep.subr.mxu1 %v1047_v37  ;;  %v974_v34 = vld [vmem:[#allocation6 + $0x870] sm:$0xff]  ;;  %v711_v45 = vld [vmem:[#allocation6 + $0x38] sm:$0xff] }
 0x2aa   :  { %2633 = vmatpush1.msra.mxu0 %v790_v39  ;;  %2704 = vmatpush1.msra.mxu1 %v1046_v40  ;;  %v967_v35 = vld [vmem:[#allocation6 + $0x838] sm:$0xff]  ;;  %v710_v36 = vld [vmem:[#allocation6 + $0x30] sm:$0xff] }
 0x2ab   :  { %2634 = vmatprep.subr.mxu0 %v783_v41  ;;  %2705 = vmatprep.subr.mxu1 %v1039_v42  ;;  %v966_v37 = vld [vmem:[#allocation6 + $0x830] sm:$0xff]  ;;  %v959_v39 = vld [vmem:[#allocation6 + $0x7f8] sm:$0xff] }
 0x2ac   :  { %2635 = vmatpush1.msra.mxu0 %v782_v48  ;;  %2706 = vmatpush1.msra.mxu1 %v1038_v49  ;;  %v1215_v40 = vld [vmem:[#allocation6 + $0xff8] sm:$0xff]  ;;  %v958_v41 = vld [vmem:[#allocation6 + $0x7f0] sm:$0xff] }
 0x2ad   :  { %2636 = vmatprep.subr.mxu0 %v775_v54  ;;  %2707 = vmatprep.subr.mxu1 %v1031_v59  ;;  %v1214_v42 = vld [vmem:[#allocation6 + $0xff0] sm:$0xff]  ;;  %v951_v48 = vld [vmem:[#allocation6 + $0x7b8] sm:$0xff] }
 0x2ae   :  { %2637 = vmatpush1.msra.mxu0 %v774_v61  ;;  %2708 = vmatpush1.msra.mxu1 %v1030_v63  ;;  %v1207_v49 = vld [vmem:[#allocation6 + $0xfb8] sm:$0xff]  ;;  %v950_v54 = vld [vmem:[#allocation6 + $0x7b0] sm:$0xff] }
 0x2af   :  { %2638 = vmatprep.subr.mxu0 %v767_v0  ;;  %2709 = vmatprep.subr.mxu1 %v1023_v2  ;;  %v1206_v59 = vld [vmem:[#allocation6 + $0xfb0] sm:$0xff]  ;;  %v943_v61 = vld [vmem:[#allocation6 + $0x778] sm:$0xff] }
 0x2b0   :  { %2639 = vmatpush1.msra.mxu0 %v766_v4  ;;  %2710 = vmatpush1.msra.mxu1 %v1022_v5  ;;  %v1199_v63 = vld [vmem:[#allocation6 + $0xf78] sm:$0xff]  ;;  %v942_v0 = vld [vmem:[#allocation6 + $0x770] sm:$0xff] }
 0x2b1   :  { %2640 = vmatprep.subr.mxu0 %v759_v29  ;;  %2711 = vmatprep.subr.mxu1 %v1015_v7  ;;  %v1198_v2 = vld [vmem:[#allocation6 + $0xf70] sm:$0xff]  ;;  %v935_v4 = vld [vmem:[#allocation6 + $0x738] sm:$0xff] }
 0x2b2   :  { %2641 = vmatpush1.msra.mxu0 %v758_v8  ;;  %2712 = vmatpush1.msra.mxu1 %v1014_v10  ;;  %v1191_v5 = vld [vmem:[#allocation6 + $0xf38] sm:$0xff]  ;;  %v934_v29 = vld [vmem:[#allocation6 + $0x730] sm:$0xff] }
 0x2b3   :  { %2642 = vmatprep.subr.mxu0 %v751_v12  ;;  %2713 = vmatprep.subr.mxu1 %v1007_v11  ;;  %v1190_v7 = vld [vmem:[#allocation6 + $0xf30] sm:$0xff]  ;;  %v927_v8 = vld [vmem:[#allocation6 + $0x6f8] sm:$0xff] }
 0x2b4   :  { %2643 = vmatpush1.msra.mxu0 %v750_v14  ;;  %2714 = vmatpush1.msra.mxu1 %v1006_v15  ;;  %v1183_v10 = vld [vmem:[#allocation6 + $0xef8] sm:$0xff]  ;;  %v926_v12 = vld [vmem:[#allocation6 + $0x6f0] sm:$0xff] }
 0x2b5   :  { %2644 = vmatprep.subr.mxu0 %v743_v16  ;;  %2715 = vmatprep.subr.mxu1 %v999_v17  ;;  %v1182_v11 = vld [vmem:[#allocation6 + $0xef0] sm:$0xff]  ;;  %v919_v14 = vld [vmem:[#allocation6 + $0x6b8] sm:$0xff] }
 0x2b6   :  { %2645 = vmatpush1.msra.mxu0 %v742_v18  ;;  %2716 = vmatpush1.msra.mxu1 %v998_v19  ;;  %v1175_v15 = vld [vmem:[#allocation6 + $0xeb8] sm:$0xff]  ;;  %v918_v16 = vld [vmem:[#allocation6 + $0x6b0] sm:$0xff] }
 0x2b7   :  { %2646 = vmatprep.subr.mxu0 %v735_v20  ;;  %2717 = vmatprep.subr.mxu1 %v991_v3  ;;  %v1174_v17 = vld [vmem:[#allocation6 + $0xeb0] sm:$0xff]  ;;  %v911_v18 = vld [vmem:[#allocation6 + $0x678] sm:$0xff] }
 0x2b8   :  { %2647 = vmatpush1.msra.mxu0 %v734_v21  ;;  %2718 = vmatpush1.msra.mxu1 %v990_v22  ;;  %v1167_v19 = vld [vmem:[#allocation6 + $0xe78] sm:$0xff]  ;;  %v910_v20 = vld [vmem:[#allocation6 + $0x670] sm:$0xff] }
 0x2b9   :  { %2648 = vmatprep.subr.mxu0 %v727_v23  ;;  %2719 = vmatprep.subr.mxu1 %v983_v24  ;;  %v1166_v3 = vld [vmem:[#allocation6 + $0xe70] sm:$0xff]  ;;  %v903_v21 = vld [vmem:[#allocation6 + $0x638] sm:$0xff] }
 0x2ba   :  { %2649 = vmatpush1.msra.mxu0 %v726_v31  ;;  %2720 = vmatpush1.msra.mxu1 %v982_v6  ;;  %v1159_v22 = vld [vmem:[#allocation6 + $0xe38] sm:$0xff]  ;;  %v902_v23 = vld [vmem:[#allocation6 + $0x630] sm:$0xff] }
 0x2bb   :  { %2650 = vmatprep.subr.mxu0 %v719_v32  ;;  %2721 = vmatprep.subr.mxu1 %v975_v33  ;;  %v1158_v24 = vld [vmem:[#allocation6 + $0xe30] sm:$0xff]  ;;  %v895_v31 = vld [vmem:[#allocation6 + $0x5f8] sm:$0xff] }
 0x2bc   :  { %2651 = vmatpush1.msra.mxu0 %v718_v44  ;;  %2722 = vmatpush1.msra.mxu1 %v974_v34  ;;  %v1151_v6 = vld [vmem:[#allocation6 + $0xdf8] sm:$0xff]  ;;  %v894_v32 = vld [vmem:[#allocation6 + $0x5f0] sm:$0xff] }
 0x2bd   :  { %2652 = vmatprep.subr.mxu0 %v711_v45  ;;  %2723 = vmatprep.subr.mxu1 %v967_v35  ;;  %v1150_v33 = vld [vmem:[#allocation6 + $0xdf0] sm:$0xff]  ;;  %v887_v44 = vld [vmem:[#allocation6 + $0x5b8] sm:$0xff] }
 0x2be   :  { %2653 = vmatpush1.msra.mxu0 %v710_v36  ;;  %2724 = vmatpush1.msra.mxu1 %v966_v37  ;;  %v1143_v34 = vld [vmem:[#allocation6 + $0xdb8] sm:$0xff]  ;;  %v886_v45 = vld [vmem:[#allocation6 + $0x5b0] sm:$0xff] }
 0x2bf   :  { %2654 = vmatprep.subr.mxu0 %v959_v39  ;;  %2725 = vmatprep.subr.mxu1 %v1215_v40  ;;  %v1142_v35 = vld [vmem:[#allocation6 + $0xdb0] sm:$0xff]  ;;  %v879_v36 = vld [vmem:[#allocation6 + $0x578] sm:$0xff] }
 0x2c0   :  { %2655 = vmatpush2.msra.mxu0 %v958_v41  ;;  %2726 = vmatpush2.msra.mxu1 %v1214_v42  ;;  %v1135_v37 = vld [vmem:[#allocation6 + $0xd78] sm:$0xff]  ;;  %v878_v39 = vld [vmem:[#allocation6 + $0x570] sm:$0xff] }
 0x2c1   :  { %2656 = vmatprep.subr.mxu0 %v951_v48  ;;  %2727 = vmatprep.subr.mxu1 %v1207_v49  ;;  %v1134_v40 = vld [vmem:[#allocation6 + $0xd70] sm:$0xff]  ;;  %v871_v41 = vld [vmem:[#allocation6 + $0x538] sm:$0xff] }
 0x2c2   :  { %2657 = vmatpush2.msra.mxu0 %v950_v54  ;;  %2728 = vmatpush2.msra.mxu1 %v1206_v59  ;;  %v1127_v42 = vld [vmem:[#allocation6 + $0xd38] sm:$0xff]  ;;  %v870_v48 = vld [vmem:[#allocation6 + $0x530] sm:$0xff] }
 0x2c3   :  { %2658 = vmatprep.subr.mxu0 %v943_v61  ;;  %2729 = vmatprep.subr.mxu1 %v1199_v63  ;;  %v1126_v49 = vld [vmem:[#allocation6 + $0xd30] sm:$0xff]  ;;  %v863_v54 = vld [vmem:[#allocation6 + $0x4f8] sm:$0xff] }
 0x2c4   :  { %2659 = vmatpush2.msra.mxu0 %v942_v0  ;;  %2730 = vmatpush2.msra.mxu1 %v1198_v2  ;;  %v1119_v59 = vld [vmem:[#allocation6 + $0xcf8] sm:$0xff]  ;;  %v862_v61 = vld [vmem:[#allocation6 + $0x4f0] sm:$0xff] }
 0x2c5   :  { %2660 = vmatprep.subr.mxu0 %v935_v4  ;;  %2731 = vmatprep.subr.mxu1 %v1191_v5  ;;  %v1118_v63 = vld [vmem:[#allocation6 + $0xcf0] sm:$0xff]  ;;  %v855_v0 = vld [vmem:[#allocation6 + $0x4b8] sm:$0xff]  ;;  %v3827_v4 = vpop.f32.mrf.mxu0 }
 0x2c6   :  { %2661 = vmatpush2.msra.mxu0 %v934_v29  ;;  %2732 = vmatpush2.msra.mxu1 %v1190_v7  ;;  %v1111_v2 = vld [vmem:[#allocation6 + $0xcb8] sm:$0xff]  ;;  %v854_v5 = vld [vmem:[#allocation6 + $0x4b0] sm:$0xff] }
 0x2c7   :  { %2662 = vmatprep.subr.mxu0 %v927_v8  ;;  %2733 = vmatprep.subr.mxu1 %v1183_v10  ;;  %v1110_v29 = vld [vmem:[#allocation6 + $0xcb0] sm:$0xff]  ;;  %v847_v7 = vld [vmem:[#allocation6 + $0x478] sm:$0xff]  ;;  %v3829_v10 = vpop.f32.mrf.mxu1 }
 0x2c8   :  { %2663 = vmatpush2.msra.mxu0 %v926_v12  ;;  %2734 = vmatpush2.msra.mxu1 %v1182_v11  ;;  %v1103_v8 = vld [vmem:[#allocation6 + $0xc78] sm:$0xff]  ;;  %v846_v12 = vld [vmem:[#allocation6 + $0x470] sm:$0xff] }
 0x2c9   :  { %2664 = vmatprep.subr.mxu0 %v919_v14  ;;  %2735 = vmatprep.subr.mxu1 %v1175_v15  ;;  %v1102_v11 = vld [vmem:[#allocation6 + $0xc70] sm:$0xff]  ;;  %v839_v15 = vld [vmem:[#allocation6 + $0x438] sm:$0xff] }
 0x2ca   :  { %2665 = vmatpush2.msra.mxu0 %v918_v16  ;;  %2736 = vmatpush2.msra.mxu1 %v1174_v17  ;;  %v1095_v16 = vld [vmem:[#allocation6 + $0xc38] sm:$0xff] }
 0x2cb   :  { %2666 = vmatprep.subr.mxu0 %v911_v18  ;;  %2737 = vmatprep.subr.mxu1 %v1167_v19  ;;  %v838_v18 = vld [vmem:[#allocation6 + $0x430] sm:$0xff] }
 0x2cc   :  { %2667 = vmatpush2.msra.mxu0 %v910_v20  ;;  %2738 = vmatpush2.msra.mxu1 %v1166_v3  ;;  %v1094_v19 = vld [vmem:[#allocation6 + $0xc30] sm:$0xff] }
 0x2cd   :  { %2668 = vmatprep.subr.mxu0 %v903_v21  ;;  %2739 = vmatprep.subr.mxu1 %v1159_v22  ;;  %v1343_v21 = vld [vmem:[#allocation6 + $0x13f8] sm:$0xff] }
 0x2ce   :  { %2669 = vmatpush2.msra.mxu0 %v902_v23  ;;  %2740 = vmatpush2.msra.mxu1 %v1158_v24  ;;  %v1599_v22 = vld [vmem:[#allocation6 + $0x1bf8] sm:$0xff]  ;;  %v1342_v23 = vld [vmem:[#allocation6 + $0x13f0] sm:$0xff] }
 0x2cf   :  { %2670 = vmatprep.subr.mxu0 %v895_v31  ;;  %2741 = vmatprep.subr.mxu1 %v1151_v6  ;;  %v1335_v24 = vld [vmem:[#allocation6 + $0x13b8] sm:$0xff]  ;;  %v1334_v6 = vld [vmem:[#allocation6 + $0x13b0] sm:$0xff] }
 0x2d0   :  { %2671 = vmatpush2.msra.mxu0 %v894_v32  ;;  %2742 = vmatpush2.msra.mxu1 %v1150_v33  ;;  %v1591_v31 = vld [vmem:[#allocation6 + $0x1bb8] sm:$0xff]  ;;  %v1590_v32 = vld [vmem:[#allocation6 + $0x1bb0] sm:$0xff] }
 0x2d1   :  { %2672 = vmatprep.subr.mxu0 %v887_v44  ;;  %2743 = vmatprep.subr.mxu1 %v1143_v34  ;;  %v1327_v33 = vld [vmem:[#allocation6 + $0x1378] sm:$0xff]  ;;  %v1582_v34 = vld [vmem:[#allocation6 + $0x1b70] sm:$0xff] }
 0x2d2   :  { %2673 = vmatpush2.msra.mxu0 %v886_v45  ;;  %2744 = vmatpush2.msra.mxu1 %v1142_v35  ;;  %v1583_v44 = vld [vmem:[#allocation6 + $0x1b78] sm:$0xff]  ;;  %v1318_v35 = vld [vmem:[#allocation6 + $0x1330] sm:$0xff] }
 0x2d3   :  { %2674 = vmatprep.subr.mxu0 %v879_v36  ;;  %2745 = vmatprep.subr.mxu1 %v1135_v37  ;;  %v1575_v45 = vld [vmem:[#allocation6 + $0x1b38] sm:$0xff]  ;;  %v1574_v36 = vld [vmem:[#allocation6 + $0x1b30] sm:$0xff] }
 0x2d4   :  { %2675 = vmatpush2.msra.mxu0 %v878_v39  ;;  %2746 = vmatpush2.msra.mxu1 %v1134_v40  ;;  %v1567_v37 = vld [vmem:[#allocation6 + $0x1af8] sm:$0xff]  ;;  %v1566_v39 = vld [vmem:[#allocation6 + $0x1af0] sm:$0xff] }
 0x2d5   :  { %2676 = vmatprep.subr.mxu0 %v871_v41  ;;  %2747 = vmatprep.subr.mxu1 %v1127_v42  ;;  %v1303_v40 = vld [vmem:[#allocation6 + $0x12b8] sm:$0xff]  ;;  %v1302_v42 = vld [vmem:[#allocation6 + $0x12b0] sm:$0xff] }
 0x2d6   :  { %2677 = vmatpush2.msra.mxu0 %v870_v48  ;;  %2748 = vmatpush2.msra.mxu1 %v1126_v49  ;;  %v1559_v41 = vld [vmem:[#allocation6 + $0x1ab8] sm:$0xff]  ;;  %v1558_v48 = vld [vmem:[#allocation6 + $0x1ab0] sm:$0xff] }
 0x2d7   :  { %2678 = vmatprep.subr.mxu0 %v863_v54  ;;  %2749 = vmatprep.subr.mxu1 %v1119_v59  ;;  %v1295_v49 = vld [vmem:[#allocation6 + $0x1278] sm:$0xff]  ;;  %v1294_v59 = vld [vmem:[#allocation6 + $0x1270] sm:$0xff] }
 0x2d8   :  { %2679 = vmatpush2.msra.mxu0 %v862_v61  ;;  %2750 = vmatpush2.msra.mxu1 %v1118_v63  ;;  %v1551_v54 = vld [vmem:[#allocation6 + $0x1a78] sm:$0xff]  ;;  %v1550_v61 = vld [vmem:[#allocation6 + $0x1a70] sm:$0xff] }
 0x2d9   :  { %2680 = vmatprep.subr.mxu0 %v855_v0  ;;  %2751 = vmatprep.subr.mxu1 %v1111_v2  ;;  %v2262_v14 = vpop.f32.mrf.mxu0  ;;  %v2333_v20 = vpop.f32.mrf.mxu1  ;;  %v1287_v63 = vld [vmem:[#allocation6 + $0x1238] sm:$0xff]  ;;  %v1286_v2 = vld [vmem:[#allocation6 + $0x1230] sm:$0xff] }
 0x2da   :  { %2681 = vmatpush2.msra.mxu0 %v854_v5  ;;  %2752 = vmatpush2.msra.mxu1 %v1110_v29  ;;  %v2263_v17 = vadd.f32 %v2262_v14, %v3821_v13  ;;  %v1598_v13 = vld [vmem:[#allocation6 + $0x1bf0] sm:$0xff]  ;;  %v1543_v0 = vld [vmem:[#allocation6 + $0x1a38] sm:$0xff] }
 0x2db   :  { %2682 = vmatprep.subr.mxu0 %v847_v7  ;;  %2753 = vmatprep.subr.mxu1 %v1103_v8  ;;  %v1542_v5 = vld [vmem:[#allocation6 + $0x1a30] sm:$0xff]  ;;  %v1279_v29 = vld [vmem:[#allocation6 + $0x11f8] sm:$0xff] }
 0x2dc   :  { %2683 = vmatpush2.msra.mxu0 %v846_v12  ;;  %2754 = vmatpush2.msra.mxu1 %v1102_v11  ;;  %v3832_v3 = vadd.f32 %v2333_v20, %v2263_v17  ;;  %v1535_v7 = vld [vmem:[#allocation6 + $0x19f8] sm:$0xff]  ;;  %v1278_v8 = vld [vmem:[#allocation6 + $0x11f0] sm:$0xff] }
 0x2dd   :  { %2684 = vmatprep.subr.mxu0 %v839_v15  ;;  %2755 = vmatprep.subr.mxu1 %v1095_v16  ;;  %v1534_v12 = vld [vmem:[#allocation6 + $0x19f0] sm:$0xff]  ;;  %v1271_v11 = vld [vmem:[#allocation6 + $0x11b8] sm:$0xff] }
 0x2de   :  { %2685 = vmatpush2.msra.mxu0 %v838_v18  ;;  %2756 = vmatpush2.msra.mxu1 %v1094_v19  ;;  %v1527_v14 = vld [vmem:[#allocation6 + $0x19b8] sm:$0xff]  ;;  %v1270_v15 = vld [vmem:[#allocation6 + $0x11b0] sm:$0xff] }
 0x2df   :  { %2687 = vmatmul.mubr.f32.vlgmr.msra.gmra.mxu0 %v3754_v46  ;;  %2758 = vmatmul.mubr.f32.vlgmr.msra.gmra.mxu1 %v3748_v43  ;;  %v1326_v46 = vld [vmem:[#allocation6 + $0x1370] sm:$0xff]  ;;  %v1319_v43 = vld [vmem:[#allocation6 + $0x1338] sm:$0xff] }
 0x2e0   :  { %2764 = vmatprep.subr.mxu0 %v1343_v21  ;;  %2835 = vmatprep.subr.mxu1 %v1599_v22  ;;  %v1526_v16 = vld [vmem:[#allocation6 + $0x19b0] sm:$0xff]  ;;  %v1263_v17 = vld [vmem:[#allocation6 + $0x1178] sm:$0xff] }
 0x2e1   :  { %2765 = vmatpush1.msra.mxu0 %v1342_v23  ;;  %2828 = vmatprep.mubr.f32.mxu0 %v3778_v26  ;;  %v1311_v26 = vld [vmem:[#allocation6 + $0x12f8] sm:$0xff]  ;;  %v1262_v19 = vld [vmem:[#allocation6 + $0x1170] sm:$0xff] }
 0x2e2   :  { %2836 = vmatpush1.msra.mxu1 %v1598_v13  ;;  %2899 = vmatprep.mubr.f32.mxu1 %v3780_v27  ;;  %v1310_v27 = vld [vmem:[#allocation6 + $0x12f0] sm:$0xff]  ;;  %v1519_v18 = vld [vmem:[#allocation6 + $0x1978] sm:$0xff] }
 0x2e3   :  { %2766 = vmatprep.subr.mxu0 %v1335_v24  ;;  %2837 = vmatprep.subr.mxu1 %v1591_v31  ;;  %v1518_v20 = vld [vmem:[#allocation6 + $0x1970] sm:$0xff]  ;;  %v1255_v21 = vld [vmem:[#allocation6 + $0x1138] sm:$0xff] }
 0x2e4   :  { %2767 = vmatpush1.msra.mxu0 %v1334_v6  ;;  %2838 = vmatpush1.msra.mxu1 %v1590_v32  ;;  %v1511_v22 = vld [vmem:[#allocation6 + $0x1938] sm:$0xff]  ;;  %v1254_v23 = vld [vmem:[#allocation6 + $0x1130] sm:$0xff] }
 0x2e5   :  { %2768 = vmatprep.subr.mxu0 %v1327_v33  ;;  %2839 = vmatprep.subr.mxu1 %v1583_v44  ;;  %v1510_v13 = vld [vmem:[#allocation6 + $0x1930] sm:$0xff]  ;;  %v1247_v24 = vld [vmem:[#allocation6 + $0x10f8] sm:$0xff] }
 0x2e6   :  { %2769 = vmatpush1.msra.mxu0 %v1326_v46  ;;  %2840 = vmatpush1.msra.mxu1 %v1582_v34  ;;  %v1503_v31 = vld [vmem:[#allocation6 + $0x18f8] sm:$0xff]  ;;  %v1246_v6 = vld [vmem:[#allocation6 + $0x10f0] sm:$0xff] }
 0x2e7   :  { %2770 = vmatprep.subr.mxu0 %v1319_v43  ;;  %2841 = vmatprep.subr.mxu1 %v1575_v45  ;;  %v1502_v32 = vld [vmem:[#allocation6 + $0x18f0] sm:$0xff]  ;;  %v1239_v33 = vld [vmem:[#allocation6 + $0x10b8] sm:$0xff] }
 0x2e8   :  { %2771 = vmatpush1.msra.mxu0 %v1318_v35  ;;  %2842 = vmatpush1.msra.mxu1 %v1574_v36  ;;  %v1495_v44 = vld [vmem:[#allocation6 + $0x18b8] sm:$0xff]  ;;  %v1238_v46 = vld [vmem:[#allocation6 + $0x10b0] sm:$0xff] }
 0x2e9   :  { %2772 = vmatprep.subr.mxu0 %v1311_v26  ;;  %2843 = vmatprep.subr.mxu1 %v1567_v37  ;;  %v1494_v34 = vld [vmem:[#allocation6 + $0x18b0] sm:$0xff]  ;;  %v1231_v43 = vld [vmem:[#allocation6 + $0x1078] sm:$0xff] }
 0x2ea   :  { %2773 = vmatpush1.msra.mxu0 %v1310_v27  ;;  %2844 = vmatpush1.msra.mxu1 %v1566_v39  ;;  %v1487_v45 = vld [vmem:[#allocation6 + $0x1878] sm:$0xff]  ;;  %v1230_v35 = vld [vmem:[#allocation6 + $0x1070] sm:$0xff] }
 0x2eb   :  { %2774 = vmatprep.subr.mxu0 %v1303_v40  ;;  %2845 = vmatprep.subr.mxu1 %v1559_v41  ;;  %v1486_v36 = vld [vmem:[#allocation6 + $0x1870] sm:$0xff]  ;;  %v1223_v26 = vld [vmem:[#allocation6 + $0x1038] sm:$0xff] }
 0x2ec   :  { %2775 = vmatpush1.msra.mxu0 %v1302_v42  ;;  %2846 = vmatpush1.msra.mxu1 %v1558_v48  ;;  %v1479_v37 = vld [vmem:[#allocation6 + $0x1838] sm:$0xff]  ;;  %v1222_v27 = vld [vmem:[#allocation6 + $0x1030] sm:$0xff] }
 0x2ed   :  { %2776 = vmatprep.subr.mxu0 %v1295_v49  ;;  %2847 = vmatprep.subr.mxu1 %v1551_v54  ;;  %v1478_v39 = vld [vmem:[#allocation6 + $0x1830] sm:$0xff]  ;;  %v1471_v40 = vld [vmem:[#allocation6 + $0x17f8] sm:$0xff] }
 0x2ee   :  { %2777 = vmatpush1.msra.mxu0 %v1294_v59  ;;  %2848 = vmatpush1.msra.mxu1 %v1550_v61  ;;  %v1727_v41 = vld [vmem:[#allocation6 + $0x1ff8] sm:$0xff]  ;;  %v1470_v42 = vld [vmem:[#allocation6 + $0x17f0] sm:$0xff] }
 0x2ef   :  { %2778 = vmatprep.subr.mxu0 %v1287_v63  ;;  %2849 = vmatprep.subr.mxu1 %v1543_v0  ;;  %v1726_v48 = vld [vmem:[#allocation6 + $0x1ff0] sm:$0xff]  ;;  %v1463_v49 = vld [vmem:[#allocation6 + $0x17b8] sm:$0xff] }
 0x2f0   :  { %2779 = vmatpush1.msra.mxu0 %v1286_v2  ;;  %2850 = vmatpush1.msra.mxu1 %v1542_v5  ;;  %v1719_v54 = vld [vmem:[#allocation6 + $0x1fb8] sm:$0xff]  ;;  %v1462_v59 = vld [vmem:[#allocation6 + $0x17b0] sm:$0xff] }
 0x2f1   :  { %2780 = vmatprep.subr.mxu0 %v1279_v29  ;;  %2851 = vmatprep.subr.mxu1 %v1535_v7  ;;  %v1718_v61 = vld [vmem:[#allocation6 + $0x1fb0] sm:$0xff]  ;;  %v1455_v63 = vld [vmem:[#allocation6 + $0x1778] sm:$0xff] }
 0x2f2   :  { %2781 = vmatpush1.msra.mxu0 %v1278_v8  ;;  %2852 = vmatpush1.msra.mxu1 %v1534_v12  ;;  %v1711_v0 = vld [vmem:[#allocation6 + $0x1f78] sm:$0xff]  ;;  %v1454_v2 = vld [vmem:[#allocation6 + $0x1770] sm:$0xff] }
 0x2f3   :  { %2782 = vmatprep.subr.mxu0 %v1271_v11  ;;  %2853 = vmatprep.subr.mxu1 %v1527_v14  ;;  %v1710_v5 = vld [vmem:[#allocation6 + $0x1f70] sm:$0xff]  ;;  %v1447_v29 = vld [vmem:[#allocation6 + $0x1738] sm:$0xff] }
 0x2f4   :  { %2783 = vmatpush1.msra.mxu0 %v1270_v15  ;;  %2854 = vmatpush1.msra.mxu1 %v1526_v16  ;;  %v1703_v7 = vld [vmem:[#allocation6 + $0x1f38] sm:$0xff]  ;;  %v1446_v8 = vld [vmem:[#allocation6 + $0x1730] sm:$0xff] }
 0x2f5   :  { %2784 = vmatprep.subr.mxu0 %v1263_v17  ;;  %2855 = vmatprep.subr.mxu1 %v1519_v18  ;;  %v1702_v12 = vld [vmem:[#allocation6 + $0x1f30] sm:$0xff]  ;;  %v1439_v11 = vld [vmem:[#allocation6 + $0x16f8] sm:$0xff] }
 0x2f6   :  { %2785 = vmatpush1.msra.mxu0 %v1262_v19  ;;  %2856 = vmatpush1.msra.mxu1 %v1518_v20  ;;  %v1695_v14 = vld [vmem:[#allocation6 + $0x1ef8] sm:$0xff]  ;;  %v1438_v15 = vld [vmem:[#allocation6 + $0x16f0] sm:$0xff] }
 0x2f7   :  { %2786 = vmatprep.subr.mxu0 %v1255_v21  ;;  %2857 = vmatprep.subr.mxu1 %v1511_v22  ;;  %v1694_v16 = vld [vmem:[#allocation6 + $0x1ef0] sm:$0xff]  ;;  %v1431_v17 = vld [vmem:[#allocation6 + $0x16b8] sm:$0xff] }
 0x2f8   :  { %2787 = vmatpush1.msra.mxu0 %v1254_v23  ;;  %2858 = vmatpush1.msra.mxu1 %v1510_v13  ;;  %v1687_v18 = vld [vmem:[#allocation6 + $0x1eb8] sm:$0xff]  ;;  %v1430_v19 = vld [vmem:[#allocation6 + $0x16b0] sm:$0xff] }
 0x2f9   :  { %2788 = vmatprep.subr.mxu0 %v1247_v24  ;;  %2859 = vmatprep.subr.mxu1 %v1503_v31  ;;  %v1686_v20 = vld [vmem:[#allocation6 + $0x1eb0] sm:$0xff]  ;;  %v1423_v21 = vld [vmem:[#allocation6 + $0x1678] sm:$0xff] }
 0x2fa   :  { %2789 = vmatpush1.msra.mxu0 %v1246_v6  ;;  %2860 = vmatpush1.msra.mxu1 %v1502_v32  ;;  %v1679_v22 = vld [vmem:[#allocation6 + $0x1e78] sm:$0xff]  ;;  %v1422_v23 = vld [vmem:[#allocation6 + $0x1670] sm:$0xff] }
 0x2fb   :  { %2790 = vmatprep.subr.mxu0 %v1239_v33  ;;  %2861 = vmatprep.subr.mxu1 %v1495_v44  ;;  %v1678_v13 = vld [vmem:[#allocation6 + $0x1e70] sm:$0xff]  ;;  %v1415_v24 = vld [vmem:[#allocation6 + $0x1638] sm:$0xff] }
 0x2fc   :  { %2791 = vmatpush1.msra.mxu0 %v1238_v46  ;;  %2862 = vmatpush1.msra.mxu1 %v1494_v34  ;;  %v1671_v31 = vld [vmem:[#allocation6 + $0x1e38] sm:$0xff]  ;;  %v1414_v6 = vld [vmem:[#allocation6 + $0x1630] sm:$0xff]  ;;  %v1737_v46 = vrot.slane %v3812_v52, %v3712_v56 }
 0x2fd   :  { %2792 = vmatprep.subr.mxu0 %v1231_v43  ;;  %2863 = vmatprep.subr.mxu1 %v1487_v45  ;;  %v1670_v32 = vld [vmem:[#allocation6 + $0x1e30] sm:$0xff]  ;;  %v1407_v33 = vld [vmem:[#allocation6 + $0x15f8] sm:$0xff]  ;;  %v1745_v45 = vrot.slane %v3812_v52, %v386_v30 }
 0x2fe   :  { %2793 = vmatpush1.msra.mxu0 %v1230_v35  ;;  %2864 = vmatpush1.msra.mxu1 %v1486_v36  ;;  %v1663_v44 = vld [vmem:[#allocation6 + $0x1df8] sm:$0xff]  ;;  %v1406_v34 = vld [vmem:[#allocation6 + $0x15f0] sm:$0xff] }
 0x2ff   :  { %2794 = vmatprep.subr.mxu0 %v1223_v26  ;;  %2865 = vmatprep.subr.mxu1 %v1479_v37  ;;  %v1662_v43 = vld [vmem:[#allocation6 + $0x1df0] sm:$0xff]  ;;  %v1399_v35 = vld [vmem:[#allocation6 + $0x15b8] sm:$0xff]  ;;  %v2123_v30 = vadd.f32 %v3827_v4, %v1745_v45  ;;  %v2942_v45 = vld [vmem:[#allocation9 + $0xe0] sm:$0xff] }
 0x300   :  { %2795 = vmatpush1.msra.mxu0 %v1222_v27  ;;  %2866 = vmatpush1.msra.mxu1 %v1478_v39  ;;  %v1655_v36 = vld [vmem:[#allocation6 + $0x1db8] sm:$0xff]  ;;  %v1398_v26 = vld [vmem:[#allocation6 + $0x15b0] sm:$0xff] }
 0x301   :  { %2796 = vmatprep.subr.mxu0 %v1471_v40  ;;  %2867 = vmatprep.subr.mxu1 %v1727_v41  ;;  %v1654_v37 = vld [vmem:[#allocation6 + $0x1db0] sm:$0xff]  ;;  %v1391_v27 = vld [vmem:[#allocation6 + $0x1578] sm:$0xff]  ;;  %v1839_v40 = vadd.f32 %v3801_v51, %v1737_v46  ;;  %v2194_v4 = vadd.f32 %v3829_v10, %v2123_v30 }
 0x302   :  { %2797 = vmatpush2.msra.mxu0 %v1470_v42  ;;  %2868 = vmatpush2.msra.mxu1 %v1726_v48  ;;  %v1647_v39 = vld [vmem:[#allocation6 + $0x1d78] sm:$0xff]  ;;  %v1390_v41 = vld [vmem:[#allocation6 + $0x1570] sm:$0xff] }
 0x303   :  { %2798 = vmatprep.subr.mxu0 %v1463_v49  ;;  %2869 = vmatprep.subr.mxu1 %v1719_v54  ;;  %v1646_v42 = vld [vmem:[#allocation6 + $0x1d70] sm:$0xff]  ;;  %v1383_v52 = vld [vmem:[#allocation6 + $0x1538] sm:$0xff]  ;;  %v1910_v51 = vadd.f32 %v3803_v60, %v1839_v40  ;;  %v3002_v40 = vld [vmem:[#allocation9 + $0x2c0] sm:$0xff] }
 0x304   :  { %2799 = vmatpush2.msra.mxu0 %v1462_v59  ;;  %2870 = vmatpush2.msra.mxu1 %v1718_v61  ;;  %v1639_v48 = vld [vmem:[#allocation6 + $0x1d38] sm:$0xff]  ;;  %v1382_v49 = vld [vmem:[#allocation6 + $0x1530] sm:$0xff] }
 0x305   :  { %2800 = vmatprep.subr.mxu0 %v1455_v63  ;;  %2871 = vmatprep.subr.mxu1 %v1711_v0  ;;  %v1638_v54 = vld [vmem:[#allocation6 + $0x1d30] sm:$0xff]  ;;  %v1375_v59 = vld [vmem:[#allocation6 + $0x14f8] sm:$0xff]  ;;  %v2264_v63 = vpop.f32.mrf.mxu0 }
 0x306   :  { %2801 = vmatpush2.msra.mxu0 %v1454_v2  ;;  %2872 = vmatpush2.msra.mxu1 %v1710_v5  ;;  %v1631_v61 = vld [vmem:[#allocation6 + $0x1cf8] sm:$0xff]  ;;  %v1374_v0 = vld [vmem:[#allocation6 + $0x14f0] sm:$0xff] }
 0x307   :  { %2802 = vmatprep.subr.mxu0 %v1447_v29  ;;  %2873 = vmatprep.subr.mxu1 %v1703_v7  ;;  %v1630_v2 = vld [vmem:[#allocation6 + $0x1cf0] sm:$0xff]  ;;  %v1367_v5 = vld [vmem:[#allocation6 + $0x14b8] sm:$0xff]  ;;  %v3847_v7 = vld [vmem:[#allocation7] sm:$0xff] }
 0x308   :  { %2803 = vmatpush2.msra.mxu0 %v1446_v8  ;;  %2874 = vmatpush2.msra.mxu1 %v1702_v12  ;;  %v1623_v29 = vld [vmem:[#allocation6 + $0x1cb8] sm:$0xff]  ;;  %v1749_v8 = vrot.slane %v3847_v7, %v390_v53  ;;  %v1981_v12 = vadd.f32 %v3817_v55, %v1910_v51  ;;  %v1366_v60 = vld [vmem:[#allocation6 + $0x14b0] sm:$0xff]  ;;  %v2997_v51 = vld [vmem:[#allocation9 + $0x298] sm:$0xff] }
 0x309   :  { %2804 = vmatprep.subr.mxu0 %v1439_v11  ;;  %2875 = vmatprep.subr.mxu1 %v1695_v14  ;;  %v1622_v11 = vld [vmem:[#allocation6 + $0x1cb0] sm:$0xff]  ;;  %v2265_v14 = vadd.f32 %v2264_v63, %v2194_v4  ;;  %v1359_v10 = vld [vmem:[#allocation6 + $0x1478] sm:$0xff] }
 0x30a   :  { %2805 = vmatpush2.msra.mxu0 %v1438_v15  ;;  %2876 = vmatpush2.msra.mxu1 %v1694_v16  ;;  %v1615_v15 = vld [vmem:[#allocation6 + $0x1c78] sm:$0xff]  ;;  %v2335_v16 = vpop.f32.mrf.mxu1  ;;  %v2995_v4 = vld [vmem:[#allocation9 + $0x288] sm:$0xff] }
 0x30b   :  { %2806 = vmatprep.subr.mxu0 %v1431_v17  ;;  %2877 = vmatprep.subr.mxu1 %v1687_v18  ;;  %v1358_v17 = vld [vmem:[#allocation6 + $0x1470] sm:$0xff]  ;;  %v1351_v53 = vld [vmem:[#allocation6 + $0x1438] sm:$0xff] }
 0x30c   :  { %2807 = vmatpush2.msra.mxu0 %v1430_v19  ;;  %2878 = vmatpush2.msra.mxu1 %v1686_v20  ;;  %v1614_v18 = vld [vmem:[#allocation6 + $0x1c70] sm:$0xff]  ;;  %v1607_v20 = vld [vmem:[#allocation6 + $0x1c38] sm:$0xff] }
 0x30d   :  { %2808 = vmatprep.subr.mxu0 %v1423_v21  ;;  %2879 = vmatprep.subr.mxu1 %v1679_v22  ;;  %v2052_v21 = vadd.f32 %v3819_v1, %v1981_v12  ;;  %v1350_v22 = vld [vmem:[#allocation6 + $0x1430] sm:$0xff]  ;;  %v3008_v1 = vld [vmem:[#allocation9 + $0x2f0] sm:$0xff]  ;;  %v2993_v12 = vld [vmem:[#allocation9 + $0x278] sm:$0xff] }
 0x30e   :  { %2809 = vmatpush2.msra.mxu0 %v1422_v23  ;;  %2880 = vmatpush2.msra.mxu1 %v1678_v13  ;;  %v1606_v23 = vld [vmem:[#allocation6 + $0x1c30] sm:$0xff]  ;;  %v2936_v30 = vld [vmem:[#allocation9 + $0xb0] sm:$0xff] }
 0x30f   :  { %2810 = vmatprep.subr.mxu0 %v1415_v24  ;;  %2881 = vmatprep.subr.mxu1 %v1671_v31  ;;  %v2336_v24 = vadd.f32 %v2335_v16, %v2265_v14  ;;  %v2932_v63 = vld [vmem:[#allocation9 + $0x90] sm:$0xff]  ;;  %v2927_v14 = vld [vmem:[#allocation9 + $0x68] sm:$0xff]  ;;  %v2990_v16 = vld [vmem:[#allocation9 + $0x260] sm:$0xff] }
 0x310   :  { %2811 = vmatpush2.msra.mxu0 %v1414_v6  ;;  %2882 = vmatpush2.msra.mxu1 %v1670_v32  ;;  %v2945_v6 = vld [vmem:[#allocation9 + $0xf8] sm:$0xff] }
 0x311   :  { %2812 = vmatprep.subr.mxu0 %v1407_v33  ;;  %2883 = vmatprep.subr.mxu1 %v1663_v44  ;;  %v3009_v32 = vld [vmem:[#allocation9 + $0x2f8] sm:$0xff]  ;;  %v2944_v33 = vld [vmem:[#allocation9 + $0xf0] sm:$0xff]  ;;  %v2907_v44 = vmax.f32 %v2052_v21, 0.0  ;;  %v2909_v46 = vmax.f32 %v2336_v24, 0.0  ;;  %v2922_v21 = vld [vmem:[#allocation9 + $0x40] sm:$0xff] }
 0x312   :  { %2813 = vmatpush2.msra.mxu0 %v1406_v34  ;;  %2884 = vmatpush2.msra.mxu1 %v1662_v43  ;;  %v2943_v34 = vld [vmem:[#allocation9 + $0xe8] sm:$0xff]  ;;  %v2920_v24 = vld [vmem:[#allocation9 + $0x30] sm:$0xff] }
 0x313   :  { %2814 = vmatprep.subr.mxu0 %v1399_v35  ;;  %2885 = vmatprep.subr.mxu1 %v1655_v36  ;;  %v3007_v43 = vld [vmem:[#allocation9 + $0x2e8] sm:$0xff]  ;;  %v3006_v35 = vld [vmem:[#allocation9 + $0x2e0] sm:$0xff]  ;;  %v2941_v36 = vld [vmem:[#allocation9 + $0xd8] sm:$0xff] }
 0x314   :  { %2815 = vmatpush2.msra.mxu0 %v1398_v26  ;;  %2886 = vmatpush2.msra.mxu1 %v1654_v37  ;;  %v3005_v26 = vld [vmem:[#allocation9 + $0x2d8] sm:$0xff]  ;;  %v2940_v37 = vld [vmem:[#allocation9 + $0xd0] sm:$0xff] }
 0x315   :  { %2816 = vmatprep.subr.mxu0 %v1391_v27  ;;  %2887 = vmatprep.subr.mxu1 %v1647_v39  ;;  %v3003_v27 = vld [vmem:[#allocation9 + $0x2c8] sm:$0xff]  ;;  %v2938_v39 = vld [vmem:[#allocation9 + $0xc0] sm:$0xff] }
 0x316   :  { %2817 = vmatpush2.msra.mxu0 %v1390_v41  ;;  %2888 = vmatpush2.msra.mxu1 %v1646_v42  ;;  %v2937_v41 = vld [vmem:[#allocation9 + $0xb8] sm:$0xff] }
 0x317   :  { %2818 = vmatprep.subr.mxu0 %v1383_v52  ;;  %2889 = vmatprep.subr.mxu1 %v1639_v48  ;;  %v3001_v42 = vld [vmem:[#allocation9 + $0x2b8] sm:$0xff]  ;;  %v3000_v52 = vld [vmem:[#allocation9 + $0x2b0] sm:$0xff]  ;;  %v2935_v48 = vld [vmem:[#allocation9 + $0xa8] sm:$0xff] }
 0x318   :  { %2819 = vmatpush2.msra.mxu0 %v1382_v49  ;;  %2890 = vmatpush2.msra.mxu1 %v1638_v54  ;;  %v2999_v49 = vld [vmem:[#allocation9 + $0x2a8] sm:$0xff]  ;;  %v2934_v54 = vld [vmem:[#allocation9 + $0xa0] sm:$0xff] }
 0x319   :  { %2820 = vmatprep.subr.mxu0 %v1375_v59  ;;  %2891 = vmatprep.subr.mxu1 %v1631_v61  ;;  %v2998_v59 = vld [vmem:[#allocation9 + $0x2a0] sm:$0xff]  ;;  %v2933_v61 = vld [vmem:[#allocation9 + $0x98] sm:$0xff] }
 0x31a   :  { %2821 = vmatpush2.msra.mxu0 %v1374_v0  ;;  %2892 = vmatpush2.msra.mxu1 %v1630_v2  ;;  %v2996_v0 = vld [vmem:[#allocation9 + $0x290] sm:$0xff]  ;;  %v2931_v2 = vld [vmem:[#allocation9 + $0x88] sm:$0xff] }
 0x31b   :  { %2822 = vmatprep.subr.mxu0 %v1367_v5  ;;  %2893 = vmatprep.subr.mxu1 %v1623_v29  ;;  %v2404_v19 = vpop.f32.mrf.mxu0  ;;  %v2475_v13 = vpop.f32.mrf.mxu1  ;;  %v2930_v5 = vld [vmem:[#allocation9 + $0x80] sm:$0xff] }
 0x31c   :  { %2823 = vmatpush2.msra.mxu0 %v1366_v60  ;;  %2894 = vmatpush2.msra.mxu1 %v1622_v11  ;;  %v2405_v55 = vadd.f32 %v2404_v19, %v1749_v8  ;;  %v2994_v29 = vld [vmem:[#allocation9 + $0x280] sm:$0xff]  ;;  %v2929_v8 = vld [vmem:[#allocation9 + $0x78] sm:$0xff]  ;;  %v2928_v60 = vld [vmem:[#allocation9 + $0x70] sm:$0xff] }
 0x31d   :  { %2824 = vmatprep.subr.mxu0 %v1359_v10  ;;  %2895 = vmatprep.subr.mxu1 %v1615_v15  ;;  %v2992_v11 = vld [vmem:[#allocation9 + $0x270] sm:$0xff]  ;;  %v2991_v10 = vld [vmem:[#allocation9 + $0x268] sm:$0xff]  ;;  %v2926_v15 = vld [vmem:[#allocation9 + $0x60] sm:$0xff] }
 0x31e   :  { %2825 = vmatpush2.msra.mxu0 %v1358_v17  ;;  %2896 = vmatpush2.msra.mxu1 %v1614_v18  ;;  %v3854_v31 = vadd.f32 %v2475_v13, %v2405_v55  ;;  %v2925_v17 = vld [vmem:[#allocation9 + $0x58] sm:$0xff]  ;;  %v2924_v19 = vld [vmem:[#allocation9 + $0x50] sm:$0xff]  ;;  %v2987_v55 = vld [vmem:[#allocation9 + $0x248] sm:$0xff] }
 0x31f   :  { %2826 = vmatprep.subr.mxu0 %v1351_v53  ;;  %2897 = vmatprep.subr.mxu1 %v1607_v20  ;;  %v2989_v18 = vld [vmem:[#allocation9 + $0x258] sm:$0xff]  ;;  %v2988_v53 = vld [vmem:[#allocation9 + $0x250] sm:$0xff]  ;;  %v2923_v20 = vld [vmem:[#allocation9 + $0x48] sm:$0xff] }
 0x320   :  { %2827 = vmatpush2.msra.mxu0 %v1350_v22  ;;  %2898 = vmatpush2.msra.mxu1 %v1606_v23  ;;  %v2986_v22 = vld [vmem:[#allocation9 + $0x240] sm:$0xff]  ;;  %v2921_v23 = vld [vmem:[#allocation9 + $0x38] sm:$0xff] }
 0x321   :  { %2829 = vmatmul.mubr.f32.vlgmr.msra.gmra.mxu0 %v3782_v28  ;;  %2900 = vmatmul.mubr.f32.vlgmr.msra.gmra.mxu1 %v3776_v25  ;;  %v3004_v28 = vld [vmem:[#allocation9 + $0x2d0] sm:$0xff]  ;;  %v2939_v25 = vld [vmem:[#allocation9 + $0xc8] sm:$0xff]  ;;  %v2985_v13 = vld [vmem:[#allocation9 + $0x238] sm:$0xff] }
 0x322   :  { %3182 = vmatprep.subr.mxu0 %v2945_v6  ;;  %3253 = vmatprep.subr.mxu1 %v3009_v32  ;;  %v2984_v6 = vld [vmem:[#allocation9 + $0x230] sm:$0xff]  ;;  %v2919_v32 = vld [vmem:[#allocation9 + $0x28] sm:$0xff] }
 0x323   :  { %3183 = vmatpush1.msra.mxu0 %v2944_v33  ;;  %3246 = vmatprep.mubr.f32.mxu0 %v2907_v44  ;;  %v2983_v33 = vld [vmem:[#allocation9 + $0x228] sm:$0xff]  ;;  %v2918_v44 = vld [vmem:[#allocation9 + $0x20] sm:$0xff] }
 0x324   :  { %3254 = vmatpush1.msra.mxu1 %v3008_v1  ;;  %3317 = vmatprep.mubr.f32.mxu1 %v2909_v46  ;;  %v2982_v1 = vld [vmem:[#allocation9 + $0x220] sm:$0xff]  ;;  %v2917_v46 = vld [vmem:[#allocation9 + $0x18] sm:$0xff] }
 0x325   :  { %3184 = vmatprep.subr.mxu0 %v2943_v34  ;;  %3255 = vmatprep.subr.mxu1 %v3007_v43  ;;  %v2981_v34 = vld [vmem:[#allocation9 + $0x218] sm:$0xff]  ;;  %v2916_v43 = vld [vmem:[#allocation9 + $0x10] sm:$0xff] }
 0x326   :  { %3185 = vmatpush1.msra.mxu0 %v2942_v45  ;;  %3256 = vmatpush1.msra.mxu1 %v3006_v35  ;;  %v2980_v45 = vld [vmem:[#allocation9 + $0x210] sm:$0xff]  ;;  %v2915_v35 = vld [vmem:[#allocation9 + $0x8] sm:$0xff] }
 0x327   :  { %3186 = vmatprep.subr.mxu0 %v2941_v36  ;;  %3257 = vmatprep.subr.mxu1 %v3005_v26  ;;  %v2979_v36 = vld [vmem:[#allocation9 + $0x208] sm:$0xff]  ;;  %v2914_v26 = vld [vmem:[#allocation9] sm:$0xff] }
 0x328   :  { %3187 = vmatpush1.msra.mxu0 %v2940_v37  ;;  %3258 = vmatpush1.msra.mxu1 %v3004_v28  ;;  %v2978_v37 = vld [vmem:[#allocation9 + $0x200] sm:$0xff]  ;;  %v2977_v28 = vld [vmem:[#allocation9 + $0x1f8] sm:$0xff] }
 0x329   :  { %3188 = vmatprep.subr.mxu0 %v2939_v25  ;;  %3259 = vmatprep.subr.mxu1 %v3003_v27  ;;  %v3041_v25 = vld [vmem:[#allocation9 + $0x3f8] sm:$0xff]  ;;  %v2976_v27 = vld [vmem:[#allocation9 + $0x1f0] sm:$0xff] }
 0x32a   :  { %3189 = vmatpush1.msra.mxu0 %v2938_v39  ;;  %3260 = vmatpush1.msra.mxu1 %v3002_v40  ;;  %v3040_v39 = vld [vmem:[#allocation9 + $0x3f0] sm:$0xff]  ;;  %v2975_v40 = vld [vmem:[#allocation9 + $0x1e8] sm:$0xff] }
 0x32b   :  { %3190 = vmatprep.subr.mxu0 %v2937_v41  ;;  %3261 = vmatprep.subr.mxu1 %v3001_v42  ;;  %v3039_v41 = vld [vmem:[#allocation9 + $0x3e8] sm:$0xff]  ;;  %v2974_v42 = vld [vmem:[#allocation9 + $0x1e0] sm:$0xff] }
 0x32c   :  { %3191 = vmatpush1.msra.mxu0 %v2936_v30  ;;  %3262 = vmatpush1.msra.mxu1 %v3000_v52  ;;  %v3038_v30 = vld [vmem:[#allocation9 + $0x3e0] sm:$0xff]  ;;  %v2973_v52 = vld [vmem:[#allocation9 + $0x1d8] sm:$0xff] }
 0x32d   :  { %3192 = vmatprep.subr.mxu0 %v2935_v48  ;;  %3263 = vmatprep.subr.mxu1 %v2999_v49  ;;  %v3037_v48 = vld [vmem:[#allocation9 + $0x3d8] sm:$0xff]  ;;  %v2972_v49 = vld [vmem:[#allocation9 + $0x1d0] sm:$0xff] }
 0x32e   :  { %3193 = vmatpush1.msra.mxu0 %v2934_v54  ;;  %3264 = vmatpush1.msra.mxu1 %v2998_v59  ;;  %v3036_v54 = vld [vmem:[#allocation9 + $0x3d0] sm:$0xff]  ;;  %v2971_v59 = vld [vmem:[#allocation9 + $0x1c8] sm:$0xff] }
 0x32f   :  { %3194 = vmatprep.subr.mxu0 %v2933_v61  ;;  %3265 = vmatprep.subr.mxu1 %v2997_v51  ;;  %v3035_v61 = vld [vmem:[#allocation9 + $0x3c8] sm:$0xff]  ;;  %v2970_v51 = vld [vmem:[#allocation9 + $0x1c0] sm:$0xff] }
 0x330   :  { %3195 = vmatpush1.msra.mxu0 %v2932_v63  ;;  %3266 = vmatpush1.msra.mxu1 %v2996_v0  ;;  %v3034_v63 = vld [vmem:[#allocation9 + $0x3c0] sm:$0xff]  ;;  %v2969_v0 = vld [vmem:[#allocation9 + $0x1b8] sm:$0xff] }
 0x331   :  { %3196 = vmatprep.subr.mxu0 %v2931_v2  ;;  %3267 = vmatprep.subr.mxu1 %v2995_v4  ;;  %v3033_v2 = vld [vmem:[#allocation9 + $0x3b8] sm:$0xff]  ;;  %v2968_v4 = vld [vmem:[#allocation9 + $0x1b0] sm:$0xff] }
 0x332   :  { %3197 = vmatpush1.msra.mxu0 %v2930_v5  ;;  %3268 = vmatpush1.msra.mxu1 %v2994_v29  ;;  %v3032_v5 = vld [vmem:[#allocation9 + $0x3b0] sm:$0xff]  ;;  %v2967_v29 = vld [vmem:[#allocation9 + $0x1a8] sm:$0xff] }
 0x333   :  { %3198 = vmatprep.subr.mxu0 %v2929_v8  ;;  %3269 = vmatprep.subr.mxu1 %v2993_v12  ;;  %v3031_v8 = vld [vmem:[#allocation9 + $0x3a8] sm:$0xff]  ;;  %v2966_v12 = vld [vmem:[#allocation9 + $0x1a0] sm:$0xff] }
 0x334   :  { %3199 = vmatpush1.msra.mxu0 %v2928_v60  ;;  %3270 = vmatpush1.msra.mxu1 %v2992_v11  ;;  %v3030_v60 = vld [vmem:[#allocation9 + $0x3a0] sm:$0xff]  ;;  %v2965_v11 = vld [vmem:[#allocation9 + $0x198] sm:$0xff] }
 0x335   :  { %3200 = vmatprep.subr.mxu0 %v2927_v14  ;;  %3271 = vmatprep.subr.mxu1 %v2991_v10  ;;  %v3029_v14 = vld [vmem:[#allocation9 + $0x398] sm:$0xff]  ;;  %v2964_v10 = vld [vmem:[#allocation9 + $0x190] sm:$0xff] }
 0x336   :  { %3201 = vmatpush1.msra.mxu0 %v2926_v15  ;;  %3272 = vmatpush1.msra.mxu1 %v2990_v16  ;;  %v3028_v15 = vld [vmem:[#allocation9 + $0x390] sm:$0xff]  ;;  %v2963_v16 = vld [vmem:[#allocation9 + $0x188] sm:$0xff] }
 0x337   :  { %3202 = vmatprep.subr.mxu0 %v2925_v17  ;;  %3273 = vmatprep.subr.mxu1 %v2989_v18  ;;  %v3027_v17 = vld [vmem:[#allocation9 + $0x388] sm:$0xff]  ;;  %v2962_v18 = vld [vmem:[#allocation9 + $0x180] sm:$0xff] }
 0x338   :  { %3203 = vmatpush1.msra.mxu0 %v2924_v19  ;;  %3274 = vmatpush1.msra.mxu1 %v2988_v53  ;;  %v3026_v19 = vld [vmem:[#allocation9 + $0x380] sm:$0xff]  ;;  %v2961_v53 = vld [vmem:[#allocation9 + $0x178] sm:$0xff] }
 0x339   :  { %3204 = vmatprep.subr.mxu0 %v2923_v20  ;;  %3275 = vmatprep.subr.mxu1 %v2987_v55  ;;  %v3025_v20 = vld [vmem:[#allocation9 + $0x378] sm:$0xff]  ;;  %v2960_v55 = vld [vmem:[#allocation9 + $0x170] sm:$0xff] }
 0x33a   :  { %3205 = vmatpush1.msra.mxu0 %v2922_v21  ;;  %3276 = vmatpush1.msra.mxu1 %v2986_v22  ;;  %v3024_v21 = vld [vmem:[#allocation9 + $0x370] sm:$0xff]  ;;  %v2959_v22 = vld [vmem:[#allocation9 + $0x168] sm:$0xff] }
 0x33b   :  { %3206 = vmatprep.subr.mxu0 %v2921_v23  ;;  %3277 = vmatprep.subr.mxu1 %v2985_v13  ;;  %v3023_v23 = vld [vmem:[#allocation9 + $0x368] sm:$0xff]  ;;  %v2958_v13 = vld [vmem:[#allocation9 + $0x160] sm:$0xff] }
 0x33c   :  { %3207 = vmatpush1.msra.mxu0 %v2920_v24  ;;  %3278 = vmatpush1.msra.mxu1 %v2984_v6  ;;  %v3022_v24 = vld [vmem:[#allocation9 + $0x360] sm:$0xff]  ;;  %v2957_v6 = vld [vmem:[#allocation9 + $0x158] sm:$0xff] }
 0x33d   :  { %3208 = vmatprep.subr.mxu0 %v2919_v32  ;;  %3279 = vmatprep.subr.mxu1 %v2983_v33  ;;  %v3021_v32 = vld [vmem:[#allocation9 + $0x358] sm:$0xff]  ;;  %v2956_v33 = vld [vmem:[#allocation9 + $0x150] sm:$0xff] }
 0x33e   :  { %3209 = vmatpush1.msra.mxu0 %v2918_v44  ;;  %3280 = vmatpush1.msra.mxu1 %v2982_v1  ;;  %v3020_v44 = vld [vmem:[#allocation9 + $0x350] sm:$0xff]  ;;  %v1753_v1 = vrot.slane %v3847_v7, %v394_v57  ;;  %v2951_v57 = vld [vmem:[#allocation9 + $0x128] sm:$0xff] }
 0x33f   :  { %3210 = vmatprep.subr.mxu0 %v2917_v46  ;;  %3281 = vmatprep.subr.mxu1 %v2981_v34  ;;  %v2955_v46 = vld [vmem:[#allocation9 + $0x148] sm:$0xff] }
 0x340   :  { %3211 = vmatpush1.msra.mxu0 %v2916_v43  ;;  %3282 = vmatpush1.msra.mxu1 %v2980_v45  ;;  %v3019_v34 = vld [vmem:[#allocation9 + $0x348] sm:$0xff]  ;;  %v2406_v43 = vpop.f32.mrf.mxu0  ;;  %v2954_v45 = vld [vmem:[#allocation9 + $0x140] sm:$0xff] }
 0x341   :  { %3212 = vmatprep.subr.mxu0 %v2915_v35  ;;  %3283 = vmatprep.subr.mxu1 %v2979_v36  ;;  %v3018_v35 = vld [vmem:[#allocation9 + $0x340] sm:$0xff]  ;;  %v2953_v36 = vld [vmem:[#allocation9 + $0x138] sm:$0xff]  ;;  %v3015_v7 = vld [vmem:[#allocation9 + $0x328] sm:$0xff] }
 0x342   :  { %3213 = vmatpush1.msra.mxu0 %v2914_v26  ;;  %3284 = vmatpush1.msra.mxu1 %v2978_v37  ;;  %v3017_v26 = vld [vmem:[#allocation9 + $0x338] sm:$0xff]  ;;  %v2952_v37 = vld [vmem:[#allocation9 + $0x130] sm:$0xff] }
 0x343   :  { %3214 = vmatprep.subr.mxu0 %v2977_v28  ;;  %3285 = vmatprep.subr.mxu1 %v3041_v25  ;;  %v3016_v28 = vld [vmem:[#allocation9 + $0x330] sm:$0xff]  ;;  %v2407_v25 = vadd.f32 %v2406_v43, %v1753_v1  ;;  %v3127_v1 = vld [vmem:[#allocation9 + $0x6a8] sm:$0xff] }
 0x344   :  { %3215 = vmatpush2.msra.mxu0 %v2976_v27  ;;  %3286 = vmatpush2.msra.mxu1 %v3040_v39  ;;  %v2477_v27 = vpop.f32.mrf.mxu1  ;;  %v2950_v39 = vld [vmem:[#allocation9 + $0x120] sm:$0xff]  ;;  %v3060_v43 = vld [vmem:[#allocation9 + $0x490] sm:$0xff] }
 0x345   :  { %3216 = vmatprep.subr.mxu0 %v2975_v40  ;;  %3287 = vmatprep.subr.mxu1 %v3039_v41  ;;  %v3014_v40 = vld [vmem:[#allocation9 + $0x320] sm:$0xff]  ;;  %v2949_v41 = vld [vmem:[#allocation9 + $0x118] sm:$0xff] }
 0x346   :  { %3217 = vmatpush2.msra.mxu0 %v2974_v42  ;;  %3288 = vmatpush2.msra.mxu1 %v3038_v30  ;;  %v3013_v42 = vld [vmem:[#allocation9 + $0x318] sm:$0xff]  ;;  %v2948_v30 = vld [vmem:[#allocation9 + $0x110] sm:$0xff] }
 0x347   :  { %3218 = vmatprep.subr.mxu0 %v2973_v52  ;;  %3289 = vmatprep.subr.mxu1 %v3037_v48  ;;  %v3012_v52 = vld [vmem:[#allocation9 + $0x310] sm:$0xff] }
 0x348   :  { %3219 = vmatpush2.msra.mxu0 %v2972_v49  ;;  %3290 = vmatpush2.msra.mxu1 %v3036_v54  ;;  %v2478_v54 = vadd.f32 %v2477_v27, %v2407_v25  ;;  %v3122_v25 = vld [vmem:[#allocation9 + $0x680] sm:$0xff]  ;;  %v3055_v27 = vld [vmem:[#allocation9 + $0x468] sm:$0xff] }
 0x349   :  { %3220 = vmatprep.subr.mxu0 %v2971_v59  ;;  %3291 = vmatprep.subr.mxu1 %v3035_v61  ;;  %v2947_v59 = vld [vmem:[#allocation9 + $0x108] sm:$0xff] }
 0x34a   :  { %3221 = vmatpush2.msra.mxu0 %v2970_v51  ;;  %3292 = vmatpush2.msra.mxu1 %v3034_v63  ;;  %v3011_v61 = vld [vmem:[#allocation9 + $0x308] sm:$0xff]  ;;  %v2946_v63 = vld [vmem:[#allocation9 + $0x100] sm:$0xff] }
 0x34b   :  { %3222 = vmatprep.subr.mxu0 %v2969_v0  ;;  %3293 = vmatprep.subr.mxu1 %v3033_v2  ;;  %v3010_v0 = vld [vmem:[#allocation9 + $0x300] sm:$0xff] }
 0x34c   :  { %3223 = vmatpush2.msra.mxu0 %v2968_v4  ;;  %3294 = vmatpush2.msra.mxu1 %v3032_v5 }
 0x34d   :  { %3224 = vmatprep.subr.mxu0 %v2967_v29  ;;  %3295 = vmatprep.subr.mxu1 %v3031_v8  ;;  %v2906_v29 = vmax.f32 %v3806_v9, 0.0  ;;  %v2908_v8 = vmax.f32 %v3832_v3, 0.0  ;;  %v3135_v9 = vld [vmem:[#allocation9 + $0x6e8] sm:$0xff]  ;;  %v3069_v3 = vld [vmem:[#allocation9 + $0x4d8] sm:$0xff] }
 0x34e   :  { %3225 = vmatpush2.msra.mxu0 %v2966_v12  ;;  %3296 = vmatpush2.msra.mxu1 %v3030_v60  ;;  %v3073_v12 = vld [vmem:[#allocation9 + $0x4f8] sm:$0xff] }
 0x34f   :  { %3226 = vmatprep.subr.mxu0 %v2965_v11  ;;  %3297 = vmatprep.subr.mxu1 %v3029_v14  ;;  %v3137_v11 = vld [vmem:[#allocation9 + $0x6f8] sm:$0xff] }
 0x350   :  { %3227 = vmatpush2.msra.mxu0 %v2964_v10  ;;  %3298 = vmatpush2.msra.mxu1 %v3028_v15  ;;  %v3136_v10 = vld [vmem:[#allocation9 + $0x6f0] sm:$0xff]  ;;  %v3071_v15 = vld [vmem:[#allocation9 + $0x4e8] sm:$0xff] }
 0x351   :  { %3228 = vmatprep.subr.mxu0 %v2963_v16  ;;  %3299 = vmatprep.subr.mxu1 %v3027_v17  ;;  %v3070_v17 = vld [vmem:[#allocation9 + $0x4e0] sm:$0xff] }
 0x352   :  { %3229 = vmatpush2.msra.mxu0 %v2962_v18  ;;  %3300 = vmatpush2.msra.mxu1 %v3026_v19  ;;  %v3134_v18 = vld [vmem:[#allocation9 + $0x6e0] sm:$0xff]  ;;  %v3068_v19 = vld [vmem:[#allocation9 + $0x4d0] sm:$0xff] }
 0x353   :  { %3230 = vmatprep.subr.mxu0 %v2961_v53  ;;  %3301 = vmatprep.subr.mxu1 %v3025_v20  ;;  %v3133_v53 = vld [vmem:[#allocation9 + $0x6d8] sm:$0xff]  ;;  %v3067_v20 = vld [vmem:[#allocation9 + $0x4c8] sm:$0xff] }
 0x354   :  { %3231 = vmatpush2.msra.mxu0 %v2960_v55  ;;  %3302 = vmatpush2.msra.mxu1 %v3024_v21  ;;  %v3132_v55 = vld [vmem:[#allocation9 + $0x6d0] sm:$0xff]  ;;  %v3066_v21 = vld [vmem:[#allocation9 + $0x4c0] sm:$0xff] }
 0x355   :  { %3232 = vmatprep.subr.mxu0 %v2959_v22  ;;  %3303 = vmatprep.subr.mxu1 %v3023_v23  ;;  %v3131_v22 = vld [vmem:[#allocation9 + $0x6c8] sm:$0xff]  ;;  %v3065_v23 = vld [vmem:[#allocation9 + $0x4b8] sm:$0xff] }
 0x356   :  { %3233 = vmatpush2.msra.mxu0 %v2958_v13  ;;  %3304 = vmatpush2.msra.mxu1 %v3022_v24  ;;  %v3130_v13 = vld [vmem:[#allocation9 + $0x6c0] sm:$0xff]  ;;  %v3064_v24 = vld [vmem:[#allocation9 + $0x4b0] sm:$0xff] }
 0x357   :  { %3234 = vmatprep.subr.mxu0 %v2957_v6  ;;  %3305 = vmatprep.subr.mxu1 %v3021_v32  ;;  %v3129_v6 = vld [vmem:[#allocation9 + $0x6b8] sm:$0xff]  ;;  %v3063_v32 = vld [vmem:[#allocation9 + $0x4a8] sm:$0xff] }
 0x358   :  { %3235 = vmatpush2.msra.mxu0 %v2956_v33  ;;  %3306 = vmatpush2.msra.mxu1 %v3020_v44  ;;  %v3128_v33 = vld [vmem:[#allocation9 + $0x6b0] sm:$0xff]  ;;  %v3062_v44 = vld [vmem:[#allocation9 + $0x4a0] sm:$0xff] }
 0x359   :  { %3236 = vmatprep.subr.mxu0 %v2955_v46  ;;  %3307 = vmatprep.subr.mxu1 %v3019_v34  ;;  %v3061_v46 = vld [vmem:[#allocation9 + $0x498] sm:$0xff]  ;;  %v3126_v34 = vld [vmem:[#allocation9 + $0x6a0] sm:$0xff] }
 0x35a   :  { %3237 = vmatpush2.msra.mxu0 %v2954_v45  ;;  %3308 = vmatpush2.msra.mxu1 %v3018_v35  ;;  %v3125_v45 = vld [vmem:[#allocation9 + $0x698] sm:$0xff]  ;;  %v3059_v35 = vld [vmem:[#allocation9 + $0x488] sm:$0xff] }
 0x35b   :  { %3238 = vmatprep.subr.mxu0 %v2953_v36  ;;  %3309 = vmatprep.subr.mxu1 %v3017_v26  ;;  %v3124_v36 = vld [vmem:[#allocation9 + $0x690] sm:$0xff]  ;;  %v3058_v26 = vld [vmem:[#allocation9 + $0x480] sm:$0xff] }
 0x35c   :  { %3239 = vmatpush2.msra.mxu0 %v2952_v37  ;;  %3310 = vmatpush2.msra.mxu1 %v3016_v28  ;;  %v3123_v37 = vld [vmem:[#allocation9 + $0x688] sm:$0xff]  ;;  %v3057_v28 = vld [vmem:[#allocation9 + $0x478] sm:$0xff] }
 0x35d   :  { %3240 = vmatprep.subr.mxu0 %v2951_v57  ;;  %3311 = vmatprep.subr.mxu1 %v3015_v7  ;;  %v2546_v48 = vpop.f32.mrf.mxu0  ;;  %v2617_v49 = vpop.f32.mrf.mxu1  ;;  %v3056_v57 = vld [vmem:[#allocation9 + $0x470] sm:$0xff]  ;;  %v3121_v7 = vld [vmem:[#allocation9 + $0x678] sm:$0xff] }
 0x35e   :  { %3241 = vmatpush2.msra.mxu0 %v2950_v39  ;;  %3312 = vmatpush2.msra.mxu1 %v3014_v40  ;;  %v2547_v51 = vadd.f32 %v2546_v48, %v3854_v31  ;;  %v3072_v31 = vld [vmem:[#allocation9 + $0x4f0] sm:$0xff]  ;;  %v3054_v40 = vld [vmem:[#allocation9 + $0x460] sm:$0xff]  ;;  %v3117_v48 = vld [vmem:[#allocation9 + $0x658] sm:$0xff] }
 0x35f   :  { %3242 = vmatprep.subr.mxu0 %v2949_v41  ;;  %3313 = vmatprep.subr.mxu1 %v3013_v42  ;;  %v2548_v2 = vpop.f32.mrf.mxu0  ;;  %v2619_v60 = vpop.f32.mrf.mxu1  ;;  %v3120_v39 = vld [vmem:[#allocation9 + $0x670] sm:$0xff]  ;;  %v3119_v41 = vld [vmem:[#allocation9 + $0x668] sm:$0xff]  ;;  %v3053_v42 = vld [vmem:[#allocation9 + $0x458] sm:$0xff] }
 0x360   :  { %3243 = vmatpush2.msra.mxu0 %v2948_v30  ;;  %3314 = vmatpush2.msra.mxu1 %v3012_v52  ;;  %v3862_v4 = vadd.f32 %v2617_v49, %v2547_v51  ;;  %v2549_v5 = vadd.f32 %v2548_v2, %v2478_v54  ;;  %v3118_v30 = vld [vmem:[#allocation9 + $0x660] sm:$0xff]  ;;  %v3052_v52 = vld [vmem:[#allocation9 + $0x450] sm:$0xff]  ;;  %v3051_v49 = vld [vmem:[#allocation9 + $0x448] sm:$0xff] }
 0x361   :  { %3244 = vmatprep.subr.mxu0 %v2947_v59  ;;  %3315 = vmatprep.subr.mxu1 %v3011_v61  ;;  %v3116_v54 = vld [vmem:[#allocation9 + $0x650] sm:$0xff]  ;;  %v3050_v59 = vld [vmem:[#allocation9 + $0x440] sm:$0xff]  ;;  %v3115_v61 = vld [vmem:[#allocation9 + $0x648] sm:$0xff] }
 0x362   :  { %3245 = vmatpush2.msra.mxu0 %v2946_v63  ;;  %3316 = vmatpush2.msra.mxu1 %v3010_v0  ;;  %v2620_v14 = vadd.f32 %v2619_v60, %v2549_v5  ;;  %v3049_v51 = vld [vmem:[#allocation9 + $0x438] sm:$0xff]  ;;  %v3114_v63 = vld [vmem:[#allocation9 + $0x640] sm:$0xff]  ;;  %v3048_v0 = vld [vmem:[#allocation9 + $0x430] sm:$0xff] }
 0x363   :  { %3247 = vmatmul.mubr.f32.vlgmr.msra.gmra.mxu0 %v2906_v29  ;;  %3318 = vmatmul.mubr.f32.vlgmr.msra.gmra.mxu1 %v2908_v8  ;;  %v3113_v2 = vld [vmem:[#allocation9 + $0x638] sm:$0xff]  ;;  %v3047_v5 = vld [vmem:[#allocation9 + $0x428] sm:$0xff]  ;;  %v3112_v29 = vld [vmem:[#allocation9 + $0x630] sm:$0xff] }
 0x364   :  { %3324 = vmatprep.subr.mxu0 %v3073_v12  ;;  %v2911_v16 = vmax.f32 %v2620_v14, 0.0  ;;  %3395 = vmatprep.subr.mxu1 %v3137_v11  ;;  %v3046_v8 = vld [vmem:[#allocation9 + $0x420] sm:$0xff]  ;;  %v3111_v12 = vld [vmem:[#allocation9 + $0x628] sm:$0xff]  ;;  %v3045_v60 = vld [vmem:[#allocation9 + $0x418] sm:$0xff] }
 0x365   :  { %3325 = vmatpush1.msra.mxu0 %v3072_v31  ;;  %3396 = vmatpush1.msra.mxu1 %v3136_v10  ;;  %v3110_v11 = vld [vmem:[#allocation9 + $0x620] sm:$0xff]  ;;  %v3044_v31 = vld [vmem:[#allocation9 + $0x410] sm:$0xff]  ;;  %v3109_v14 = vld [vmem:[#allocation9 + $0x618] sm:$0xff] }
 0x366   :  { %3326 = vmatprep.subr.mxu0 %v3071_v15  ;;  %3388 = vmatprep.mubr.f32.mxu0 %v2911_v16  ;;  %v3043_v10 = vld [vmem:[#allocation9 + $0x408] sm:$0xff]  ;;  %v3108_v15 = vld [vmem:[#allocation9 + $0x610] sm:$0xff]  ;;  %v3042_v16 = vld [vmem:[#allocation9 + $0x400] sm:$0xff] }
 0x367   :  { %3327 = vmatpush1.msra.mxu0 %v3070_v17  ;;  %3397 = vmatprep.subr.mxu1 %v3135_v9  ;;  %v3107_v17 = vld [vmem:[#allocation9 + $0x608] sm:$0xff]  ;;  %v3105_v9 = vld [vmem:[#allocation9 + $0x5f8] sm:$0xff] }
 0x368   :  { %3328 = vmatprep.subr.mxu0 %v3069_v3  ;;  %3398 = vmatpush1.msra.mxu1 %v3134_v18  ;;  %v3106_v3 = vld [vmem:[#allocation9 + $0x600] sm:$0xff]  ;;  %v3104_v18 = vld [vmem:[#allocation9 + $0x5f0] sm:$0xff] }
 0x369   :  { %3329 = vmatpush1.msra.mxu0 %v3068_v19  ;;  %3399 = vmatprep.subr.mxu1 %v3133_v53  ;;  %v3169_v19 = vld [vmem:[#allocation9 + $0x7f8] sm:$0xff]  ;;  %v3103_v53 = vld [vmem:[#allocation9 + $0x5e8] sm:$0xff] }
 0x36a   :  { %3330 = vmatprep.subr.mxu0 %v3067_v20  ;;  %3400 = vmatpush1.msra.mxu1 %v3132_v55  ;;  %v3168_v20 = vld [vmem:[#allocation9 + $0x7f0] sm:$0xff]  ;;  %v3102_v55 = vld [vmem:[#allocation9 + $0x5e0] sm:$0xff] }
 0x36b   :  { %3331 = vmatpush1.msra.mxu0 %v3066_v21  ;;  %3401 = vmatprep.subr.mxu1 %v3131_v22  ;;  %v3167_v21 = vld [vmem:[#allocation9 + $0x7e8] sm:$0xff]  ;;  %v3101_v22 = vld [vmem:[#allocation9 + $0x5d8] sm:$0xff] }
 0x36c   :  { %3332 = vmatprep.subr.mxu0 %v3065_v23  ;;  %3402 = vmatpush1.msra.mxu1 %v3130_v13  ;;  %v3166_v23 = vld [vmem:[#allocation9 + $0x7e0] sm:$0xff]  ;;  %v3100_v13 = vld [vmem:[#allocation9 + $0x5d0] sm:$0xff] }
 0x36d   :  { %3333 = vmatpush1.msra.mxu0 %v3064_v24  ;;  %3403 = vmatprep.subr.mxu1 %v3129_v6  ;;  %v3165_v24 = vld [vmem:[#allocation9 + $0x7d8] sm:$0xff]  ;;  %v3099_v6 = vld [vmem:[#allocation9 + $0x5c8] sm:$0xff] }
 0x36e   :  { %3334 = vmatprep.subr.mxu0 %v3063_v32  ;;  %3404 = vmatpush1.msra.mxu1 %v3128_v33  ;;  %v3164_v32 = vld [vmem:[#allocation9 + $0x7d0] sm:$0xff]  ;;  %v3098_v33 = vld [vmem:[#allocation9 + $0x5c0] sm:$0xff] }
 0x36f   :  { %3335 = vmatpush1.msra.mxu0 %v3062_v44  ;;  %3405 = vmatprep.subr.mxu1 %v3127_v1  ;;  %v3163_v44 = vld [vmem:[#allocation9 + $0x7c8] sm:$0xff]  ;;  %v3097_v1 = vld [vmem:[#allocation9 + $0x5b8] sm:$0xff] }
 0x370   :  { %3336 = vmatprep.subr.mxu0 %v3061_v46  ;;  %3406 = vmatpush1.msra.mxu1 %v3126_v34  ;;  %v3162_v46 = vld [vmem:[#allocation9 + $0x7c0] sm:$0xff]  ;;  %v3096_v34 = vld [vmem:[#allocation9 + $0x5b0] sm:$0xff] }
 0x371   :  { %3337 = vmatpush1.msra.mxu0 %v3060_v43  ;;  %3407 = vmatprep.subr.mxu1 %v3125_v45  ;;  %v3161_v43 = vld [vmem:[#allocation9 + $0x7b8] sm:$0xff]  ;;  %v3095_v45 = vld [vmem:[#allocation9 + $0x5a8] sm:$0xff] }
 0x372   :  { %3338 = vmatprep.subr.mxu0 %v3059_v35  ;;  %3408 = vmatpush1.msra.mxu1 %v3124_v36  ;;  %v3160_v35 = vld [vmem:[#allocation9 + $0x7b0] sm:$0xff]  ;;  %v3094_v36 = vld [vmem:[#allocation9 + $0x5a0] sm:$0xff] }
 0x373   :  { %3339 = vmatpush1.msra.mxu0 %v3058_v26  ;;  %3409 = vmatprep.subr.mxu1 %v3123_v37  ;;  %v3159_v26 = vld [vmem:[#allocation9 + $0x7a8] sm:$0xff]  ;;  %v3093_v37 = vld [vmem:[#allocation9 + $0x598] sm:$0xff] }
 0x374   :  { %3340 = vmatprep.subr.mxu0 %v3057_v28  ;;  %3410 = vmatpush1.msra.mxu1 %v3122_v25  ;;  %v3158_v28 = vld [vmem:[#allocation9 + $0x7a0] sm:$0xff]  ;;  %v3092_v25 = vld [vmem:[#allocation9 + $0x590] sm:$0xff] }
 0x375   :  { %3341 = vmatpush1.msra.mxu0 %v3056_v57  ;;  %3411 = vmatprep.subr.mxu1 %v3121_v7  ;;  %v3157_v57 = vld [vmem:[#allocation9 + $0x798] sm:$0xff]  ;;  %v3091_v7 = vld [vmem:[#allocation9 + $0x588] sm:$0xff] }
 0x376   :  { %3342 = vmatprep.subr.mxu0 %v3055_v27  ;;  %3412 = vmatpush1.msra.mxu1 %v3120_v39  ;;  %v3156_v27 = vld [vmem:[#allocation9 + $0x790] sm:$0xff]  ;;  %v3090_v39 = vld [vmem:[#allocation9 + $0x580] sm:$0xff] }
 0x377   :  { %3343 = vmatpush1.msra.mxu0 %v3054_v40  ;;  %3413 = vmatprep.subr.mxu1 %v3119_v41  ;;  %v3155_v40 = vld [vmem:[#allocation9 + $0x788] sm:$0xff]  ;;  %v3089_v41 = vld [vmem:[#allocation9 + $0x578] sm:$0xff] }
 0x378   :  { %3344 = vmatprep.subr.mxu0 %v3053_v42  ;;  %3414 = vmatpush1.msra.mxu1 %v3118_v30  ;;  %v3154_v42 = vld [vmem:[#allocation9 + $0x780] sm:$0xff]  ;;  %v3088_v30 = vld [vmem:[#allocation9 + $0x570] sm:$0xff] }
 0x379   :  { %3345 = vmatpush1.msra.mxu0 %v3052_v52  ;;  %3415 = vmatprep.subr.mxu1 %v3117_v48  ;;  %v3153_v52 = vld [vmem:[#allocation9 + $0x778] sm:$0xff]  ;;  %v3087_v48 = vld [vmem:[#allocation9 + $0x568] sm:$0xff] }
 0x37a   :  { %3346 = vmatprep.subr.mxu0 %v3051_v49  ;;  %3416 = vmatpush1.msra.mxu1 %v3116_v54  ;;  %v3152_v49 = vld [vmem:[#allocation9 + $0x770] sm:$0xff]  ;;  %v3086_v54 = vld [vmem:[#allocation9 + $0x560] sm:$0xff] }
 0x37b   :  { %3347 = vmatpush1.msra.mxu0 %v3050_v59  ;;  %3417 = vmatprep.subr.mxu1 %v3115_v61  ;;  %v3151_v59 = vld [vmem:[#allocation9 + $0x768] sm:$0xff]  ;;  %v3085_v61 = vld [vmem:[#allocation9 + $0x558] sm:$0xff] }
 0x37c   :  { %3348 = vmatprep.subr.mxu0 %v3049_v51  ;;  %3418 = vmatpush1.msra.mxu1 %v3114_v63  ;;  %v3150_v51 = vld [vmem:[#allocation9 + $0x760] sm:$0xff]  ;;  %v3084_v63 = vld [vmem:[#allocation9 + $0x550] sm:$0xff] }
 0x37d   :  { %3349 = vmatpush1.msra.mxu0 %v3048_v0  ;;  %3419 = vmatprep.subr.mxu1 %v3113_v2  ;;  %v3149_v0 = vld [vmem:[#allocation9 + $0x758] sm:$0xff]  ;;  %v3083_v2 = vld [vmem:[#allocation9 + $0x548] sm:$0xff] }
 0x37e   :  { %3350 = vmatprep.subr.mxu0 %v3047_v5  ;;  %3420 = vmatpush1.msra.mxu1 %v3112_v29  ;;  %v3148_v5 = vld [vmem:[#allocation9 + $0x750] sm:$0xff]  ;;  %v3082_v29 = vld [vmem:[#allocation9 + $0x540] sm:$0xff] }
 0x37f   :  { %3351 = vmatpush1.msra.mxu0 %v3046_v8  ;;  %3421 = vmatprep.subr.mxu1 %v3111_v12  ;;  %v3147_v8 = vld [vmem:[#allocation9 + $0x748] sm:$0xff]  ;;  %v3081_v12 = vld [vmem:[#allocation9 + $0x538] sm:$0xff] }
 0x380   :  { %3352 = vmatprep.subr.mxu0 %v3045_v60  ;;  %3422 = vmatpush1.msra.mxu1 %v3110_v11  ;;  %v3146_v60 = vld [vmem:[#allocation9 + $0x740] sm:$0xff]  ;;  %v3080_v11 = vld [vmem:[#allocation9 + $0x530] sm:$0xff] }
 0x381   :  { %3353 = vmatpush1.msra.mxu0 %v3044_v31  ;;  %3423 = vmatprep.subr.mxu1 %v3109_v14  ;;  %v3145_v31 = vld [vmem:[#allocation9 + $0x738] sm:$0xff]  ;;  %v3079_v14 = vld [vmem:[#allocation9 + $0x528] sm:$0xff] }
 0x382   :  { %3354 = vmatprep.subr.mxu0 %v3043_v10  ;;  %3424 = vmatpush1.msra.mxu1 %v3108_v15  ;;  %v3144_v10 = vld [vmem:[#allocation9 + $0x730] sm:$0xff]  ;;  %v3078_v15 = vld [vmem:[#allocation9 + $0x520] sm:$0xff] }
 0x383   :  { %3355 = vmatpush1.msra.mxu0 %v3042_v16  ;;  %3425 = vmatprep.subr.mxu1 %v3107_v17  ;;  %v3143_v16 = vld [vmem:[#allocation9 + $0x728] sm:$0xff]  ;;  %v3077_v17 = vld [vmem:[#allocation9 + $0x518] sm:$0xff] }
 0x384   :  { %3356 = vmatprep.subr.mxu0 %v3105_v9  ;;  %3426 = vmatpush1.msra.mxu1 %v3106_v3  ;;  %v3142_v9 = vld [vmem:[#allocation9 + $0x720] sm:$0xff]  ;;  %v3076_v3 = vld [vmem:[#allocation9 + $0x510] sm:$0xff] }
 0x385   :  { %3357 = vmatpush2.msra.mxu0 %v3104_v18  ;;  %3427 = vmatprep.subr.mxu1 %v3169_v19  ;;  %v3141_v18 = vld [vmem:[#allocation9 + $0x718] sm:$0xff]  ;;  %v3075_v19 = vld [vmem:[#allocation9 + $0x508] sm:$0xff] }
 0x386   :  { %3358 = vmatprep.subr.mxu0 %v3103_v53  ;;  %3428 = vmatpush2.msra.mxu1 %v3168_v20  ;;  %v3140_v53 = vld [vmem:[#allocation9 + $0x710] sm:$0xff]  ;;  %v3074_v20 = vld [vmem:[#allocation9 + $0x500] sm:$0xff] }
 0x387   :  { %3359 = vmatpush2.msra.mxu0 %v3102_v55  ;;  %3429 = vmatprep.subr.mxu1 %v3167_v21  ;;  %v3139_v55 = vld [vmem:[#allocation9 + $0x708] sm:$0xff]  ;;  %v3138_v21 = vld [vmem:[#allocation9 + $0x700] sm:$0xff] }
 0x388   :  { %3360 = vmatprep.subr.mxu0 %v3101_v22  ;;  %3430 = vmatpush2.msra.mxu1 %v3166_v23  ;;  %v2910_v22 = vmax.f32 %v3862_v4, 0.0 }
 0x389   :  { %3361 = vmatpush2.msra.mxu0 %v3100_v13  ;;  %3431 = vmatprep.subr.mxu1 %v3165_v24  ;;  %v3510_v13 = vld [vmem:[#allocation7] sm:$0xff] }
 0x38a   :  { %3362 = vmatprep.subr.mxu0 %v3099_v6  ;;  %3432 = vmatpush2.msra.mxu1 %v3164_v32  ;;  %v1757_v24 = vrot.slane %v3510_v13, %v398_v50  ;;  %v1761_v6 = vrot.slane %v3510_v13, %v402_v58  ;;  %v3170_v58 = vld [vmem:[#allocation10] sm:$0x3] }
 0x38b   :  { %3363 = vmatpush2.msra.mxu0 %v3098_v33  ;;  %3433 = vmatprep.subr.mxu1 %v3163_v44 }
 0x38c   :  { %3364 = vmatprep.subr.mxu0 %v3097_v1  ;;  %3434 = vmatpush2.msra.mxu1 %v3162_v46 }
 0x38d   :  { %3365 = vmatpush2.msra.mxu0 %v3096_v34  ;;  %3435 = vmatprep.subr.mxu1 %v3161_v43 }
 0x38e   :  { %3366 = vmatprep.subr.mxu0 %v3095_v45  ;;  %3436 = vmatpush2.msra.mxu1 %v3160_v35 }
 0x38f   :  { %3367 = vmatpush2.msra.mxu0 %v3094_v36  ;;  %3437 = vmatprep.subr.mxu1 %v3159_v26 }
 0x390   :  { %3368 = vmatprep.subr.mxu0 %v3093_v37  ;;  %3438 = vmatpush2.msra.mxu1 %v3158_v28 }
 0x391   :  { %3369 = vmatpush2.msra.mxu0 %v3092_v25  ;;  %3439 = vmatprep.subr.mxu1 %v3157_v57 }
 0x392   :  { %3370 = vmatprep.subr.mxu0 %v3091_v7  ;;  %3440 = vmatpush2.msra.mxu1 %v3156_v27  ;;  %v3175_v27 = vrot.slane %v3170_v58, %v3718_v62 }
 0x393   :  { %3371 = vmatpush2.msra.mxu0 %v3090_v39  ;;  %3441 = vmatprep.subr.mxu1 %v3155_v40  ;;  %v3179_v39 = vrot.slane %v3170_v58, %v3712_v56 }
 0x394   :  { %3372 = vmatprep.subr.mxu0 %v3089_v41  ;;  %3442 = vmatpush2.msra.mxu1 %v3154_v42 }
 0x395   :  { %3373 = vmatpush2.msra.mxu0 %v3088_v30  ;;  %3443 = vmatprep.subr.mxu1 %v3153_v52 }
 0x396   :  { %3374 = vmatprep.subr.mxu0 %v3087_v48  ;;  %3444 = vmatpush2.msra.mxu1 %v3152_v49  ;;  %v3649_v48 = vmov 1966171168  }
 0x397   :  { %3375 = vmatpush2.msra.mxu0 %v3086_v54  ;;  %3445 = vmatprep.subr.mxu1 %v3151_v59  ;;  %v3470_v49 = vunpack.c.l.s4 %v3649_v48 }
 0x398   :  { %3376 = vmatprep.subr.mxu0 %v3085_v61  ;;  %3446 = vmatpush2.msra.mxu1 %v3150_v51 }
 0x399   :  { %3377 = vmatpush2.msra.mxu0 %v3084_v63  ;;  %3447 = vmatprep.subr.mxu1 %v3149_v0  ;;  %v3471_v63 = vunpack.c.0.s8 %v3470_v49 }
 0x39a   :  { %3378 = vmatprep.subr.mxu0 %v3083_v2  ;;  %3448 = vmatpush2.msra.mxu1 %v3148_v5 }
 0x39b   :  { %3379 = vmatpush2.msra.mxu0 %v3082_v29  ;;  %3449 = vmatprep.subr.mxu1 %v3147_v8  ;;  %v3474_v56 = vsub.s32 %v3471_v63, %v3709_v47 }
 0x39c   :  { %3380 = vmatprep.subr.mxu0 %v3081_v12  ;;  %3450 = vmatpush2.msra.mxu1 %v3146_v60 }
 0x39d   :  { %3381 = vmatpush2.msra.mxu0 %v3080_v11  ;;  %3451 = vmatprep.subr.mxu1 %v3145_v31 }
 0x39e   :  { %3382 = vmatprep.subr.mxu0 %v3079_v14  ;;  %3452 = vmatpush2.msra.mxu1 %v3144_v10 }
 0x39f   :  { %3383 = vmatpush2.msra.mxu0 %v3078_v15  ;;  %3453 = vmatprep.subr.mxu1 %v3143_v16  ;;  %v2688_v23 = vpop.f32.mrf.mxu0  ;;  %v2759_v32 = vpop.f32.mrf.mxu1 }
 0x3a0   :  { %3384 = vmatprep.subr.mxu0 %v3077_v17  ;;  %3454 = vmatpush2.msra.mxu1 %v3142_v9  ;;  %v2689_v44 = vadd.f32 %v2688_v23, %v1757_v24 }
 0x3a1   :  { %3385 = vmatpush2.msra.mxu0 %v3076_v3  ;;  %3455 = vmatprep.subr.mxu1 %v3141_v18  ;;  %v2690_v33 = vpop.f32.mrf.mxu0  ;;  %v2761_v46 = vpop.f32.mrf.mxu1 }
 0x3a2   :  { %3386 = vmatprep.subr.mxu0 %v3075_v19  ;;  %3456 = vmatpush2.msra.mxu1 %v3140_v53  ;;  %v2691_v1 = vadd.f32 %v2690_v33, %v1761_v6  ;;  %v2760_v4 = vadd.f32 %v2759_v32, %v2689_v44 }
 0x3a3   :  { %3387 = vmatpush2.msra.mxu0 %v3074_v20  ;;  %3457 = vmatprep.subr.mxu1 %v3139_v55 }
 0x3a4   :  { %3389 = vmatmul.mubr.f32.vlgmr.msra.gmra.mxu0 %v2910_v22  ;;  %3458 = vmatpush2.msra.mxu1 %v3138_v21  ;;  %v2762_v45 = vadd.f32 %v2761_v46, %v2691_v1 }
 0x3e1   :  { %v2830_v34 = vpop.f32.mrf.mxu0  ;;  %v2901_v43 = vpop.f32.mrf.mxu1 }
 0x3e2   :  { %v2831_v35 = vadd.f32 %v2830_v34, %v2760_v4 }
 0x3e3   :  { %v2832_v36 = vpop.f32.mrf.mxu0  ;;  %v2903_v28 = vpop.f32.mrf.mxu1 }
 0x3e4   :  { %v2833_v26 = vadd.f32 %v2832_v36, %v2762_v45  ;;  %v2902_v37 = vadd.f32 %v2901_v43, %v2831_v35 }
 0x3e6   :  { %v2904_v25 = vadd.f32 %v2903_v28, %v2833_v26  ;;  %v2912_v50 = vmax.f32 %v2902_v37, 0.0 }
 0x3e8   :  { %v2913_v57 = vmax.f32 %v2904_v25, 0.0 }
 0x3ea   :  { %3459 = vmatprep.mubr.f32.mxu1 %v2913_v57 }
 0x3eb   :  { %3460 = vmatmul.mubr.f32.vlgmr.msra.gmra.mxu1 %v2912_v50 }
 0x423   :  { %v3248_v7 = vpop.f32.mrf.mxu0  ;;  %v3319_v41 = vpop.f32.mrf.mxu1 }
 0x424   :  { %v3249_v30 = vadd.f32 %v3248_v7, %v3175_v27 }
 0x425   :  { %v3250_v40 = vpop.f32.mrf.mxu0  ;;  %v3321_v54 = vpop.f32.mrf.mxu1 }
 0x426   :  { %v3251_v52 = vadd.f32 %v3250_v40, %v3179_v39  ;;  %v3320_v61 = vadd.f32 %v3319_v41, %v3249_v30 }
 0x428   :  { %v3322_v51 = vadd.f32 %v3321_v54, %v3251_v52 }
 0x464   :  { %v3390_v42 = vpop.f32.mrf.mxu0 }
 0x465   :  { %v3391_v2 = vadd.f32 %v3390_v42, %v3320_v61 }
 0x466   :  { %v3392_v59 = vpop.f32.mrf.mxu0 }
 0x467   :  { %v3393_v5 = vadd.f32 %v3392_v59, %v3322_v51 }
 0x4ab   :  { %v3461_v0 = vpop.f32.mrf.mxu1 }
 0x4ac   :  { %v3462_v8 = vadd.f32 %v3461_v0, %v3391_v2 }
 0x4ad   :  { %v3463_v29 = vpop.f32.mrf.mxu1 }
 0x4ae   :  { %v3464_v62 = vadd.f32 %v3463_v29, %v3393_v5 }
 0x4b0   :  { %v3468_v12 = vcombine.low %v3462_v8, %v3464_v62 }
 0x4b2   :  { %v3475_v60 = vrot.slane %v3468_v12, %v3474_v56 }
 0x4b4   :  { %v3482_v11 = vrot.slane %v3475_v60, %v3474_v56 }
 0x4b6   :  { %3488 = vst.msk [vmem:[%s3885_s7] sm:$0x3] %vm3486_vm0, %v3482_v11 }
 0x4b7   :  { %3493 = vsyncpa [#allocation3], 1 }
 0x4b8   :  { %3494 = vsyncpa [#allocation5], 1 }
 0x4b9   :  { %3495 = vsyncpa [#allocation8], 1 }
 0x4ba   :  { %3496 = vsyncpa [#allocation11], 1 }

</bundles_post_ra>
